<compile_context>
chip_gen: v5e
topology: v5e:2x2
jax: 0.10.0
libtpu: 0.0.40
codegen_flags: <defaults>
</compile_context>

<pallas_src>
import math

import jax
import jax.numpy as jnp
from jax import lax
from jax.experimental import pallas as pl
from jax.experimental.pallas import tpu as pltpu


def _round_up(n, m):
    return ((n + m - 1) // m) * m


# --------------------------------------------------------------------------
# Pallas kernel 1: row-tiled linear projection (bf16 MXU, lane-dense output)
# --------------------------------------------------------------------------

def _linear_kernel(x_ref, w_ref, b_ref, o_ref):
    # x: (TM, K) bf16, w: (K, Dp) bf16 (VMEM-resident), b: (1, Dp) f32
    acc = jnp.dot(x_ref[...], w_ref[...], preferred_element_type=jnp.float32)
    o_ref[...] = (acc + b_ref[...]).astype(o_ref.dtype)


def linear_pallas(x, w, b):
    """x: (N, K) bf16/f32, w: (K, D) f32, b: (1, D) f32 -> (N, Dp) bf16.

    The output channel dim is padded up to Dp = round_up(D, 128) with exact
    zeros (zero weight columns + zero bias pads) and is NOT sliced here: the
    lane-dense Dp layout is carried through the rest of the pipeline."""
    N, K = x.shape
    D = w.shape[1]
    Dp = _round_up(D, 128)

    # Row tile: multiple of 16 (bf16 sublane packing); big tiles amortize the
    # ~0.35 us per-grid-step overhead.  Halve once if that would leave a
    # single-step grid, so the v7x megacore 'parallel' axis has >= 2 steps.
    TM = min(1024, _round_up(N, 16))
    Np = _round_up(N, TM)
    if Np // TM == 1 and TM >= 32 and TM % 32 == 0:
        TM //= 2
        Np = _round_up(N, TM)

    x_p = jnp.pad(x.astype(jnp.bfloat16), ((0, Np - N), (0, 0)))
    w_p = jnp.pad(w.astype(jnp.bfloat16), ((0, 0), (0, Dp - D)))
    b_p = jnp.pad(b.reshape(1, D).astype(jnp.float32), ((0, 0), (0, Dp - D)))

    out = pl.pallas_call(
        _linear_kernel,
        out_shape=jax.ShapeDtypeStruct((Np, Dp), jnp.bfloat16),
        grid=(Np // TM,),
        in_specs=[
            pl.BlockSpec((TM, K), lambda i: (i, 0)),
            pl.BlockSpec((K, Dp), lambda i: (0, 0)),   # weight stays resident
            pl.BlockSpec((1, Dp), lambda i: (0, 0)),
        ],
        out_specs=pl.BlockSpec((TM, Dp), lambda i: (i, 0)),
        compiler_params=pltpu.CompilerParams(
            dimension_semantics=("parallel",)),
    )(x_p, w_p, b_p)
    return out[:N]          # keep all Dp channels (lane-dense), drop row pads


# --------------------------------------------------------------------------
# Pallas kernel 2: fused softmax(scores/0.1) + GPO weighted pooling + l2norm
# --------------------------------------------------------------------------

def _pool_l2norm_kernel(score_ref, feat_ref, o_ref):
    # score: (TB, Lp) f32 (sentinel -1e4 at masked / padded positions)
    # feat : (TB, Dp, Lp) bf16, sorted descending over Lp; positions beyond
    #        each caption's length hold the -1e4 sort sentinel.
    scores = score_ref[...]
    m = jnp.max(scores, axis=-1, keepdims=True)
    e = jnp.exp(scores - m)
    denom = jnp.sum(e, axis=-1, keepdims=True)
    # Zero the weights at sentinel positions (equivalent to the reference's
    # post-sort masked_fill(..., 0) on the features); exact division.
    valid = scores > -5000.0
    w = jnp.where(valid, e, 0.0) / denom                         # (TB, Lp) f32

    # Weighted sum over L: VPU multiply + lane reduce, f32 accumulation
    # (bf16 * f32 promotes to f32).  No M=1 MXU matmuls.
    pooled = jnp.sum(feat_ref[...] * w[:, None, :], axis=-1)     # (TB, Dp) f32

    # l2norm, exact (reference: x / (sqrt(sum(x^2)) + eps)); pad channels are
    # exact zeros so the norm over Dp equals the norm over the real D.
    norm = jnp.sqrt(jnp.sum(pooled * pooled, axis=-1, keepdims=True)) + 1e-8
    o_ref[...] = pooled / norm


def pool_l2norm_pallas(scores, sorted_feats_t):
    """scores: (B, L) f32 (masked to -1e4); sorted_feats_t: (B, Dp, L) bf16.
    Returns l2-normalized pooled features (B, Dp) f32."""
    B, Dp, L = sorted_feats_t.shape
    Lp = _round_up(L, 128)        # lane-dense sequence axis for the reduces
    TB = 8
    Bp = _round_up(B, TB)         # bounded blocks; no full-extent fallback

    scores_p = jnp.pad(scores, ((0, Bp - B), (0, Lp - L)),
                       constant_values=-10000.0)
    feats_p = jnp.pad(sorted_feats_t, ((0, Bp - B), (0, 0), (0, Lp - L)))

    pooled = pl.pallas_call(
        _pool_l2norm_kernel,
        out_shape=jax.ShapeDtypeStruct((Bp, Dp), jnp.float32),
        grid=(Bp // TB,),
        in_specs=[
            pl.BlockSpec((TB, Lp), lambda i: (i, 0)),
            pl.BlockSpec((TB, Dp, Lp), lambda i: (i, 0, 0)),
        ],
        out_specs=pl.BlockSpec((TB, Dp), lambda i: (i, 0)),
        compiler_params=pltpu.CompilerParams(
            dimension_semantics=("parallel",)),
    )(scores_p, feats_p)
    return pooled[:B]


# --------------------------------------------------------------------------
# GPO pieces (plain-JAX glue)
# --------------------------------------------------------------------------

def positional_encoding_1d(d_model, length):
    position = jnp.arange(length, dtype=jnp.float32)[:, None]
    div_term = jnp.exp(
        jnp.arange(0, d_model, 2, dtype=jnp.float32) * -(math.log(10000.0) / d_model)
    )
    pe_sin = jnp.sin(position * div_term)
    pe_cos = jnp.cos(position * div_term)
    # interleave: pe[:, 0::2] = sin, pe[:, 1::2] = cos
    return jnp.stack([pe_sin, pe_cos], axis=-1).reshape(length, d_model)


def gru_scan(xs, params):
    """Unidirectional GRU over time.  xs: (L, B, I) -> outputs (L, B, H)."""
    w_ih, w_hh, b_ih, b_hh = params
    H = w_hh.shape[1]
    B = xs.shape[1]

    def step(h, x):
        gi = x @ w_ih.T + b_ih
        gh = h @ w_hh.T + b_hh
        i_r, i_z, i_n = jnp.split(gi, 3, axis=-1)
        h_r, h_z, h_n = jnp.split(gh, 3, axis=-1)
        r = jax.nn.sigmoid(i_r + h_r)
        z = jax.nn.sigmoid(i_z + h_z)
        n = jnp.tanh(i_n + r * h_n)
        h_new = (1.0 - z) * n + z * h
        return h_new, h_new

    h0 = jnp.zeros((B, H), jnp.float32)
    _, ys = lax.scan(step, h0, xs)
    return ys


def gpo_forward(params, features, lengths):
    """GPO(32, 32): GRU-generated pooling weights over sorted features.
    features: (B, L, Dp) bf16, lane-dense channels (pad channels exact zero).
    Returns l2-normalized pooled features (B, Dp) f32."""
    B, L, Dp = features.shape
    d_pe = 32
    max_len = L  # synthetic run: lengths.max() == L (static shapes)

    pe = positional_encoding_1d(d_pe, max_len)                  # (L, d_pe)
    pes = jnp.broadcast_to(pe[None], (B, max_len, d_pe))
    mask = jnp.arange(max_len)[None, :] < lengths[:, None]      # (B, L) bool
    pes = jnp.where(mask[..., None], pes, 0.0)

    # forward direction (pack_padded semantics: valid prefix first)
    out_f = gru_scan(jnp.transpose(pes, (1, 0, 2)), params["gru_fwd"])
    out_f = jnp.transpose(out_f, (1, 0, 2))                     # (B, L, H)

    # backward direction: reverse the valid prefix of each sequence
    t = jnp.arange(max_len)
    rev_idx = jnp.where(
        t[None, :] < lengths[:, None], lengths[:, None] - 1 - t[None, :], t[None, :]
    )
    pes_rev = jnp.take_along_axis(pes, rev_idx[..., None], axis=1)
    out_b = gru_scan(jnp.transpose(pes_rev, (1, 0, 2)), params["gru_bwd"])
    out_b = jnp.transpose(out_b, (1, 0, 2))
    out_b = jnp.take_along_axis(out_b, rev_idx[..., None], axis=1)

    out_emb = (out_f + out_b) / 2.0
    # temperature 0.1 folded into the score projection:
    # softmax(s / 0.1) == softmax((10 * w) @ x); -1e4 sentinel not rescaled.
    scores = (out_emb @ (10.0 * params["gpo_lin_w"]).T)[..., 0]  # (B, L)
    scores = jnp.where(mask, scores, -10000.0)

    # Per-channel descending sort (reference: masked_fill(-1e4) -> sort ->
    # masked_fill(0)).  Done over the MINOR axis in (B, Dp, L) layout so XLA
    # does not transpose twice; the post-sort re-zeroing of the sentinels is
    # folded into the pooling kernel (score > -5000 test).
    # TODO(synk): a Pallas bitonic sort over L lanes would remove this XLA op.
    feats_t = jnp.transpose(features, (0, 2, 1))                 # (B, Dp, L) bf16
    feats_t = jnp.where(mask[:, None, :], feats_t, -10000.0)
    sorted_t = -jnp.sort(-feats_t, axis=-1)                      # descending

    # softmax + weighted pooling + l2norm fused in one Pallas kernel.
    # (pool_weights are not needed by EncoderText.forward and are not emitted)
    return pool_l2norm_pallas(scores, sorted_t)


# --------------------------------------------------------------------------
# EncoderText forward
# --------------------------------------------------------------------------

def encoder_text_forward(params, x, lengths):
    """x: (B, L) int32 token ids; lengths: (B,) int32."""
    bert_attention_mask = x != 0                                 # (B, L) bool

    # TODO(synk): the pretrained BertModel backbone has no clean Pallas
    # equivalent; it is replaced by a deterministic bf16 token-embedding
    # lookup (mask folded into the gather so the (B*L, 768) activation is
    # written exactly once, in bf16).
    # TODO(synk): fully fusing this gather into the projection kernel via
    # scalar-prefetched token ids is left for a follow-up.
    bert_emb = jnp.where(bert_attention_mask[..., None],
                         params["embed_table"][x], 0).astype(jnp.bfloat16)

    B, L = x.shape
    D = params["lin_w"].shape[1]

    # linear 768 -> embed_size on the MXU (bf16 operands, f32 accum, bf16 out,
    # lane-dense Dp channels carried forward).
    cap_emb = linear_pallas(
        bert_emb.reshape(B * L, 768), params["lin_w"], params["lin_b"]
    )
    Dp = cap_emb.shape[-1]
    cap_emb = cap_emb.reshape(B, L, Dp)

    pooled = gpo_forward(params, cap_emb, lengths)               # (B, Dp) f32
    # l2norm(dim=-1) is fused into the pooling kernel; slice the real channels.
    return pooled[:, :D]


# --------------------------------------------------------------------------
# deterministic parameter init + driver
# --------------------------------------------------------------------------

def init_params(key, vocab_size=100, embed_size=32, d_pe=32, d_hidden=32):
    ks = jax.random.split(key, 12)
    p = {}
    p["embed_table"] = (
        0.02 * jax.random.normal(ks[0], (vocab_size, 768), jnp.float32)
    ).astype(jnp.bfloat16)
    p["lin_w"] = 0.02 * jax.random.normal(ks[1], (768, embed_size), jnp.float32)
    p["lin_b"] = 0.01 * jax.random.normal(ks[2], (1, embed_size), jnp.float32)

    def gru_params(k):
        k1, k2, k3, k4 = jax.random.split(k, 4)
        s = 1.0 / math.sqrt(d_hidden)
        return (
            jax.random.uniform(k1, (3 * d_hidden, d_pe), jnp.float32, -s, s),
            jax.random.uniform(k2, (3 * d_hidden, d_hidden), jnp.float32, -s, s),
            jax.random.uniform(k3, (3 * d_hidden,), jnp.float32, -s, s),
            jax.random.uniform(k4, (3 * d_hidden,), jnp.float32, -s, s),
        )

    p["gru_fwd"] = gru_params(ks[3])
    p["gru_bwd"] = gru_params(ks[4])
    p["gpo_lin_w"] = 0.1 * jax.random.normal(ks[5], (1, d_hidden), jnp.float32)
    return p


if __name__ == "__main__":
    key = jax.random.PRNGKey(0)
    k_param, k_tok = jax.random.split(key)

    B, L, embed_size = 2, 8, 32
    params = init_params(k_param, vocab_size=100, embed_size=embed_size)

    lengths = jnp.array([8, 5], dtype=jnp.int32)
    tokens = jax.random.randint(k_tok, (B, L), 1, 100, dtype=jnp.int32)
    # zero-pad beyond each caption's length (token id 0 == [PAD])
    tokens = jnp.where(jnp.arange(L)[None, :] < lengths[:, None], tokens, 0)

    pooled = jax.jit(encoder_text_forward)(params, tokens, lengths)
    pooled = jax.block_until_ready(pooled)

    assert pooled.shape == (B, embed_size)
    assert bool(jnp.all(jnp.isfinite(pooled)))
    print("KERNEL_OK")
</pallas_src>

<mosaic_0001>
module attributes {stable_mosaic.version = 11 : i64} {
  func.func @_linear_kernel(%arg0: i32, %arg1: memref<16x768xbf16, #tpu.memory_space<vmem>>, %arg2: memref<768x128xbf16, #tpu.memory_space<vmem>>, %arg3: memref<1x128xf32, #tpu.memory_space<vmem>>, %arg4: memref<16x128xbf16, #tpu.memory_space<vmem>>) attributes {dimension_semantics = [#tpu.dimension_semantics<parallel>], iteration_bounds = array<i64: 1>, scalar_prefetch = 0 : i64, scratch_operands = 0 : i64, tpu.core_type = #tpu.core_type<tc>, window_params = [{transform_indices = @transform_0, window_bounds = array<i64: 16, 768>}, {pipeline_mode = #tpu.pipeline_mode<synchronous>, transform_indices = @transform_1, window_bounds = array<i64: 768, 128>}, {pipeline_mode = #tpu.pipeline_mode<synchronous>, transform_indices = @transform_2, window_bounds = array<i64: 1, 128>}, {transform_indices = @transform_3, window_bounds = array<i64: 16, 128>}]} {
    %c0 = arith.constant 0 : index
    %c0_0 = arith.constant 0 : index
    %0 = vector.load %arg1[%c0, %c0_0] : memref<16x768xbf16, #tpu.memory_space<vmem>>, vector<16x768xbf16>
    %c0_1 = arith.constant 0 : index
    %c0_2 = arith.constant 0 : index
    %1 = vector.load %arg2[%c0_1, %c0_2] : memref<768x128xbf16, #tpu.memory_space<vmem>>, vector<768x128xbf16>
    %cst = arith.constant dense<0.000000e+00> : vector<16x128xf32>
    %2 = tpu.matmul %0, %1, %cst {dimension_numbers = #tpu.dot_dimension_numbers<[1], [0], [0], [1], [0, 0, 1, 1], [], []>} : vector<16x768xbf16>, vector<768x128xbf16>, vector<16x128xf32> -> vector<16x128xf32>
    %c0_3 = arith.constant 0 : index
    %c0_4 = arith.constant 0 : index
    %3 = vector.load %arg3[%c0_3, %c0_4] : memref<1x128xf32, #tpu.memory_space<vmem>>, vector<1x128xf32>
    %4 = vector.broadcast %3 : vector<1x128xf32> to vector<16x128xf32>
    %5 = arith.addf %2, %4 : vector<16x128xf32>
    %6 = arith.truncf %5 : vector<16x128xf32> to vector<16x128xbf16>
    %c0_5 = arith.constant 0 : index
    %c0_6 = arith.constant 0 : index
    %7 = vector.load %arg4[%c0_5, %c0_6] : memref<16x128xbf16, #tpu.memory_space<vmem>>, vector<16x128xbf16>
    tpu.vector_store %arg4[%c0_5, %c0_6], %6 {strides = array<i32>} : memref<16x128xbf16, #tpu.memory_space<vmem>>, vector<16x128xbf16>,
    return
  }
  func.func @transform_0(%arg0: i32) -> (i32, i32) {
    %c0_i32 = arith.constant 0 : i32
    %c0_i32_0 = arith.constant 0 : i32
    return %arg0, %c0_i32 : i32, i32
  }
  func.func @transform_1(%arg0: i32) -> (i32, i32) {
    %c0_i32 = arith.constant 0 : i32
    %c0_i32_0 = arith.constant 0 : i32
    %c0_i32_1 = arith.constant 0 : i32
    return %c0_i32, %c0_i32_0 : i32, i32
  }
  func.func @transform_2(%arg0: i32) -> (i32, i32) {
    %c0_i32 = arith.constant 0 : i32
    %c0_i32_0 = arith.constant 0 : i32
    %c0_i32_1 = arith.constant 0 : i32
    return %c0_i32, %c0_i32_0 : i32, i32
  }
  func.func @transform_3(%arg0: i32) -> (i32, i32) {
    %c0_i32 = arith.constant 0 : i32
    %c0_i32_0 = arith.constant 0 : i32
    return %arg0, %c0_i32 : i32, i32
  }
}

module attributes {stable_mosaic.version = 11 : i64} {
  func.func @_pool_l2norm_kernel(%arg0: i32, %arg1: memref<8x128xf32, #tpu.memory_space<vmem>>, %arg2: memref<8x128x128xbf16, #tpu.memory_space<vmem>>, %arg3: memref<8x128xf32, #tpu.memory_space<vmem>>) attributes {dimension_semantics = [#tpu.dimension_semantics<parallel>], iteration_bounds = array<i64: 1>, scalar_prefetch = 0 : i64, scratch_operands = 0 : i64, tpu.core_type = #tpu.core_type<tc>, window_params = [{transform_indices = @transform_0, window_bounds = array<i64: 8, 128>}, {transform_indices = @transform_1, window_bounds = array<i64: 8, 128, 128>}, {transform_indices = @transform_2, window_bounds = array<i64: 8, 128>}]} {
    %c0 = arith.constant 0 : index
    %c0_0 = arith.constant 0 : index
    %0 = vector.load %arg1[%c0, %c0_0] : memref<8x128xf32, #tpu.memory_space<vmem>>, vector<8x128xf32>
    %cst = arith.constant dense<0xFF800000> : vector<8xf32>
    %1 = vector.multi_reduction <maximumf>, %0, %cst [1] : vector<8x128xf32> to vector<8xf32>
    %2 = vector.shape_cast %1 : vector<8xf32> to vector<8x1xf32>
    %3 = vector.broadcast %2 : vector<8x1xf32> to vector<8x128xf32>
    %4 = arith.subf %0, %3 : vector<8x128xf32>
    %5 = math.exp %4 : vector<8x128xf32>
    %cst_1 = arith.constant dense<0.000000e+00> : vector<8xf32>
    %6 = vector.multi_reduction <add>, %5, %cst_1 [1] : vector<8x128xf32> to vector<8xf32>
    %7 = vector.shape_cast %6 : vector<8xf32> to vector<8x1xf32>
    %cst_2 = arith.constant -5.000000e+03 : f32
    %8 = vector.broadcast %cst_2 : f32 to vector<8x128xf32>
    %9 = arith.cmpf ogt, %0, %8 : vector<8x128xf32>
    %cst_3 = arith.constant 0.000000e+00 : f32
    %10 = vector.broadcast %cst_3 : f32 to vector<8x128xf32>
    %11 = arith.select %9, %5, %10 : vector<8x128xi1>, vector<8x128xf32>
    %12 = vector.broadcast %7 : vector<8x1xf32> to vector<8x128xf32>
    %13 = arith.divf %11, %12 : vector<8x128xf32>
    %c0_4 = arith.constant 0 : index
    %c0_5 = arith.constant 0 : index
    %c0_6 = arith.constant 0 : index
    %14 = vector.load %arg2[%c0_4, %c0_5, %c0_6] : memref<8x128x128xbf16, #tpu.memory_space<vmem>>, vector<8x128x128xbf16>
    %15 = vector.shape_cast %13 : vector<8x128xf32> to vector<8x1x128xf32>
    %16 = arith.extf %14 : vector<8x128x128xbf16> to vector<8x128x128xf32>
    %17 = vector.broadcast %15 : vector<8x1x128xf32> to vector<8x128x128xf32>
    %18 = arith.mulf %16, %17 : vector<8x128x128xf32>
    %cst_7 = arith.constant dense<0.000000e+00> : vector<8x128xf32>
    %19 = vector.multi_reduction <add>, %18, %cst_7 [2] : vector<8x128x128xf32> to vector<8x128xf32>
    %20 = arith.mulf %19, %19 : vector<8x128xf32>
    %cst_8 = arith.constant dense<0.000000e+00> : vector<8xf32>
    %21 = vector.multi_reduction <add>, %20, %cst_8 [1] : vector<8x128xf32> to vector<8xf32>
    %22 = vector.shape_cast %21 : vector<8xf32> to vector<8x1xf32>
    %23 = math.sqrt %22 : vector<8x1xf32>
    %cst_9 = arith.constant 9.99999993E-9 : f32
    %24 = vector.broadcast %cst_9 : f32 to vector<8x1xf32>
    %25 = arith.addf %23, %24 : vector<8x1xf32>
    %26 = vector.broadcast %25 : vector<8x1xf32> to vector<8x128xf32>
    %27 = arith.divf %19, %26 : vector<8x128xf32>
    %c0_10 = arith.constant 0 : index
    %c0_11 = arith.constant 0 : index
    %28 = vector.load %arg3[%c0_10, %c0_11] : memref<8x128xf32, #tpu.memory_space<vmem>>, vector<8x128xf32>
    tpu.vector_store %arg3[%c0_10, %c0_11], %27 {strides = array<i32>} : memref<8x128xf32, #tpu.memory_space<vmem>>, vector<8x128xf32>,
    return
  }
  func.func @transform_0(%arg0: i32) -> (i32, i32) {
    %c0_i32 = arith.constant 0 : i32
    %c0_i32_0 = arith.constant 0 : i32
    return %arg0, %c0_i32 : i32, i32
  }
  func.func @transform_1(%arg0: i32) -> (i32, i32, i32) {
    %c0_i32 = arith.constant 0 : i32
    %c0_i32_0 = arith.constant 0 : i32
    %c0_i32_1 = arith.constant 0 : i32
    return %arg0, %c0_i32, %c0_i32_0 : i32, i32, i32
  }
  func.func @transform_2(%arg0: i32) -> (i32, i32) {
    %c0_i32 = arith.constant 0 : i32
    %c0_i32_0 = arith.constant 0 : i32
    return %arg0, %c0_i32 : i32, i32
  }
}

</mosaic_0001>

<bundles_post_ra>
// kernel: custom-call.10
= control target key start
LH: loop header
LB: loop body
LE: loop exit
PB: predicated region body
PF: predicated region fallthrough
CT: control target
= control target key end

     0   :  { %s6_s0 = inlined_call_operand.vmem [shape: f32[8,2,32], index: 0, kind: output, shape index: {}]  }

// kernel: custom-call.5
= control target key start
LH: loop header
LB: loop body
LE: loop exit
PB: predicated region body
PF: predicated region fallthrough
CT: control target
= control target key end

     0   :  { %s6_s0 = inlined_call_operand.vmem [shape: f32[2,32], index: 0, kind: output, shape index: {}]  }

// kernel: custom-call.11
= control target key start
LH: loop header
LB: loop body
LE: loop exit
PB: predicated region body
PF: predicated region fallthrough
CT: control target
= control target key end

     0   :  { %s6_s0 = inlined_call_operand.vmem [shape: f32[8,2,32], index: 0, kind: output, shape index: {}]  }

// kernel: neg.11
= control target key start
LH: loop header
LB: loop body
LE: loop exit
PB: predicated region body
PF: predicated region fallthrough
CT: control target
= control target key end

     0   :  { %s43_s0 = inlined_call_operand.vmem [shape: bf16[2,128,8], index: 0, kind: input, shape index: {}]   ;;  %s44_s1 = inlined_call_operand.vmem [shape: bf16[2,128,8], index: 1, kind: output, shape index: {}]  }
   0x1   :  { %v2_v0 = vld [vmem:[%s43_s0] sm:$0xff]  }
   0x2   :  { %v3_v1 = vunpack.c.l.bf16 %v2_v0  ;;  %v13_v2 = vunpack.c.h.bf16 %v2_v0 }
   0x4   :  { %v7_v3 = vxor.u32 2147483648, %v3_v1  ;;  %v17_v4 = vxor.u32 2147483648, %v13_v2 }
   0x6   :  { %v9_v5 = vpack.c.bf16 0.0, %v7_v3  ;;  %v20_v6 = vpack.c.bf16 0.0, %v17_v4 }
   0x8   :  { %10 = vst [vmem:[%s44_s1] sm:$0xf] %v9_v5 }
   0x9   :  { %23 = vst [vmem:[%s44_s1 + $0x4] sm:$0xf] %v20_v6 }

// kernel: encoder_text_forward.2
= control target key start
LH: loop header
LB: loop body
LE: loop exit
PB: predicated region body
PF: predicated region fallthrough
CT: control target
= control target key end

     0   :  { %s1012_s1 = inlined_call_operand.vmem [shape: bf16[768,128], index: 1, kind: input, shape index: {}]   ;;  %s1013_s2 = inlined_call_operand.vmem [shape: f32[1,128], index: 2, kind: input, shape index: {}]   ;;  %s1014_s0 = inlined_call_operand.vmem [shape: bf16[16,768], index: 0, kind: input, shape index: {}]   ;;  %s1015_s3 = inlined_call_operand.vmem [shape: bf16[16,128], index: 3, kind: output, shape index: {}]  }
   0x1   :  { %v759_v0 = vld [vmem:[%s1012_s1 + $0x38] sm:$0xff]  ;;  %v758_v4 = vld [vmem:[%s1012_s1 + $0x30] sm:$0xff]  ;;  %v757_v8 = vld [vmem:[%s1012_s1 + $0x28] sm:$0xff] }
   0x2   :  { %v767_v1 = vld [vmem:[%s1012_s1 + $0x78] sm:$0xff]  ;;  %438 = vmatpush.bf16.msra.mxu0 %v759_v0  ;;  %v766_v5 = vld [vmem:[%s1012_s1 + $0x70] sm:$0xff]  ;;  %v765_v9 = vld [vmem:[%s1012_s1 + $0x68] sm:$0xff] }
   0x3   :  { %v775_v2 = vld [vmem:[%s1012_s1 + $0xb8] sm:$0xff]  ;;  %452 = vmatpush.bf16.msra.mxu1 %v767_v1  ;;  %v774_v6 = vld [vmem:[%s1012_s1 + $0xb0] sm:$0xff]  ;;  %v773_v10 = vld [vmem:[%s1012_s1 + $0xa8] sm:$0xff] }
   0x4   :  { %v783_v3 = vld [vmem:[%s1012_s1 + $0xf8] sm:$0xff]  ;;  %466 = vmatpush.bf16.msra.mxu2 %v775_v2  ;;  %v782_v7 = vld [vmem:[%s1012_s1 + $0xf0] sm:$0xff]  ;;  %v781_v11 = vld [vmem:[%s1012_s1 + $0xe8] sm:$0xff] }
   0x5   :  { %480 = vmatpush.bf16.msra.mxu3 %v783_v3  ;;  %v756_v12 = vld [vmem:[%s1012_s1 + $0x20] sm:$0xff]  ;;  %v755_v16 = vld [vmem:[%s1012_s1 + $0x18] sm:$0xff]  ;;  %v754_v20 = vld [vmem:[%s1012_s1 + $0x10] sm:$0xff] }
   0x6   :  { %439 = vmatpush.bf16.msra.mxu0 %v758_v4  ;;  %v764_v13 = vld [vmem:[%s1012_s1 + $0x60] sm:$0xff]  ;;  %v763_v17 = vld [vmem:[%s1012_s1 + $0x58] sm:$0xff]  ;;  %v762_v21 = vld [vmem:[%s1012_s1 + $0x50] sm:$0xff] }
   0x7   :  { %453 = vmatpush.bf16.msra.mxu1 %v766_v5  ;;  %v772_v14 = vld [vmem:[%s1012_s1 + $0xa0] sm:$0xff]  ;;  %v771_v18 = vld [vmem:[%s1012_s1 + $0x98] sm:$0xff]  ;;  %v770_v22 = vld [vmem:[%s1012_s1 + $0x90] sm:$0xff] }
   0x8   :  { %467 = vmatpush.bf16.msra.mxu2 %v774_v6  ;;  %v780_v15 = vld [vmem:[%s1012_s1 + $0xe0] sm:$0xff]  ;;  %v779_v19 = vld [vmem:[%s1012_s1 + $0xd8] sm:$0xff]  ;;  %v778_v23 = vld [vmem:[%s1012_s1 + $0xd0] sm:$0xff] }
   0x9   :  { %481 = vmatpush.bf16.msra.mxu3 %v782_v7  ;;  %v753_v24 = vld [vmem:[%s1012_s1 + $0x8] sm:$0xff]  ;;  %v752_v28 = vld [vmem:[%s1012_s1] sm:$0xff]  ;;  %v749_v31 = vld [vmem:[%s1014_s0 + $0x14] sm:$0xf0] }
   0xa   :  { %440 = vmatpush.bf16.msra.mxu0 %v757_v8  ;;  %v761_v25 = vld [vmem:[%s1012_s1 + $0x48] sm:$0xff]  ;;  %v760_v29 = vld [vmem:[%s1012_s1 + $0x40] sm:$0xff]  ;;  %v534_v33 = vld [vmem:[%s1014_s0 + $0x18] sm:$0xf0] }
   0xb   :  { %454 = vmatpush.bf16.msra.mxu1 %v765_v9  ;;  %v769_v26 = vld [vmem:[%s1012_s1 + $0x88] sm:$0xff]  ;;  %v532_v30 = vld [vmem:[%s1014_s0] sm:$0xf]  ;;  %v746_v32 = vld [vmem:[%s1014_s0 + $0x4] sm:$0xf] }
   0xc   :  { %468 = vmatpush.bf16.msra.mxu2 %v773_v10  ;;  %v777_v27 = vld [vmem:[%s1012_s1 + $0xc8] sm:$0xff]  ;;  %v791_v34 = vld [vmem:[%s1012_s1 + $0x138] sm:$0xff]  ;;  %v768_v36 = vld [vmem:[%s1012_s1 + $0x80] sm:$0xff]  ;;  %v533_v40 = vor.u32 %v749_v31, %v532_v30  ;;  %v537_v43 = vor.u32 %v746_v32, %v534_v33 }
   0xd   :  { %482 = vmatpush.bf16.msra.mxu3 %v781_v11  ;;  %v799_v35 = vld [vmem:[%s1012_s1 + $0x178] sm:$0xff]  ;;  %v776_v37 = vld [vmem:[%s1012_s1 + $0xc0] sm:$0xff]  ;;  %v540_v38 = vld [vmem:[%s1014_s0 + $0x8] sm:$0xf] }
   0xe   :  { %441 = vmatpush.bf16.msra.mxu0 %v756_v12  ;;  %v750_v39 = vld [vmem:[%s1014_s0 + $0x1c] sm:$0xf0]  ;;  %v747_v41 = vld [vmem:[%s1014_s0 + $0xc] sm:$0xf]  ;;  %v542_v42 = vld [vmem:[%s1014_s0 + $0x20] sm:$0xf0] }
   0xf   :  { %455 = vmatpush.bf16.msra.mxu1 %v764_v13  ;;  %v790_v44 = vld [vmem:[%s1012_s1 + $0x130] sm:$0xff]  ;;  %v541_v46 = vor.u32 %v750_v39, %v540_v38  ;;  %v545_v47 = vor.u32 %v747_v41, %v542_v42  ;;  %v789_v48 = vld [vmem:[%s1012_s1 + $0x128] sm:$0xff]  ;;  %v788_v50 = vld [vmem:[%s1012_s1 + $0x120] sm:$0xff] }
  0x10   :  { %469 = vmatpush.bf16.msra.mxu2 %v772_v14  ;;  %v798_v45 = vld [vmem:[%s1012_s1 + $0x170] sm:$0xff]  ;;  %v797_v49 = vld [vmem:[%s1012_s1 + $0x168] sm:$0xff]  ;;  %v796_v51 = vld [vmem:[%s1012_s1 + $0x160] sm:$0xff] }
  0x11   :  { %483 = vmatpush.bf16.msra.mxu3 %v780_v15  ;;  %v787_v52 = vld [vmem:[%s1012_s1 + $0x118] sm:$0xff]  ;;  %v786_v54 = vld [vmem:[%s1012_s1 + $0x110] sm:$0xff]  ;;  %v785_v56 = vld [vmem:[%s1012_s1 + $0x108] sm:$0xff] }
  0x12   :  { %442 = vmatpush.bf16.msra.mxu0 %v755_v16  ;;  %v795_v53 = vld [vmem:[%s1012_s1 + $0x158] sm:$0xff]  ;;  %v794_v55 = vld [vmem:[%s1012_s1 + $0x150] sm:$0xff]  ;;  %v793_v57 = vld [vmem:[%s1012_s1 + $0x148] sm:$0xff] }
  0x13   :  { %456 = vmatpush.bf16.msra.mxu1 %v763_v17  ;;  %v784_v58 = vld [vmem:[%s1012_s1 + $0x100] sm:$0xff]  ;;  %v548_v60 = vld [vmem:[%s1014_s0 + $0x10] sm:$0xf]  ;;  %v751_v61 = vld [vmem:[%s1014_s0 + $0x24] sm:$0xf0] }
  0x14   :  { %470 = vmatpush.bf16.msra.mxu2 %v771_v18  ;;  %v792_v59 = vld [vmem:[%s1012_s1 + $0x140] sm:$0xff]  ;;  %v748_v62 = vld [vmem:[%s1014_s0 + $0x14] sm:$0xf]  ;;  %v550_v63 = vld [vmem:[%s1014_s0 + $0x28] sm:$0xf0]  ;;  %v549_v0 = vor.u32 %v751_v61, %v548_v60 }
  0x15   :  { %484 = vmatpush.bf16.msra.mxu3 %v779_v19  ;;  %v553_v1 = vor.u32 %v748_v62, %v550_v63  ;;  %v805_v4 = vld [vmem:[%s1013_s2] ss:$0 sm:$0xff] }
  0x16   :  { %443 = vmatpush.bf16.msra.mxu0 %v754_v20 }
  0x17   :  { %457 = vmatpush.bf16.msra.mxu1 %v762_v21 }
  0x18   :  { %471 = vmatpush.bf16.msra.mxu2 %v770_v22 }
  0x19   :  { %485 = vmatpush.bf16.msra.mxu3 %v778_v23 }
  0x1a   :  { %444 = vmatpush.bf16.msra.mxu0 %v753_v24 }
  0x1b   :  { %458 = vmatpush.bf16.msra.mxu1 %v761_v25 }
  0x1c   :  { %472 = vmatpush.bf16.msra.mxu2 %v769_v26 }
  0x1d   :  { %486 = vmatpush.bf16.msra.mxu3 %v777_v27 }
  0x1e   :  { %445 = vmatpush.bf16.msra.mxu0 %v752_v28 }
  0x1f   :  { %459 = vmatpush.bf16.msra.mxu1 %v760_v29 }
  0x20   :  { %473 = vmatpush.bf16.msra.mxu2 %v768_v36 }
  0x21   :  { %487 = vmatpush.bf16.msra.mxu3 %v776_v37  ;;  %446 = vmatmul.bf16.vlgmr.msra.gmra.mxu0 %v533_v40 }
  0x22   :  { %494 = vmatpush.bf16.msrb.mxu0 %v791_v34  ;;  %460 = vmatmul.bf16.vlgmr.msra.gmra.mxu1 %v537_v43 }
  0x23   :  { %508 = vmatpush.bf16.msrb.mxu1 %v799_v35  ;;  %474 = vmatmul.bf16.vlgmr.msra.gmra.mxu2 %v541_v46 }
  0x24   :  { %488 = vmatmul.bf16.vlgmr.msra.gmra.mxu3 %v545_v47 }
  0x26   :  { %495 = vmatpush.bf16.msrb.mxu0 %v790_v44 }
  0x27   :  { %509 = vmatpush.bf16.msrb.mxu1 %v798_v45 }
  0x2a   :  { %496 = vmatpush.bf16.msrb.mxu0 %v789_v48 }
  0x2b   :  { %510 = vmatpush.bf16.msrb.mxu1 %v797_v49 }
  0x2e   :  { %497 = vmatpush.bf16.msrb.mxu0 %v788_v50 }
  0x2f   :  { %511 = vmatpush.bf16.msrb.mxu1 %v796_v51 }
  0x32   :  { %498 = vmatpush.bf16.msrb.mxu0 %v787_v52 }
  0x33   :  { %512 = vmatpush.bf16.msrb.mxu1 %v795_v53 }
  0x36   :  { %499 = vmatpush.bf16.msrb.mxu0 %v786_v54 }
  0x37   :  { %513 = vmatpush.bf16.msrb.mxu1 %v794_v55 }
  0x3a   :  { %500 = vmatpush.bf16.msrb.mxu0 %v785_v56 }
  0x3b   :  { %514 = vmatpush.bf16.msrb.mxu1 %v793_v57 }
  0x3e   :  { %501 = vmatpush.bf16.msrb.mxu0 %v784_v58 }
  0x3f   :  { %515 = vmatpush.bf16.msrb.mxu1 %v792_v59 }
  0x41   :  { %502 = vmatmul.bf16.vlgmr.msrb.gmra.mxu0 %v549_v0 }
  0x42   :  { %516 = vmatmul.bf16.vlgmr.msrb.gmra.mxu1 %v553_v1 }
  0x9e   :  { %v447_v2 = vpop.f32.mrf.mxu0 }
  0x9f   :  { %v461_v3 = vpop.f32.mrf.mxu1  ;;  %v448_v8 = vadd.f32 %v805_v4, %v447_v2 }
  0xa1   :  { %v462_v11 = vadd.f32 %v461_v3, %v448_v8 }
  0xa6   :  { %v475_v5 = vpop.f32.mrf.mxu2  ;;  %v449_v6 = vpop.f32.mrf.mxu0 }
  0xa7   :  { %v463_v7 = vpop.f32.mrf.mxu1  ;;  %v489_v9 = vpop.f32.mrf.mxu3  ;;  %v450_v10 = vadd.f32 %v805_v4, %v449_v6  ;;  %v476_v16 = vadd.f32 %v475_v5, %v462_v11 }
  0xa9   :  { %v464_v12 = vadd.f32 %v463_v7, %v450_v10  ;;  %v490_v19 = vadd.f32 %v489_v9, %v476_v16 }
  0xae   :  { %v477_v13 = vpop.f32.mrf.mxu2 }
  0xaf   :  { %v478_v17 = vadd.f32 %v477_v13, %v464_v12  ;;  %v491_v18 = vpop.f32.mrf.mxu3 }
  0xb1   :  { %v492_v20 = vadd.f32 %v491_v18, %v478_v17 }
  0xbe   :  { %v503_v14 = vpop.f32.mrf.mxu0 }
  0xbf   :  { %v517_v15 = vpop.f32.mrf.mxu1  ;;  %v504_v21 = vadd.f32 %v503_v14, %v490_v19 }
  0xc1   :  { %v518_v25 = vadd.f32 %v517_v15, %v504_v21 }
  0xc6   :  { %v505_v22 = vpop.f32.mrf.mxu0 }
  0xc7   :  { %v506_v23 = vadd.f32 %v505_v22, %v492_v20  ;;  %v519_v24 = vpop.f32.mrf.mxu1 }
  0xc9   :  { %v520_v26 = vadd.f32 %v519_v24, %v506_v23 }
  0xcb   :  { %v803_v27 = vpack.c.bf16 %v520_v26, %v518_v25 }
  0xcd   :  { %804 = vst [vmem:[%s1015_s3] sm:$0xff] %v803_v27  }

// kernel: encoder_text_forward.3
= control target key start
LH: loop header
LB: loop body
LE: loop exit
PB: predicated region body
PF: predicated region fallthrough
CT: control target
= control target key end

     0   :  { %vm961_vm5 = vcmask 130112   ;;  %vm965_vm6 = vcmask 195712   ;;  %vm969_vm7 = vcmask 261312   ;;  %vm973_vm8 = vcmask 326912   ;;  %s5098_s0 = inlined_call_operand.vmem [shape: f32[8,128], index: 0, kind: input, shape index: {}]   ;;  %s5099_s1 = inlined_call_operand.vmem [shape: bf16[8,128,128], index: 1, kind: input, shape index: {}]   ;;  %s5100_s2 = inlined_call_operand.vmem [shape: f32[8,128], index: 2, kind: output, shape index: {}]  }
   0x1   :  { %v11_v0 = vld [vmem:[%s5098_s0] sm:$0xff]  ;;  %v2663_v5 = vld [vmem:[%s5099_s1 + $0x10] sm:$0xff]   ;;  %v2668_v6 = vld [vmem:[%s5099_s1 + $0x8] sm:$0xff]   ;;  %vm977_vm9 = vcmask 392512   ;;  %vm981_vm10 = vcmask 458112   ;;  %vm985_vm11 = vcmask 523712  }
   0x2   :  { %12 = vmax.xlane.f32.xlu0 %v11_v0  ;;  %vm19_vm0 = vcmp.gt.f32.partialorder %v11_v0, -5000.0  ;;  %v2673_v7 = vld [vmem:[%s5099_s1] sm:$0xff]   ;;  %v2678_v8 = vld [vmem:[%s5099_s1 + $0x18] sm:$0xff]   ;;  %v2683_v9 = vld [vmem:[%s5099_s1 + $0x28] sm:$0xff]   ;;  %v2306_v13 = vunpack.c.l.bf16 %v2663_v5  ;;  %v2302_v14 = vunpack.c.l.bf16 %v2668_v6  ;;  %vm5231_vm12 = vcmask 589312  }
   0x3   :  { %v2690_v11 = vld [vmem:[%s5099_s1 + $0x30] sm:$0xff]   ;;  %v2695_v12 = vld [vmem:[%s5099_s1 + $0x20] sm:$0xff]   ;;  %v2298_v15 = vunpack.c.l.bf16 %v2673_v7  ;;  %v2704_v17 = vld [vmem:[%s5099_s1 + $0x38] sm:$0xff]   ;;  %vm5235_vm13 = vcmask 654912   ;;  %vm5234_vm14 = vcmask 720512   ;;  %vm5233_vm15 = vcmask 786112  }
   0x4   :  { %5241 = vst [vmem:[#allocation2_spill] sm:$0xff] %v2704_v17  ;;  %v2713_v22 = vld [vmem:[%s5099_s1 + $0x40] sm:$0xff]   ;;  %v2718_v23 = vld [vmem:[%s5099_s1 + $0x48] sm:$0xff]   ;;  %v2723_v24 = vld [vmem:[%s5099_s1 + $0x70] sm:$0xff]  }
   0x5   :  { %5242 = vst [vmem:[#allocation3_spill] sm:$0xff] %v2713_v22  ;;  %v2732_v29 = vld [vmem:[%s5099_s1 + $0x68] sm:$0xff]   ;;  %v2737_v30 = vld [vmem:[%s5099_s1 + $0x78] sm:$0xff]   ;;  %v2753_v37 = vld [vmem:[%s5099_s1 + $0x80] sm:$0xff]  }
   0x6   :  { %5243 = vst [vmem:[#allocation4_spill] sm:$0xff] %v2718_v23  ;;  %v2748_v36 = vld [vmem:[%s5099_s1 + $0x88] sm:$0xff]   ;;  %v2762_v41 = vld [vmem:[%s5099_s1 + $0x90] sm:$0xff]   ;;  %v2771_v46 = vld [vmem:[%s5099_s1 + $0xa0] sm:$0xff]  }
   0x7   :  { %v2776_v47 = vld [vmem:[%s5099_s1 + $0x98] sm:$0xff]   ;;  %v2785_v52 = vld [vmem:[%s5099_s1 + $0xa8] sm:$0xff]   ;;  %v2799_v58 = vld [vmem:[%s5099_s1 + $0xb0] sm:$0xff]  }
   0x8   :  { %v2794_v57 = vld [vmem:[%s5099_s1 + $0xb8] sm:$0xff]   ;;  %v2804_v59 = vld [vmem:[%s5099_s1 + $0xc0] sm:$0xff]   ;;  %v2824_v35 = vld [vmem:[%s5099_s1 + $0xc8] sm:$0xff]  }
   0x9   :  { %v2829_v34 = vld [vmem:[%s5099_s1 + $0xd8] sm:$0xff]   ;;  %v2843_v62 = vld [vmem:[%s5099_s1 + $0xe0] sm:$0xff]   ;;  %v2856_v60 = vld [vmem:[%s5099_s1 + $0xf0] sm:$0xff]  }
   0xa   :  { %v2870_v63 = vld [vmem:[%s5099_s1 + $0xf8] sm:$0xff]   ;;  %v2878_v54 = vld [vmem:[%s5099_s1 + $0x108] sm:$0xff]   ;;  %v2891_v55 = vld [vmem:[%s5099_s1 + $0x110] sm:$0xff]  }
   0xb   :  { %v2899_v49 = vld [vmem:[%s5099_s1 + $0x120] sm:$0xff]   ;;  %v2904_v50 = vld [vmem:[%s5099_s1 + $0x130] sm:$0xff]   ;;  %v2918_v44 = vld [vmem:[%s5099_s1 + $0x138] sm:$0xff]  }
   0xc   :  { %v2926_v48 = vld [vmem:[%s5099_s1 + $0x148] sm:$0xff]   ;;  %v2943_v45 = vld [vmem:[%s5099_s1 + $0x150] sm:$0xff]   ;;  %v2951_v40 = vld [vmem:[%s5099_s1 + $0x160] sm:$0xff]  }
   0xd   :  { %v2967_v33 = vld [vmem:[%s5099_s1 + $0x168] sm:$0xff]   ;;  %v2989_v28 = vld [vmem:[%s5099_s1 + $0x170] sm:$0xff]  }
   0xe   :  { %5247 = vst [vmem:[#allocation6_spill] sm:$0xff] %v2967_v33  ;;  %v3002_v25 = vld [vmem:[%s5099_s1 + $0x190] sm:$0xff]  }
   0xf   :  { %5248 = vst [vmem:[#allocation7_spill] sm:$0xff] %v2989_v28 }
  0x75   :  { %v13_v1 = vpop.xlane.xlu0 %12 }
  0x76   :  { %v14_v2 = vsub.f32 %v11_v0, %v13_v1  ;;  %v2813_v0 = vld [vmem:[%s5099_s1 + $0xd0] sm:$0xff]  }
  0x78   :  { %v15_v3 = vmul.f32 1.442695, %v14_v2  ;;  %v2865_v2 = vld [vmem:[%s5099_s1 + $0x100] sm:$0xff]  }
  0x7a   :  { %2619 = vpow2.f32 %v15_v3 }
  0x80   :  { %v2620_v4 = vpop.eup %2619 }
  0x81   :  { %17 = vadd.xlane.f32.xlu0 %v2620_v4  ;;  %v2685_v10 = vsel %vm19_vm0, %v2620_v4, 0.0  ;;  %v2838_v4 = vld [vmem:[%s5099_s1 + $0xe8] sm:$0xff]   ;;  %vm1005_vm0 = vcmask 851712  }
  0xf4   :  { %v2739_v31 = vpop.xlane.xlu0 %17 }
  0xf5   :  { %2621 = vrcp.f32 %v2739_v31  ;;  %v32_v42 = vand.u32 2147483648, %v2739_v31  ;;  %v30_v53 = vand.u32 2147483647, %v2739_v31  ;;  %vm26_vm1 = vweird.f32 %v2739_v31 }
  0xf7   :  { %v2816_v1 = vor.u32 1.1754944e-38, %v32_v42  ;;  %vm2846_vm2 = vcmp.eq.f32.partialorder %v30_v53, 8.507059e+37  ;;  %v2913_v53 = vld [vmem:[%s5099_s1 + $0x128] sm:$0xff]  }
  0xfb   :  { %v2622_v39 = vpop.eup %2621 }
  0xfc   :  { %v22_v61 = vmul.f32 %v2622_v39, %v2739_v31  ;;  %vm27_vm3 = vweird.f32 %v2622_v39 }
  0xfd   :  { %vm28_vm4 = vmor %vm26_vm1, %vm27_vm3  ;;  %vm1009_vm1 = vcmask 917312   ;;  %vm1017_vm3 = vcmask 1048512  }
  0xfe   :  { %v23_v3 = vsub.f32 1.0, %v22_v61  ;;  %v2886_v61 = vld [vmem:[%s5099_s1 + $0x118] sm:$0xff]  }
 0x100   :  { %v24_v56 = vmul.f32 %v2622_v39, %v23_v3  ;;  %v2938_v3 = vld [vmem:[%s5099_s1 + $0x140] sm:$0xff]  }
 0x102   :  { %v25_v43 = vadd.f32 %v2622_v39, %v24_v56  ;;  %v2956_v56 = vld [vmem:[%s5099_s1 + $0x158] sm:$0xff]  }
 0x103   :  { %5246 = vst [vmem:[#allocation5_spill] sm:$0xff] %v2956_v56 }
 0x104   :  { %v29_v31 = vsel %vm28_vm4, %v2622_v39, %v25_v43  ;;  %vm5222_vm4 = vcmask 1041409  }
 0x105   :  { %v34_v39 = vsel %vm2846_vm2, %v2816_v1, %v29_v31  ;;  %v2976_v1 = vld [vmem:[%s5099_s1 + $0x178] sm:$0xff]   ;;  %vm1013_vm2 = vcmask 982912  }
 0x106   :  { %v35_v32 = vmul.f32 %v34_v39, %v2685_v10  ;;  %v2997_v10 = vld [vmem:[%s5099_s1 + $0x180] sm:$0xff]  }
 0x108   :  { %v165_v31 = vrot.slane %v35_v32, 1  ;;  %v166_v26 = vrot.slane %v35_v32, 2  ;;  %v2991_v38 = vperm.slane %v35_v32, 0  ;;  %v167_v39 = vrot.slane %v35_v32, 3 }
 0x109   :  { %v168_v27 = vrot.slane %v35_v32, 4  ;;  %v169_v43 = vrot.slane %v35_v32, 5  ;;  %v170_v42 = vrot.slane %v35_v32, 6  ;;  %v171_v21 = vrot.slane %v35_v32, 7 }
 0x10a   :  { %v320_v20 = vmul.f32 %v2306_v13, %v2991_v38  ;;  %v318_v18 = vmul.f32 %v2302_v14, %v2991_v38  ;;  %v316_v16 = vmul.f32 %v2298_v15, %v2991_v38  ;;  %v3017_v23 = vperm.slane %v165_v31, 0  ;;  %v3032_v15 = vld [vmem:[%s5099_s1 + $0x188] sm:$0xff]  }
 0x10b   :  { %v302_v33 = vperm.slane %v166_v26, 0  ;;  %v3021_v51 = vperm.slane %v167_v39, 0  ;;  %v3023_v28 = vperm.slane %v168_v27, 0  ;;  %v3025_v14 = vperm.slane %v169_v43, 0 }
 0x10c   :  { %452 = vadd.xlane.f32.xlu0 %v320_v20  ;;  %v3027_v56 = vperm.slane %v170_v42, 0  ;;  %448 = vadd.xlane.f32.xlu2 %v318_v18  ;;  %v3034_v20 = vperm.slane %v171_v21, 0  ;;  %v5249_v26 = vunpack.c.h.bf16 %v2678_v8  ;;  %v5250_v27 = vunpack.c.h.bf16 %v2668_v6 }
 0x10d   :  { %444 = vadd.xlane.f32.xlu1 %v316_v16  ;;  %v5251_v42 = vunpack.c.h.bf16 %v2673_v7  ;;  %v5252_v16 = vunpack.c.l.bf16 %v2683_v9  ;;  %v5253_v21 = vunpack.c.l.bf16 %v2678_v8  ;;  %v5254_v13 = vunpack.c.h.bf16 %v2663_v5 }
 0x10e   :  { %v323_v31 = vmul.f32 %v5249_v26, %v2991_v38  ;;  %v319_v43 = vmul.f32 %v5250_v27, %v2991_v38  ;;  %v5255_v6 = vunpack.c.h.bf16 %v2690_v11  ;;  %v5256_v7 = vunpack.c.h.bf16 %v2695_v12 }
 0x10f   :  { %v317_v18 = vmul.f32 %v5251_v42, %v2991_v38  ;;  %v326_v39 = vmul.f32 %v5252_v16, %v2991_v38  ;;  %v322_v19 = vmul.f32 %v5253_v21, %v2991_v38  ;;  %v321_v26 = vmul.f32 %v5254_v13, %v2991_v38 }
 0x110   :  { %v3057_v27 = vmul.f32 %v5255_v6, %v2991_v38  ;;  %v3062_v42 = vmul.f32 %v5256_v7, %v2991_v38  ;;  %v5257_v16 = vunpack.c.l.bf16 %v2695_v12  ;;  %v5258_v8 = vunpack.c.l.bf16 %v2690_v11 }
 0x111   :  { %v5259_v21 = vunpack.c.h.bf16 %v2683_v9  ;;  %v5260_v7 = vunpack.c.l.bf16 %v2713_v22  ;;  %v5261_v12 = vunpack.c.l.bf16 %v2723_v24  ;;  %v5263_v11 = vunpack.c.h.bf16 %v2732_v29 }
 0x112   :  { %v3067_v32 = vmul.f32 %v5257_v16, %v2991_v38  ;;  %v3072_v5 = vmul.f32 %v5258_v8, %v2991_v38  ;;  %v5265_v9 = vunpack.c.l.bf16 %v2732_v29  ;;  %v5267_v13 = vunpack.c.h.bf16 %v2737_v30 }
 0x113   :  { %v3078_v6 = vmul.f32 %v5259_v21, %v2991_v38  ;;  %v3083_v17 = vmul.f32 %v5260_v7, %v3017_v23  ;;  %v3088_v16 = vmul.f32 %v5261_v12, %v3017_v23  ;;  %v3093_v8 = vmul.f32 %v5263_v11, %v3017_v23 }
 0x114   :  { %v3098_v21 = vmul.f32 %v5265_v9, %v3017_v23  ;;  %v3103_v7 = vmul.f32 %v5267_v13, %v3017_v23  ;;  %v5269_v22 = vunpack.c.l.bf16 %v2737_v30  ;;  %v5273_v9 = vunpack.c.h.bf16 %v2753_v37  ;;  %458 = vadd.xlane.f32.xlu0 %v323_v31  ;;  %450 = vadd.xlane.f32.xlu2 %v319_v43 }
 0x115   :  { %5262 = vst [vmem:[#allocation8_spill] sm:$0xff] %v3088_v16  ;;  %v5270_v16 = vunpack.c.h.bf16 %v2723_v24  ;;  %v5275_v13 = vunpack.c.l.bf16 %v2753_v37  ;;  %v5277_v24 = vunpack.c.l.bf16 %v2762_v41  ;;  %v5281_v37 = vunpack.c.h.bf16 %v2776_v47  ;;  %446 = vadd.xlane.f32.xlu1 %v317_v18 }
 0x116   :  { %5264 = vst [vmem:[#allocation9_spill] sm:$0xff] %v3093_v8  ;;  %v3108_v12 = vmul.f32 %v5269_v22, %v3017_v23  ;;  %v5272_v8 = vunpack.c.l.bf16 %v2748_v36  ;;  %v5276_v22 = vunpack.c.h.bf16 %v2762_v41  ;;  %v5282_v31 = vunpack.c.l.bf16 %v2776_v47 }
 0x117   :  { %5266 = vst [vmem:[#allocation10_spill] sm:$0xff] %v3098_v21  ;;  %v3113_v11 = vmul.f32 %v5270_v16, %v3017_v23  ;;  %v3121_v21 = vmul.f32 %v5273_v9, %v302_v33  ;;  %v3133_v16 = vmul.f32 %v5277_v24, %v302_v33  ;;  %v5280_v9 = vunpack.c.l.bf16 %v2771_v46 }
 0x118   :  { %5268 = vst [vmem:[#allocation11_spill] sm:$0xff] %v3103_v7  ;;  %v3117_v29 = vmul.f32 %v5272_v8, %v302_v33  ;;  %v3125_v7 = vmul.f32 %v5275_v13, %v302_v33  ;;  %v3129_v30 = vmul.f32 %v5276_v22, %v302_v33  ;;  %v5278_v8 = vunpack.c.h.bf16 %v2748_v36 }
 0x119   :  { %5271 = vst [vmem:[#allocation12_spill] sm:$0xff] %v3113_v11  ;;  %v3145_v13 = vmul.f32 %v5281_v37, %v302_v33  ;;  %v3149_v22 = vmul.f32 %v5282_v31, %v302_v33  ;;  %v5284_v41 = vunpack.c.h.bf16 %v2785_v52  ;;  %v5285_v36 = vunpack.c.l.bf16 %v2785_v52 }
 0x11a   :  { %5274 = vst [vmem:[#allocation13_spill] sm:$0xff] %v3121_v21  ;;  %v3137_v11 = vmul.f32 %v5278_v8, %v302_v33  ;;  %v3141_v21 = vmul.f32 %v5280_v9, %v302_v33  ;;  %v5287_v43 = vunpack.c.l.bf16 %v2794_v57  ;;  %v5288_v47 = vunpack.c.h.bf16 %v2799_v58 }
 0x11b   :  { %5283 = vst [vmem:[#allocation15_spill] sm:$0xff] %v3149_v22  ;;  %v3153_v24 = vmul.f32 %v5284_v41, %v302_v33  ;;  %v3157_v8 = vmul.f32 %v5285_v36, %v302_v33  ;;  %v5289_v41 = vunpack.c.l.bf16 %v2799_v58  ;;  %v5291_v52 = vunpack.c.h.bf16 %v2804_v59 }
 0x11c   :  { %5279 = vst [vmem:[#allocation14_spill] sm:$0xff] %v3137_v11  ;;  %v5286_v11 = vunpack.c.h.bf16 %v2771_v46  ;;  %v3166_v18 = vmul.f32 %v5287_v43, %v302_v33  ;;  %v3170_v31 = vmul.f32 %v5288_v47, %v302_v33  ;;  %v5292_v46 = vunpack.c.l.bf16 %v2804_v59  ;;  %464 = vadd.xlane.f32.xlu0 %v326_v39  ;;  %456 = vadd.xlane.f32.xlu2 %v322_v19 }
 0x11d   :  { %v3174_v22 = vmul.f32 %v5289_v41, %v302_v33  ;;  %v3179_v36 = vmul.f32 %v5291_v52, %v3021_v51  ;;  %v5293_v43 = vunpack.c.h.bf16 %v2794_v57  ;;  %v5294_v47 = vunpack.c.l.bf16 %v2813_v0  ;;  %454 = vadd.xlane.f32.xlu1 %v321_v26 }
 0x11e   :  { %v3162_v37 = vmul.f32 %v5286_v11, %v302_v33  ;;  %v3184_v11 = vmul.f32 %v5292_v46, %v3021_v51  ;;  %v5295_v41 = vunpack.c.h.bf16 %v2824_v35  ;;  %v5296_v52 = vunpack.c.l.bf16 %v2824_v35 }
 0x11f   :  { %5290 = vst [vmem:[#allocation16_spill] sm:$0xff] %v3174_v22  ;;  %v3188_v9 = vmul.f32 %v5293_v43, %v302_v33  ;;  %v3193_v58 = vmul.f32 %v5294_v47, %v3021_v51  ;;  %v5298_v57 = vunpack.c.h.bf16 %v2829_v34  ;;  %v5299_v46 = vunpack.c.l.bf16 %v2829_v34 }
 0x120   :  { %v3198_v22 = vmul.f32 %v5295_v41, %v3021_v51  ;;  %v3203_v59 = vmul.f32 %v5296_v52, %v3021_v51  ;;  %v5301_v47 = vunpack.c.h.bf16 %v2813_v0  ;;  %v5303_v35 = vunpack.c.l.bf16 %v2838_v4 }
 0x121   :  { %v3208_v33 = vmul.f32 %v5298_v57, %v3021_v51  ;;  %v3213_v43 = vmul.f32 %v5299_v46, %v3021_v51  ;;  %v5305_v34 = vunpack.c.l.bf16 %v2843_v62  ;;  %v5307_v0 = vunpack.c.h.bf16 %v2856_v60 }
 0x122   :  { %5297 = vst [vmem:[#allocation17_spill] sm:$0xff] %v3203_v59  ;;  %v3218_v41 = vmul.f32 %v5301_v47, %v3021_v51  ;;  %v3223_v52 = vmul.f32 %v5303_v35, %v3021_v51  ;;  %v5304_v59 = vunpack.c.h.bf16 %v2843_v62  ;;  %v5312_v62 = vunpack.c.l.bf16 %v2865_v2 }
 0x123   :  { %5300 = vst [vmem:[#allocation18_spill] sm:$0xff] %v3213_v43  ;;  %v3233_v46 = vmul.f32 %v5305_v34, %v3021_v51  ;;  %v3238_v47 = vmul.f32 %v5307_v0, %v3021_v51  ;;  %v5310_v43 = vunpack.c.h.bf16 %v2838_v4  ;;  %v2602_v0 = vld [vmem:[%s5099_s1 + $0x198] sm:$0xff]   ;;  %v5328_v19 = vunpack.c.l.bf16 %v2904_v50 }
 0x124   :  { %5302 = vst [vmem:[#allocation19_spill] sm:$0xff] %v3218_v41  ;;  %v3228_v57 = vmul.f32 %v5304_v59, %v3021_v51  ;;  %v5308_v41 = vunpack.c.l.bf16 %v2856_v60  ;;  %v3253_v34 = vmul.f32 %v5312_v62, %v3023_v28  ;;  %v5317_v62 = vunpack.c.l.bf16 %v2878_v54  ;;  %470 = vadd.xlane.f32.xlu0 %v3057_v27  ;;  %462 = vadd.xlane.f32.xlu2 %v3062_v42 }
 0x125   :  { %5306 = vst [vmem:[#allocation20_spill] sm:$0xff] %v3233_v46  ;;  %v3248_v59 = vmul.f32 %v5310_v43, %v3021_v51  ;;  %v5313_v46 = vunpack.c.h.bf16 %v2870_v63  ;;  %v5316_v43 = vunpack.c.h.bf16 %v2878_v54  ;;  %v5322_v54 = vunpack.c.l.bf16 %v2891_v55  ;;  %460 = vadd.xlane.f32.xlu1 %v3067_v32  ;;  %v2608_v32 = vld [vmem:[%s5099_s1 + $0x1c8] sm:$0xff]  }
 0x126   :  { %v3243_v35 = vmul.f32 %v5308_v41, %v3021_v51  ;;  %v5315_v41 = vunpack.c.l.bf16 %v2870_v63  ;;  %v3316_v26 = vmul.f32 %v5328_v19, %v3023_v28  ;;  %v2502_v27 = vunpack.c.l.bf16 %v2602_v0 }
 0x127   :  { %5311 = vst [vmem:[#allocation22_spill] sm:$0xff] %v3248_v59  ;;  %v3261_v60 = vmul.f32 %v5313_v46, %v3021_v51  ;;  %v3271_v59 = vmul.f32 %v5316_v43, %v3023_v28  ;;  %v5318_v46 = vunpack.c.h.bf16 %v2865_v2  ;;  %v5323_v2 = vunpack.c.h.bf16 %v2899_v49 }
 0x128   :  { %5309 = vst [vmem:[#allocation21_spill] sm:$0xff] %v3243_v35  ;;  %v3266_v4 = vmul.f32 %v5315_v41, %v3021_v51  ;;  %v3276_v35 = vmul.f32 %v5317_v62, %v3023_v28  ;;  %v5319_v51 = vunpack.c.l.bf16 %v2886_v61  ;;  %v5320_v41 = vunpack.c.h.bf16 %v2891_v55 }
 0x129   :  { %5314 = vst [vmem:[#allocation23_spill] sm:$0xff] %v3261_v60  ;;  %v3281_v60 = vmul.f32 %v5318_v46, %v3023_v28  ;;  %v3296_v62 = vmul.f32 %v5322_v54, %v3023_v28  ;;  %v3301_v39 = vmul.f32 %v5323_v2, %v3023_v28  ;;  %v5324_v46 = vunpack.c.l.bf16 %v2899_v49 }
 0x12a   :  { %v3286_v63 = vmul.f32 %v5319_v51, %v3023_v28  ;;  %v3291_v43 = vmul.f32 %v5320_v41, %v3023_v28  ;;  %v5326_v41 = vunpack.c.h.bf16 %v2886_v61  ;;  %v2503_v55 = vunpack.c.h.bf16 %v2602_v0 }
 0x12b   :  { %v3306_v51 = vmul.f32 %v5324_v46, %v3023_v28  ;;  %v5329_v54 = vunpack.c.h.bf16 %v2913_v53  ;;  %v5330_v49 = vunpack.c.l.bf16 %v2913_v53  ;;  %v5332_v61 = vunpack.c.h.bf16 %v2918_v44 }
 0x12c   :  { %5321 = vst [vmem:[#allocation24_spill] sm:$0xff] %v3291_v43  ;;  %v3311_v43 = vmul.f32 %v5326_v41, %v3023_v28  ;;  %v5336_v53 = vunpack.c.l.bf16 %v2926_v48  ;;  %476 = vadd.xlane.f32.xlu0 %v3083_v17  ;;  %468 = vadd.xlane.f32.xlu2 %v3072_v5 }
 0x12d   :  { %5325 = vst [vmem:[#allocation25_spill] sm:$0xff] %v3306_v51  ;;  %v3321_v2 = vmul.f32 %v5329_v54, %v3023_v28  ;;  %v3326_v46 = vmul.f32 %v5330_v49, %v3023_v28  ;;  %v3331_v41 = vmul.f32 %v5332_v61, %v3023_v28  ;;  %v5334_v51 = vunpack.c.h.bf16 %v2904_v50  ;;  %466 = vadd.xlane.f32.xlu1 %v3078_v6 }
 0x12e   :  { %5327 = vst [vmem:[#allocation26_spill] sm:$0xff] %v3311_v43  ;;  %v5333_v43 = vunpack.c.l.bf16 %v2918_v44  ;;  %v3346_v49 = vmul.f32 %v5336_v53, %v3025_v14  ;;  %v5339_v44 = vunpack.c.l.bf16 %v2938_v3  ;;  %v5341_v50 = vunpack.c.h.bf16 %v2943_v45 }
 0x12f   :  { %5331 = vst [vmem:[#allocation27_spill] sm:$0xff] %v3326_v46  ;;  %v3341_v54 = vmul.f32 %v5334_v51, %v3023_v28  ;;  %v5337_v46 = vunpack.c.h.bf16 %v2938_v3  ;;  %v5342_v51 = vunpack.c.l.bf16 %v2943_v45  ;;  %v5346_v3 = vunpack.c.l.bf16 %v2951_v40 }
 0x130   :  { %v3336_v19 = vmul.f32 %v5333_v43, %v3023_v28  ;;  %v3356_v43 = vmul.f32 %v5339_v44, %v3025_v14  ;;  %v3361_v28 = vmul.f32 %v5341_v50, %v3025_v14 }
 0x131   :  { %5335 = vst [vmem:[#allocation28_spill] sm:$0xff] %v3341_v54  ;;  %v3351_v61 = vmul.f32 %v5337_v46, %v3025_v14  ;;  %v3366_v53 = vmul.f32 %v5342_v51, %v3025_v14  ;;  %v5344_v54 = vunpack.c.h.bf16 %v2926_v48  ;;  %v3376_v44 = vmul.f32 %v5346_v3, %v3025_v14 }
 0x132   :  { %5340 = vst [vmem:[#allocation30_spill] sm:$0xff] %v3356_v43  ;;  %v5348_v43 = vld [vmem:[#allocation5_spill] sm:$0xff] }
 0x133   :  { %5338 = vst [vmem:[#allocation29_spill] sm:$0xff] %v3351_v61  ;;  %v3371_v46 = vmul.f32 %v5344_v54, %v3025_v14  ;;  %v5349_v61 = vunpack.c.h.bf16 %v5348_v43  ;;  %v5351_v45 = vunpack.c.l.bf16 %v5348_v43  ;;  %v5359_v43 = vunpack.c.l.bf16 %v2976_v1 }
 0x134   :  { %5343 = vst [vmem:[#allocation31_spill] sm:$0xff] %v3366_v53  ;;  %v5353_v53 = vld [vmem:[#allocation6_spill] sm:$0xff] }
 0x135   :  { %5345 = vst [vmem:[#allocation32_spill] sm:$0xff] %v3371_v46  ;;  %v3381_v50 = vmul.f32 %v5349_v61, %v3025_v14  ;;  %v3386_v51 = vmul.f32 %v5351_v45, %v3025_v14  ;;  %v5354_v48 = vunpack.c.h.bf16 %v5353_v53  ;;  %v5355_v46 = vunpack.c.l.bf16 %v5353_v53  ;;  %v2604_v53 = vld [vmem:[%s5099_s1 + $0x1a8] sm:$0xff]  }
 0x136   :  { %5347 = vst [vmem:[#allocation33_spill] sm:$0xff] %v3376_v44  ;;  %v5357_v44 = vunpack.c.h.bf16 %v2951_v40  ;;  %v3406_v45 = vmul.f32 %v5359_v43, %v3025_v14  ;;  %v2603_v40 = vld [vmem:[%s5099_s1 + $0x1a0] sm:$0xff]   ;;  %v5366_v43 = vunpack.c.h.bf16 %v2997_v10 }
 0x137   :  { %5350 = vst [vmem:[#allocation5_spill] sm:$0xff] %v3381_v50  ;;  %v3391_v54 = vmul.f32 %v5354_v48, %v3025_v14  ;;  %v3396_v3 = vmul.f32 %v5355_v46, %v3025_v14 }
 0x138   :  { %5352 = vst [vmem:[#allocation34_spill] sm:$0xff] %v3386_v51  ;;  %v3401_v61 = vmul.f32 %v5357_v44, %v3025_v14  ;;  %v5361_v51 = vld [vmem:[#allocation7_spill] sm:$0xff] }
 0x139   :  { %5356 = vst [vmem:[#allocation6_spill] sm:$0xff] %v3396_v3  ;;  %v5362_v50 = vunpack.c.h.bf16 %v5361_v51  ;;  %v5364_v46 = vunpack.c.l.bf16 %v5361_v51  ;;  %v5370_v3 = vunpack.c.h.bf16 %v2976_v1  ;;  %v2605_v51 = vld [vmem:[%s5099_s1 + $0x1b0] sm:$0xff]   ;;  %v5376_v1 = vunpack.c.l.bf16 %v3032_v15 }
 0x13a   :  { %5358 = vst [vmem:[#allocation35_spill] sm:$0xff] %v3401_v61  ;;  %v3427_v61 = vmul.f32 %v5366_v43, %v3027_v56 }
 0x13b   :  { %5360 = vst [vmem:[#allocation36_spill] sm:$0xff] %v3406_v45  ;;  %v3411_v48 = vmul.f32 %v5362_v50, %v3025_v14  ;;  %v3422_v44 = vmul.f32 %v5364_v46, %v3025_v14  ;;  %v5368_v50 = vunpack.c.l.bf16 %v2997_v10  ;;  %v3437_v45 = vmul.f32 %v5370_v3, %v3025_v14 }
 0x13c   :  { %5367 = vst [vmem:[#allocation38_spill] sm:$0xff] %v3427_v61  ;;  %v5372_v46 = vunpack.c.l.bf16 %v3002_v25  ;;  %v5374_v10 = vunpack.c.h.bf16 %v3032_v15  ;;  %v3456_v14 = vmul.f32 %v5376_v1, %v3027_v56  ;;  %v3459_v3 = vmul.f32 %v2503_v55, %v3027_v56  ;;  %v2607_v15 = vld [vmem:[%s5099_s1 + $0x1c0] sm:$0xff]   ;;  %v2606_v55 = vld [vmem:[%s5099_s1 + $0x1b8] sm:$0xff]  }
 0x13d   :  { %5363 = vst [vmem:[#allocation7_spill] sm:$0xff] %v3411_v48  ;;  %v3432_v48 = vmul.f32 %v5368_v50, %v3027_v56 }
 0x13e   :  { %5365 = vst [vmem:[#allocation37_spill] sm:$0xff] %v3422_v44  ;;  %v3446_v43 = vmul.f32 %v5372_v46, %v3027_v56  ;;  %v3451_v50 = vmul.f32 %v5374_v10, %v3027_v56  ;;  %v2499_v46 = vunpack.c.h.bf16 %v3002_v25  ;;  %v2515_v10 = vunpack.c.h.bf16 %v2605_v51 }
 0x13f   :  { %5369 = vst [vmem:[#allocation39_spill] sm:$0xff] %v3432_v48  ;;  %v2507_v48 = vunpack.c.h.bf16 %v2603_v40  ;;  %v2511_v44 = vunpack.c.h.bf16 %v2604_v53  ;;  %v3474_v25 = vmul.f32 %v2502_v27, %v3027_v56 }
 0x140   :  { %5371 = vst [vmem:[#allocation40_spill] sm:$0xff] %v3437_v45  ;;  %v2510_v45 = vunpack.c.l.bf16 %v2604_v53  ;;  %v3477_v42 = vmul.f32 %v2499_v46, %v3027_v56  ;;  %v3495_v27 = vmul.f32 %v2515_v10, %v3027_v56  ;;  %v2522_v46 = vunpack.c.l.bf16 %v2607_v15 }
 0x141   :  { %5373 = vst [vmem:[#allocation41_spill] sm:$0xff] %v3446_v43  ;;  %v2506_v43 = vunpack.c.l.bf16 %v2603_v40  ;;  %v3483_v53 = vmul.f32 %v2507_v48, %v3027_v56  ;;  %v2610_v40 = vld [vmem:[%s5099_s1 + $0x1d8] sm:$0xff]   ;;  %v3501_v48 = vmul.f32 %v2511_v44, %v3027_v56 }
 0x142   :  { %5375 = vst [vmem:[#allocation42_spill] sm:$0xff] %v3451_v50  ;;  %v2514_v50 = vunpack.c.l.bf16 %v2605_v51  ;;  %v3480_v0 = vmul.f32 %v2510_v45, %v3027_v56  ;;  %v2609_v51 = vld [vmem:[%s5099_s1 + $0x1d0] sm:$0xff]   ;;  %v3507_v10 = vmul.f32 %v2522_v46, %v3034_v20  ;;  %v2614_v46 = vld [vmem:[%s5099_s1 + $0x1f8] sm:$0xff]   ;;  %v2535_v17 = vunpack.c.h.bf16 %v2610_v40 }
 0x143   :  { %5377 = vst [vmem:[#allocation43_spill] sm:$0xff] %v3456_v14  ;;  %v3492_v1 = vmul.f32 %v2506_v43, %v3027_v56  ;;  %v2523_v14 = vunpack.c.h.bf16 %v2607_v15  ;;  %v2531_v61 = vunpack.c.h.bf16 %v2609_v51  ;;  %v2611_v43 = vld [vmem:[%s5099_s1 + $0x1e0] sm:$0xff]   ;;  %v2613_v15 = vld [vmem:[%s5099_s1 + $0x1f0] sm:$0xff]  }
 0x144   :  { %5378 = vst [vmem:[#allocation44_spill] sm:$0xff] %v3459_v3  ;;  %v3498_v45 = vmul.f32 %v2514_v50, %v3027_v56  ;;  %v2534_v3 = vunpack.c.l.bf16 %v2610_v40  ;;  %v3552_v5 = vmul.f32 %v2535_v17, %v3034_v20  ;;  %v5395_v17 = vld [vmem:[#allocation2_spill] sm:$0xff] }
 0x145   :  { %5379 = vst [vmem:[#allocation45_spill] sm:$0xff] %v3474_v25  ;;  %v2527_v25 = vunpack.c.h.bf16 %v2608_v32 }
 0x146   :  { %5380 = vst [vmem:[#allocation46_spill] sm:$0xff] %v3477_v42  ;;  %v2518_v42 = vunpack.c.l.bf16 %v2606_v55 }
 0x147   :  { %5381 = vst [vmem:[#allocation47_spill] sm:$0xff] %v3480_v0  ;;  %v2526_v0 = vunpack.c.l.bf16 %v2608_v32  ;;  %v2612_v32 = vld [vmem:[%s5099_s1 + $0x1e8] sm:$0xff]  }
 0x148   :  { %5382 = vst [vmem:[#allocation48_spill] sm:$0xff] %v3483_v53  ;;  %v2519_v53 = vunpack.c.h.bf16 %v2606_v55  ;;  %v3513_v44 = vmul.f32 %v2518_v42, %v3027_v56  ;;  %v3516_v55 = vmul.f32 %v2527_v25, %v3034_v20  ;;  %v3532_v25 = vmul.f32 %v2523_v14, %v3034_v20 }
 0x149   :  { %5383 = vst [vmem:[#allocation49_spill] sm:$0xff] %v3498_v45  ;;  %v3535_v42 = vmul.f32 %v2534_v3, %v3034_v20  ;;  %v2551_v45 = vunpack.c.h.bf16 %v2614_v46 }
 0x14a   :  { %5384 = vst [vmem:[#allocation50_spill] sm:$0xff] %v3501_v48  ;;  %v3510_v50 = vmul.f32 %v2519_v53, %v3027_v56  ;;  %v3529_v56 = vmul.f32 %v2526_v0, %v3034_v20  ;;  %v3538_v53 = vmul.f32 %v2531_v61, %v3034_v20  ;;  %v2546_v48 = vunpack.c.l.bf16 %v2613_v15 }
 0x14b   :  { %5386 = vst [vmem:[#allocation52_spill] sm:$0xff] %v3513_v44  ;;  %v2530_v44 = vunpack.c.l.bf16 %v2609_v51  ;;  %v2543_v0 = vunpack.c.h.bf16 %v2612_v32 }
 0x14c   :  { %5385 = vst [vmem:[#allocation51_spill] sm:$0xff] %v3510_v50  ;;  %v2539_v50 = vunpack.c.h.bf16 %v2611_v43  ;;  %v3555_v6 = vmul.f32 %v2546_v48, %v3034_v20 }
 0x14d   :  { %5387 = vst [vmem:[#allocation53_spill] sm:$0xff] %v3516_v55  ;;  %v2538_v55 = vunpack.c.l.bf16 %v2611_v43  ;;  %v3543_v14 = vmul.f32 %v2530_v44, %v3034_v20  ;;  %v3558_v40 = vmul.f32 %v2543_v0, %v3034_v20  ;;  %v3564_v43 = vmul.f32 %v2551_v45, %v3034_v20 }
 0x14e   :  { %5388 = vst [vmem:[#allocation54_spill] sm:$0xff] %v3529_v56  ;;  %v2542_v56 = vunpack.c.l.bf16 %v2612_v32  ;;  %v3546_v3 = vmul.f32 %v2539_v50, %v3034_v20  ;;  %v2550_v50 = vunpack.c.l.bf16 %v2614_v46  ;;  %v2547_v44 = vunpack.c.h.bf16 %v2613_v15 }
 0x14f   :  { %v3549_v61 = vmul.f32 %v2538_v55, %v3034_v20  ;;  %5390 = vst [vmem:[#allocation56_spill] sm:$0xff] %v3552_v5  ;;  %v5393_v55 = vld [vmem:[#allocation4_spill] sm:$0xff]  ;;  %v5396_v5 = vunpack.c.h.bf16 %v5395_v17  ;;  %v5397_v0 = vunpack.c.l.bf16 %v5395_v17 }
 0x150   :  { %5391 = vst [vmem:[#allocation57_spill] sm:$0xff] %v3558_v40  ;;  %v3561_v51 = vmul.f32 %v2542_v56, %v3034_v20  ;;  %v5394_v32 = vunpack.c.h.bf16 %v5393_v55  ;;  %v2562_v56 = vld [vmem:[%s5099_s1 + $0x58] sm:$0xff]   ;;  %v3579_v45 = vmul.f32 %v2550_v50, %v3034_v20  ;;  %v3582_v15 = vmul.f32 %v2547_v44, %v3034_v20  ;;  %v2563_v50 = vld [vmem:[%s5099_s1 + $0x60] sm:$0xff]   ;;  %v2561_v20 = vld [vmem:[%s5099_s1 + $0x50] sm:$0xff]  }
 0x151   :  { %5389 = vst [vmem:[#allocation55_spill] sm:$0xff] %v3549_v61  ;;  %v331_v48 = vmul.f32 %v5396_v5, %v2991_v38  ;;  %v330_v40 = vmul.f32 %v5397_v0, %v2991_v38  ;;  %v2342_v46 = vunpack.c.l.bf16 %v2562_v56  ;;  %v2334_v5 = vunpack.c.l.bf16 %v5393_v55 }
 0x152   :  { %5392 = vst [vmem:[#allocation58_spill] sm:$0xff] %v3561_v51  ;;  %v335_v61 = vmul.f32 %v5394_v32, %v3017_v23  ;;  %v5398_v32 = vld [vmem:[#allocation3_spill] sm:$0xff]  ;;  %v2338_v44 = vunpack.c.l.bf16 %v2561_v20 }
 0x153   :  { %474 = vadd.xlane.f32.xlu2 %v331_v48  ;;  %472 = vadd.xlane.f32.xlu1 %v330_v40  ;;  %v2331_v51 = vunpack.c.h.bf16 %v5398_v32  ;;  %v338_v38 = vmul.f32 %v2342_v46, %v3017_v23  ;;  %v334_v17 = vmul.f32 %v2334_v5, %v3017_v23  ;;  %v2339_v40 = vunpack.c.h.bf16 %v2561_v20  ;;  %v5401_v20 = vld [vmem:[#allocation9_spill] sm:$0xff] }
 0x154   :  { %482 = vadd.xlane.f32.xlu0 %v335_v61  ;;  %v2347_v61 = vunpack.c.h.bf16 %v2563_v50  ;;  %v2346_v46 = vunpack.c.l.bf16 %v2563_v50  ;;  %v2343_v5 = vunpack.c.h.bf16 %v2562_v56  ;;  %v5403_v50 = vld [vmem:[#allocation12_spill] sm:$0xff]  ;;  %v5404_v56 = vld [vmem:[#allocation13_spill] sm:$0xff] }
 0x155   :  { %v333_v0 = vmul.f32 %v2331_v51, %v3017_v23  ;;  %v337_v48 = vmul.f32 %v2339_v40, %v3017_v23  ;;  %v336_v51 = vmul.f32 %v2338_v44, %v3017_v23 }
 0x156   :  { %v341_v55 = vmul.f32 %v2347_v61, %v3017_v23  ;;  %v340_v32 = vmul.f32 %v2346_v46, %v3017_v23  ;;  %v5402_v61 = vld [vmem:[#allocation10_spill] sm:$0xff]  ;;  %v5429_v46 = vld [vmem:[#allocation21_spill] sm:$0xff] }
 0x15b   :  { %480 = vadd.xlane.f32.xlu2 %v334_v17  ;;  %478 = vadd.xlane.f32.xlu1 %v333_v0  ;;  %v5399_v17 = vld [vmem:[#allocation8_spill] sm:$0xff]  ;;  %v5400_v0 = vld [vmem:[#allocation11_spill] sm:$0xff] }
 0x15c   :  { %488 = vadd.xlane.f32.xlu0 %v338_v38  ;;  %v339_v38 = vmul.f32 %v2343_v5, %v3017_v23  ;;  %v5405_v23 = vld [vmem:[#allocation14_spill] sm:$0xff] }
 0x15d   :  { %v5430_v5 = vld [vmem:[#allocation22_spill] sm:$0xff] }
 0x163   :  { %486 = vadd.xlane.f32.xlu2 %v337_v48  ;;  %484 = vadd.xlane.f32.xlu1 %v336_v51 }
 0x164   :  { %494 = vadd.xlane.f32.xlu0 %v341_v55 }
 0x16b   :  { %492 = vadd.xlane.f32.xlu2 %v340_v32  ;;  %490 = vadd.xlane.f32.xlu1 %v339_v38 }
 0x16c   :  { %500 = vadd.xlane.f32.xlu0 %v5399_v17 }
 0x173   :  { %498 = vadd.xlane.f32.xlu2 %v5401_v20  ;;  %496 = vadd.xlane.f32.xlu1 %v5402_v61 }
 0x174   :  { %506 = vadd.xlane.f32.xlu0 %v5400_v0 }
 0x17b   :  { %504 = vadd.xlane.f32.xlu2 %v3108_v12  ;;  %502 = vadd.xlane.f32.xlu1 %v5403_v50 }
 0x17c   :  { %512 = vadd.xlane.f32.xlu0 %v3117_v29  ;;  %v5406_v29 = vld [vmem:[#allocation15_spill] sm:$0xff] }
 0x17f   :  { %v3619_v12 = vpop.xlane.xlu0 %452 }
 0x180   :  { %5407 = vst [vmem:[#allocation4_spill] sm:$0xff] %v3619_v12 }
 0x183   :  { %510 = vadd.xlane.f32.xlu2 %v5404_v56  ;;  %508 = vadd.xlane.f32.xlu1 %v3125_v7  ;;  %v3621_v7 = vpop.xlane.xlu2 %448 }
 0x184   :  { %518 = vadd.xlane.f32.xlu0 %v3129_v30  ;;  %5408 = vst [vmem:[#allocation2_spill] sm:$0xff] %v3621_v7  ;;  %v5410_v30 = vld [vmem:[#allocation16_spill] sm:$0xff] }
 0x18b   :  { %516 = vadd.xlane.f32.xlu2 %v3133_v16  ;;  %514 = vadd.xlane.f32.xlu1 %v5405_v23  ;;  %v3628_v16 = vpop.xlane.xlu0 %458 }
 0x18c   :  { %524 = vadd.xlane.f32.xlu0 %v3141_v21  ;;  %v3623_v21 = vpop.xlane.xlu1 %444  ;;  %5411 = vst [vmem:[#allocation8_spill] sm:$0xff] %v3628_v16 }
 0x18d   :  { %5409 = vst [vmem:[#allocation3_spill] sm:$0xff] %v3623_v21 }
 0x193   :  { %522 = vadd.xlane.f32.xlu2 %v3145_v13  ;;  %520 = vadd.xlane.f32.xlu1 %v5406_v29  ;;  %v3630_v13 = vpop.xlane.xlu2 %450 }
 0x194   :  { %530 = vadd.xlane.f32.xlu0 %v3153_v24  ;;  %5412 = vst [vmem:[#allocation11_spill] sm:$0xff] %v3630_v13  ;;  %v3632_v24 = vpop.xlane.xlu1 %446 }
 0x195   :  { %5413 = vst [vmem:[#allocation9_spill] sm:$0xff] %v3632_v24 }
 0x19b   :  { %528 = vadd.xlane.f32.xlu2 %v3157_v8  ;;  %526 = vadd.xlane.f32.xlu1 %v3162_v37  ;;  %v3637_v8 = vpop.xlane.xlu0 %464  ;;  %v3639_v37 = vpop.xlane.xlu2 %456 }
 0x19c   :  { %536 = vadd.xlane.f32.xlu0 %v3166_v18  ;;  %5414 = vst [vmem:[#allocation10_spill] sm:$0xff] %v3637_v8  ;;  %v3641_v18 = vpop.xlane.xlu1 %454 }
 0x19d   :  { %5415 = vst [vmem:[#allocation12_spill] sm:$0xff] %v3639_v37 }
 0x19e   :  { %5416 = vst [vmem:[#allocation13_spill] sm:$0xff] %v3641_v18 }
 0x1a3   :  { %534 = vadd.xlane.f32.xlu2 %v3170_v31  ;;  %532 = vadd.xlane.f32.xlu1 %v5410_v30  ;;  %v5417_v31 = vld [vmem:[#allocation17_spill] sm:$0xff]  ;;  %v3648_v40 = vpop.xlane.xlu2 %462 }
 0x1a4   :  { %542 = vadd.xlane.f32.xlu0 %v3179_v36  ;;  %v3646_v36 = vpop.xlane.xlu0 %470  ;;  %5419 = vst [vmem:[#allocation15_spill] sm:$0xff] %v3648_v40 }
 0x1a5   :  { %5418 = vst [vmem:[#allocation14_spill] sm:$0xff] %v3646_v36 }
 0x1ab   :  { %540 = vadd.xlane.f32.xlu2 %v3184_v11  ;;  %538 = vadd.xlane.f32.xlu1 %v3188_v9  ;;  %v5421_v9 = vld [vmem:[#allocation18_spill] sm:$0xff]  ;;  %v5422_v11 = vld [vmem:[#allocation19_spill] sm:$0xff]  ;;  %v3657_v55 = vpop.xlane.xlu2 %468 }
 0x1ac   :  { %548 = vadd.xlane.f32.xlu0 %v3193_v58  ;;  %v3650_v58 = vpop.xlane.xlu1 %460  ;;  %v3655_v44 = vpop.xlane.xlu0 %476  ;;  %5424 = vst [vmem:[#allocation18_spill] sm:$0xff] %v3657_v55 }
 0x1ad   :  { %5420 = vst [vmem:[#allocation16_spill] sm:$0xff] %v3650_v58 }
 0x1ae   :  { %5423 = vst [vmem:[#allocation17_spill] sm:$0xff] %v3655_v44 }
 0x1b3   :  { %546 = vadd.xlane.f32.xlu2 %v3198_v22  ;;  %544 = vadd.xlane.f32.xlu1 %v5417_v31  ;;  %v5425_v22 = vld [vmem:[#allocation20_spill] sm:$0xff] }
 0x1b4   :  { %554 = vadd.xlane.f32.xlu0 %v3208_v33  ;;  %v3659_v33 = vpop.xlane.xlu1 %466 }
 0x1bb   :  { %552 = vadd.xlane.f32.xlu2 %v5421_v9  ;;  %550 = vadd.xlane.f32.xlu1 %v5422_v11  ;;  %v5454_v9 = vld [vmem:[#allocation28_spill] sm:$0xff] }
 0x1bc   :  { %560 = vadd.xlane.f32.xlu0 %v3223_v52 }
 0x1c3   :  { %558 = vadd.xlane.f32.xlu2 %v3228_v57  ;;  %556 = vadd.xlane.f32.xlu1 %v5425_v22  ;;  %v5434_v57 = vld [vmem:[#allocation23_spill] sm:$0xff] }
 0x1c4   :  { %566 = vadd.xlane.f32.xlu0 %v3238_v47 }
 0x1c6   :  { %v3666_v51 = vpop.xlane.xlu2 %474  ;;  %v3668_v52 = vpop.xlane.xlu1 %472 }
 0x1c7   :  { %v3664_v48 = vpop.xlane.xlu0 %482  ;;  %5427 = vst [vmem:[#allocation20_spill] sm:$0xff] %v3666_v51 }
 0x1c8   :  { %5426 = vst [vmem:[#allocation19_spill] sm:$0xff] %v3664_v48 }
 0x1c9   :  { %5428 = vst [vmem:[#allocation59_spill] sm:$0xff] %v3668_v52 }
 0x1cb   :  { %564 = vadd.xlane.f32.xlu2 %v5429_v46  ;;  %562 = vadd.xlane.f32.xlu1 %v5430_v5  ;;  %v5459_v46 = vld [vmem:[#allocation30_spill] sm:$0xff] }
 0x1cc   :  { %572 = vadd.xlane.f32.xlu0 %v3253_v34 }
 0x1ce   :  { %v3675_v38 = vpop.xlane.xlu2 %480  ;;  %v3677_v47 = vpop.xlane.xlu1 %478 }
 0x1cf   :  { %v3673_v32 = vpop.xlane.xlu0 %488  ;;  %5432 = vst [vmem:[#allocation22_spill] sm:$0xff] %v3675_v38 }
 0x1d0   :  { %5431 = vst [vmem:[#allocation21_spill] sm:$0xff] %v3673_v32 }
 0x1d1   :  { %5433 = vst [vmem:[#allocation60_spill] sm:$0xff] %v3677_v47 }
 0x1d3   :  { %570 = vadd.xlane.f32.xlu2 %v5434_v57  ;;  %568 = vadd.xlane.f32.xlu1 %v3266_v4  ;;  %v5441_v4 = vld [vmem:[#allocation24_spill] sm:$0xff] }
 0x1d4   :  { %578 = vadd.xlane.f32.xlu0 %v3271_v59 }
 0x1d6   :  { %v3684_v0 = vpop.xlane.xlu2 %486  ;;  %v3686_v34 = vpop.xlane.xlu1 %484 }
 0x1d7   :  { %v3682_v17 = vpop.xlane.xlu0 %494  ;;  %5436 = vst [vmem:[#allocation61_spill] sm:$0xff] %v3684_v0 }
 0x1d8   :  { %5435 = vst [vmem:[#allocation23_spill] sm:$0xff] %v3682_v17 }
 0x1d9   :  { %5437 = vst [vmem:[#allocation62_spill] sm:$0xff] %v3686_v34 }
 0x1db   :  { %576 = vadd.xlane.f32.xlu2 %v3276_v35  ;;  %574 = vadd.xlane.f32.xlu1 %v3281_v60  ;;  %v5445_v35 = vld [vmem:[#allocation25_spill] sm:$0xff]  ;;  %v5446_v60 = vld [vmem:[#allocation26_spill] sm:$0xff] }
 0x1dc   :  { %584 = vadd.xlane.f32.xlu0 %v3286_v63 }
 0x1de   :  { %v3693_v61 = vpop.xlane.xlu2 %492  ;;  %v3695_v59 = vpop.xlane.xlu1 %490 }
 0x1df   :  { %v3691_v20 = vpop.xlane.xlu0 %500  ;;  %5439 = vst [vmem:[#allocation64_spill] sm:$0xff] %v3693_v61 }
 0x1e0   :  { %5438 = vst [vmem:[#allocation63_spill] sm:$0xff] %v3691_v20 }
 0x1e1   :  { %5440 = vst [vmem:[#allocation65_spill] sm:$0xff] %v3695_v59 }
 0x1e3   :  { %582 = vadd.xlane.f32.xlu2 %v5441_v4  ;;  %580 = vadd.xlane.f32.xlu1 %v3296_v62  ;;  %v5450_v62 = vld [vmem:[#allocation27_spill] sm:$0xff] }
 0x1e4   :  { %590 = vadd.xlane.f32.xlu0 %v3301_v39  ;;  %v5464_v4 = vld [vmem:[#allocation31_spill] sm:$0xff] }
 0x1e6   :  { %v3702_v56 = vpop.xlane.xlu2 %498  ;;  %v3704_v63 = vpop.xlane.xlu1 %496 }
 0x1e7   :  { %v3700_v50 = vpop.xlane.xlu0 %506  ;;  %5443 = vst [vmem:[#allocation66_spill] sm:$0xff] %v3702_v56 }
 0x1e8   :  { %5442 = vst [vmem:[#allocation24_spill] sm:$0xff] %v3700_v50 }
 0x1e9   :  { %5444 = vst [vmem:[#allocation67_spill] sm:$0xff] %v3704_v63 }
 0x1eb   :  { %588 = vadd.xlane.f32.xlu2 %v5445_v35  ;;  %586 = vadd.xlane.f32.xlu1 %v5446_v60  ;;  %v5465_v35 = vld [vmem:[#allocation32_spill] sm:$0xff] }
 0x1ec   :  { %596 = vadd.xlane.f32.xlu0 %v3316_v26 }
 0x1ee   :  { %v3711_v29 = vpop.xlane.xlu2 %504  ;;  %v3713_v39 = vpop.xlane.xlu1 %502 }
 0x1ef   :  { %v3709_v23 = vpop.xlane.xlu0 %512  ;;  %5448 = vst [vmem:[#allocation26_spill] sm:$0xff] %v3711_v29 }
 0x1f0   :  { %5447 = vst [vmem:[#allocation25_spill] sm:$0xff] %v3709_v23 }
 0x1f1   :  { %5449 = vst [vmem:[#allocation68_spill] sm:$0xff] %v3713_v39  ;;  %v5488_v39 = vld [vmem:[#allocation40_spill] sm:$0xff] }
 0x1f3   :  { %594 = vadd.xlane.f32.xlu2 %v3321_v2  ;;  %592 = vadd.xlane.f32.xlu1 %v5450_v62  ;;  %v5458_v2 = vld [vmem:[#allocation29_spill] sm:$0xff] }
 0x1f4   :  { %602 = vadd.xlane.f32.xlu0 %v3331_v41 }
 0x1f6   :  { %v3720_v31 = vpop.xlane.xlu2 %510  ;;  %v3722_v26 = vpop.xlane.xlu1 %508 }
 0x1f7   :  { %v3718_v30 = vpop.xlane.xlu0 %518  ;;  %5452 = vst [vmem:[#allocation69_spill] sm:$0xff] %v3720_v31 }
 0x1f8   :  { %5451 = vst [vmem:[#allocation27_spill] sm:$0xff] %v3718_v30 }
 0x1f9   :  { %5453 = vst [vmem:[#allocation70_spill] sm:$0xff] %v3722_v26 }
 0x1fb   :  { %600 = vadd.xlane.f32.xlu2 %v3336_v19  ;;  %598 = vadd.xlane.f32.xlu1 %v5454_v9  ;;  %v5463_v19 = vld [vmem:[#allocation33_spill] sm:$0xff] }
 0x1fc   :  { %608 = vadd.xlane.f32.xlu0 %v3346_v49  ;;  %v5469_v9 = vld [vmem:[#allocation5_spill] sm:$0xff] }
 0x1fe   :  { %v3729_v22 = vpop.xlane.xlu2 %516  ;;  %v3731_v41 = vpop.xlane.xlu1 %514 }
 0x1ff   :  { %v3727_v11 = vpop.xlane.xlu0 %524  ;;  %5456 = vst [vmem:[#allocation71_spill] sm:$0xff] %v3729_v22 }
 0x200   :  { %5455 = vst [vmem:[#allocation28_spill] sm:$0xff] %v3727_v11 }
 0x201   :  { %5457 = vst [vmem:[#allocation72_spill] sm:$0xff] %v3731_v41 }
 0x203   :  { %606 = vadd.xlane.f32.xlu2 %v5458_v2  ;;  %604 = vadd.xlane.f32.xlu1 %v5459_v46  ;;  %v5470_v2 = vld [vmem:[#allocation34_spill] sm:$0xff] }
 0x204   :  { %614 = vadd.xlane.f32.xlu0 %v3361_v28 }
 0x206   :  { %v3738_v57 = vpop.xlane.xlu2 %522  ;;  %v3740_v49 = vpop.xlane.xlu1 %520 }
 0x207   :  { %v3736_v5 = vpop.xlane.xlu0 %530  ;;  %5461 = vst [vmem:[#allocation30_spill] sm:$0xff] %v3738_v57 }
 0x208   :  { %5460 = vst [vmem:[#allocation29_spill] sm:$0xff] %v3736_v5 }
 0x209   :  { %5462 = vst [vmem:[#allocation73_spill] sm:$0xff] %v3740_v49 }
 0x20b   :  { %612 = vadd.xlane.f32.xlu2 %v5464_v4  ;;  %610 = vadd.xlane.f32.xlu1 %v5465_v35  ;;  %v5474_v4 = vld [vmem:[#allocation36_spill] sm:$0xff]  ;;  %v5475_v35 = vld [vmem:[#allocation6_spill] sm:$0xff] }
 0x20c   :  { %620 = vadd.xlane.f32.xlu0 %v5463_v19 }
 0x20e   :  { %v3747_v62 = vpop.xlane.xlu2 %528  ;;  %v3749_v28 = vpop.xlane.xlu1 %526 }
 0x20f   :  { %v3745_v60 = vpop.xlane.xlu0 %536  ;;  %5467 = vst [vmem:[#allocation31_spill] sm:$0xff] %v3747_v62 }
 0x210   :  { %5466 = vst [vmem:[#allocation33_spill] sm:$0xff] %v3745_v60  ;;  %v5476_v60 = vld [vmem:[#allocation35_spill] sm:$0xff] }
 0x211   :  { %5468 = vst [vmem:[#allocation32_spill] sm:$0xff] %v3749_v28  ;;  %v5482_v28 = vld [vmem:[#allocation37_spill] sm:$0xff] }
 0x213   :  { %618 = vadd.xlane.f32.xlu2 %v5469_v9  ;;  %616 = vadd.xlane.f32.xlu1 %v5470_v2  ;;  %v5480_v9 = vld [vmem:[#allocation38_spill] sm:$0xff]  ;;  %v5481_v2 = vld [vmem:[#allocation7_spill] sm:$0xff] }
 0x214   :  { %626 = vadd.xlane.f32.xlu0 %v3391_v54 }
 0x216   :  { %v3756_v5 = vpop.xlane.xlu2 %534  ;;  %v3758_v19 = vpop.xlane.xlu1 %532 }
 0x217   :  { %v3754_v46 = vpop.xlane.xlu0 %542  ;;  %5472 = vst [vmem:[#allocation34_spill] sm:$0xff] %v3756_v5 }
 0x218   :  { %5471 = vst [vmem:[#allocation5_spill] sm:$0xff] %v3754_v46 }
 0x219   :  { %5473 = vst [vmem:[#allocation74_spill] sm:$0xff] %v3758_v19 }
 0x21b   :  { %624 = vadd.xlane.f32.xlu2 %v5475_v35  ;;  %622 = vadd.xlane.f32.xlu1 %v5476_v60  ;;  %v5486_v35 = vld [vmem:[#allocation41_spill] sm:$0xff]  ;;  %v5487_v60 = vld [vmem:[#allocation39_spill] sm:$0xff] }
 0x21c   :  { %632 = vadd.xlane.f32.xlu0 %v5474_v4 }
 0x21e   :  { %v3765_v29 = vpop.xlane.xlu2 %540  ;;  %v3767_v54 = vpop.xlane.xlu1 %538 }
 0x21f   :  { %v3763_v62 = vpop.xlane.xlu0 %548  ;;  %5478 = vst [vmem:[#allocation6_spill] sm:$0xff] %v3765_v29 }
 0x220   :  { %5477 = vst [vmem:[#allocation36_spill] sm:$0xff] %v3763_v62 }
 0x221   :  { %5479 = vst [vmem:[#allocation35_spill] sm:$0xff] %v3767_v54 }
 0x223   :  { %630 = vadd.xlane.f32.xlu2 %v5481_v2  ;;  %628 = vadd.xlane.f32.xlu1 %v5482_v28  ;;  %v5492_v2 = vld [vmem:[#allocation44_spill] sm:$0xff]  ;;  %v5493_v28 = vld [vmem:[#allocation42_spill] sm:$0xff] }
 0x224   :  { %638 = vadd.xlane.f32.xlu0 %v5480_v9 }
 0x226   :  { %v3774_v19 = vpop.xlane.xlu2 %546  ;;  %v3776_v4 = vpop.xlane.xlu1 %544 }
 0x227   :  { %v3772_v5 = vpop.xlane.xlu0 %554  ;;  %5484 = vst [vmem:[#allocation7_spill] sm:$0xff] %v3774_v19 }
 0x228   :  { %5483 = vst [vmem:[#allocation38_spill] sm:$0xff] %v3772_v5  ;;  %v5494_v5 = vld [vmem:[#allocation43_spill] sm:$0xff] }
 0x229   :  { %5485 = vst [vmem:[#allocation37_spill] sm:$0xff] %v3776_v4 }
 0x22b   :  { %636 = vadd.xlane.f32.xlu2 %v5487_v60  ;;  %634 = vadd.xlane.f32.xlu1 %v5488_v39  ;;  %v5498_v60 = vld [vmem:[#allocation47_spill] sm:$0xff]  ;;  %v5499_v39 = vld [vmem:[#allocation45_spill] sm:$0xff] }
 0x22c   :  { %644 = vadd.xlane.f32.xlu0 %v5486_v35 }
 0x22e   :  { %v3783_v54 = vpop.xlane.xlu2 %552  ;;  %v3785_v9 = vpop.xlane.xlu1 %550 }
 0x22f   :  { %v3781_v50 = vpop.xlane.xlu0 %560  ;;  %5490 = vst [vmem:[#allocation39_spill] sm:$0xff] %v3783_v54 }
 0x230   :  { %5489 = vst [vmem:[#allocation41_spill] sm:$0xff] %v3781_v50  ;;  %v5500_v50 = vld [vmem:[#allocation46_spill] sm:$0xff] }
 0x231   :  { %5491 = vst [vmem:[#allocation40_spill] sm:$0xff] %v3785_v9 }
 0x233   :  { %642 = vadd.xlane.f32.xlu2 %v5493_v28  ;;  %640 = vadd.xlane.f32.xlu1 %v5494_v5  ;;  %v5504_v5 = vld [vmem:[#allocation48_spill] sm:$0xff] }
 0x234   :  { %650 = vadd.xlane.f32.xlu0 %v5492_v2 }
 0x236   :  { %v3792_v52 = vpop.xlane.xlu2 %558  ;;  %v3794_v35 = vpop.xlane.xlu1 %556 }
 0x237   :  { %v3790_v62 = vpop.xlane.xlu0 %566  ;;  %5496 = vst [vmem:[#allocation42_spill] sm:$0xff] %v3792_v52  ;;  %v5515_v52 = vld [vmem:[#allocation52_spill] sm:$0xff] }
 0x238   :  { %5495 = vst [vmem:[#allocation44_spill] sm:$0xff] %v3790_v62 }
 0x239   :  { %5497 = vst [vmem:[#allocation43_spill] sm:$0xff] %v3794_v35 }
 0x23b   :  { %648 = vadd.xlane.f32.xlu2 %v5499_v39  ;;  %646 = vadd.xlane.f32.xlu1 %v5500_v50  ;;  %v5508_v50 = vld [vmem:[#allocation49_spill] sm:$0xff]  ;;  %v5509_v39 = vld [vmem:[#allocation50_spill] sm:$0xff] }
 0x23c   :  { %656 = vadd.xlane.f32.xlu0 %v5498_v60 }
 0x23e   :  { %v3801_v9 = vpop.xlane.xlu2 %564  ;;  %v3803_v2 = vpop.xlane.xlu1 %562 }
 0x23f   :  { %v3799_v54 = vpop.xlane.xlu0 %572  ;;  %5502 = vst [vmem:[#allocation45_spill] sm:$0xff] %v3801_v9 }
 0x240   :  { %5501 = vst [vmem:[#allocation47_spill] sm:$0xff] %v3799_v54 }
 0x241   :  { %5503 = vst [vmem:[#allocation46_spill] sm:$0xff] %v3803_v2 }
 0x243   :  { %654 = vadd.xlane.f32.xlu2 %v5504_v5  ;;  %652 = vadd.xlane.f32.xlu1 %v3492_v1  ;;  %v5513_v5 = vld [vmem:[#allocation53_spill] sm:$0xff]  ;;  %v5514_v1 = vld [vmem:[#allocation51_spill] sm:$0xff] }
 0x244   :  { %662 = vadd.xlane.f32.xlu0 %v3495_v27 }
 0x246   :  { %v3810_v62 = vpop.xlane.xlu2 %570  ;;  %v3812_v60 = vpop.xlane.xlu1 %568 }
 0x247   :  { %v3808_v28 = vpop.xlane.xlu0 %578  ;;  %5506 = vst [vmem:[#allocation75_spill] sm:$0xff] %v3810_v62 }
 0x248   :  { %5505 = vst [vmem:[#allocation48_spill] sm:$0xff] %v3808_v28 }
 0x249   :  { %5507 = vst [vmem:[#allocation76_spill] sm:$0xff] %v3812_v60 }
 0x24b   :  { %660 = vadd.xlane.f32.xlu2 %v5508_v50  ;;  %658 = vadd.xlane.f32.xlu1 %v5509_v39  ;;  %v5519_v50 = vld [vmem:[#allocation54_spill] sm:$0xff] }
 0x24c   :  { %668 = vadd.xlane.f32.xlu0 %v3507_v10 }
 0x24e   :  { %v3819_v2 = vpop.xlane.xlu2 %576  ;;  %v3821_v27 = vpop.xlane.xlu1 %574 }
 0x24f   :  { %v3817_v9 = vpop.xlane.xlu0 %584  ;;  %5511 = vst [vmem:[#allocation50_spill] sm:$0xff] %v3819_v2 }
 0x250   :  { %5510 = vst [vmem:[#allocation49_spill] sm:$0xff] %v3817_v9 }
 0x251   :  { %5512 = vst [vmem:[#allocation77_spill] sm:$0xff] %v3821_v27 }
 0x253   :  { %666 = vadd.xlane.f32.xlu2 %v5514_v1  ;;  %664 = vadd.xlane.f32.xlu1 %v5515_v52 }
 0x254   :  { %674 = vadd.xlane.f32.xlu0 %v5513_v5 }
 0x256   :  { %v3828_v60 = vpop.xlane.xlu2 %582  ;;  %v3830_v10 = vpop.xlane.xlu1 %580 }
 0x257   :  { %v3826_v62 = vpop.xlane.xlu0 %590  ;;  %5517 = vst [vmem:[#allocation51_spill] sm:$0xff] %v3828_v60 }
 0x258   :  { %5516 = vst [vmem:[#allocation53_spill] sm:$0xff] %v3826_v62 }
 0x259   :  { %5518 = vst [vmem:[#allocation52_spill] sm:$0xff] %v3830_v10 }
 0x25b   :  { %672 = vadd.xlane.f32.xlu2 %v5519_v50  ;;  %670 = vadd.xlane.f32.xlu1 %v3532_v25  ;;  %v5526_v25 = vld [vmem:[#allocation55_spill] sm:$0xff]  ;;  %v5527_v50 = vld [vmem:[#allocation56_spill] sm:$0xff] }
 0x25c   :  { %680 = vadd.xlane.f32.xlu0 %v3535_v42 }
 0x25e   :  { %v3837_v9 = vpop.xlane.xlu2 %588  ;;  %v3839_v5 = vpop.xlane.xlu1 %586 }
 0x25f   :  { %v3835_v39 = vpop.xlane.xlu0 %596  ;;  %5521 = vst [vmem:[#allocation78_spill] sm:$0xff] %v3837_v9  ;;  %v720_v9 = vmul.f32 %v3686_v34, %v3686_v34 }
 0x260   :  { %5520 = vst [vmem:[#allocation54_spill] sm:$0xff] %v3835_v39 }
 0x261   :  { %5522 = vst [vmem:[#allocation79_spill] sm:$0xff] %v3839_v5 }
 0x263   :  { %678 = vadd.xlane.f32.xlu2 %v3538_v53  ;;  %676 = vadd.xlane.f32.xlu1 %v3543_v14  ;;  %v5531_v53 = vld [vmem:[#allocation57_spill] sm:$0xff]  ;;  %v5532_v14 = vld [vmem:[#allocation58_spill] sm:$0xff] }
 0x264   :  { %686 = vadd.xlane.f32.xlu0 %v3546_v3 }
 0x266   :  { %v3846_v1 = vpop.xlane.xlu2 %594  ;;  %v3848_v42 = vpop.xlane.xlu1 %592 }
 0x267   :  { %v3844_v52 = vpop.xlane.xlu0 %602  ;;  %5524 = vst [vmem:[#allocation81_spill] sm:$0xff] %v3846_v1 }
 0x268   :  { %5523 = vst [vmem:[#allocation80_spill] sm:$0xff] %v3844_v52 }
 0x269   :  { %5525 = vst [vmem:[#allocation82_spill] sm:$0xff] %v3848_v42 }
 0x26b   :  { %684 = vadd.xlane.f32.xlu2 %v5526_v25  ;;  %682 = vadd.xlane.f32.xlu1 %v5527_v50  ;;  %v956_v50 = vlaneseq }
 0x26c   :  { %692 = vadd.xlane.f32.xlu0 %v3555_v6 }
 0x26e   :  { %v3855_v62 = vpop.xlane.xlu2 %600  ;;  %v3857_v3 = vpop.xlane.xlu1 %598 }
 0x26f   :  { %v3853_v39 = vpop.xlane.xlu0 %608  ;;  %5529 = vst [vmem:[#allocation56_spill] sm:$0xff] %v3855_v62  ;;  %v701_v62 = vmul.f32 %v3632_v24, %v3632_v24 }
 0x270   :  { %5528 = vst [vmem:[#allocation55_spill] sm:$0xff] %v3853_v39 }
 0x271   :  { %5530 = vst [vmem:[#allocation83_spill] sm:$0xff] %v3857_v3 }
 0x273   :  { %690 = vadd.xlane.f32.xlu2 %v5531_v53  ;;  %688 = vadd.xlane.f32.xlu1 %v5532_v14  ;;  %v3876_v53 = vand.u32 127, %v956_v50 }
 0x274   :  { %698 = vadd.xlane.f32.xlu0 %v3564_v43 }
 0x275   :  { %v3879_v14 = vadd.s32 4294967288, %v3876_v53  ;;  %v3893_v50 = vadd.s32 4294967280, %v3876_v53  ;;  %v3908_v39 = vadd.s32 4294967264, %v3876_v53 }
 0x276   :  { %v3864_v1 = vpop.xlane.xlu2 %606  ;;  %v3866_v6 = vpop.xlane.xlu1 %604 }
 0x277   :  { %v3862_v52 = vpop.xlane.xlu0 %614  ;;  %5534 = vst [vmem:[#allocation58_spill] sm:$0xff] %v3864_v1 }
 0x278   :  { %5533 = vst [vmem:[#allocation57_spill] sm:$0xff] %v3862_v52 }
 0x279   :  { %5535 = vst [vmem:[#allocation84_spill] sm:$0xff] %v3866_v6 }
 0x27b   :  { %696 = vadd.xlane.f32.xlu2 %v3579_v45  ;;  %694 = vadd.xlane.f32.xlu1 %v3582_v15  ;;  %v700_v45 = vmul.f32 %v3623_v21, %v3623_v21  ;;  %v703_v21 = vmul.f32 %v3630_v13, %v3630_v13 }
 0x27d   :  { %v958_v24 = vperm.slane %v700_v45, %v3876_v53  ;;  %v705_v45 = vmul.f32 %v3641_v18, %v3641_v18  ;;  %v706_v18 = vmul.f32 %v3639_v37, %v3639_v37  ;;  %v3942_v37 = vadd.s32 4294967232, %v3876_v53 }
 0x27e   :  { %v3872_v3 = vpop.xlane.xlu2 %612  ;;  %v3874_v43 = vpop.xlane.xlu1 %610 }
 0x27f   :  { %v3870_v25 = vpop.xlane.xlu0 %620  ;;  %5537 = vst [vmem:[#allocation86_spill] sm:$0xff] %v3872_v3  ;;  %v960_v3 = vperm.slane %v701_v62, %v3879_v14 }
 0x280   :  { %5536 = vst [vmem:[#allocation85_spill] sm:$0xff] %v3870_v25 }
 0x281   :  { %5538 = vst [vmem:[#allocation87_spill] sm:$0xff] %v3874_v43  ;;  %v702_v43 = vmul.f32 %v3621_v7, %v3621_v7  ;;  %v3911_v7 = vadd.s32 4294967256, %v3876_v53 }
 0x283   :  { %v964_v62 = vperm.slane %v702_v43, %v3893_v50  ;;  %v717_v43 = vmul.f32 %v3677_v47, %v3677_v47 }
 0x286   :  { %v3887_v15 = vpop.xlane.xlu2 %618  ;;  %v3889_v25 = vpop.xlane.xlu1 %616 }
 0x287   :  { %v3883_v52 = vpop.xlane.xlu0 %626  ;;  %5540 = vst [vmem:[#allocation89_spill] sm:$0xff] %v3887_v15  ;;  %v962_v15 = vsel %vm961_vm5, %v960_v3, %v958_v24  ;;  %v704_v24 = vmul.f32 %v3619_v12, %v3619_v12  ;;  %v3939_v12 = vadd.s32 4294967240, %v3876_v53 }
 0x288   :  { %5539 = vst [vmem:[#allocation88_spill] sm:$0xff] %v3883_v52  ;;  %v3899_v52 = vadd.s32 4294967272, %v3876_v53  ;;  %v966_v3 = vsel %vm965_vm6, %v964_v62, %v962_v15  ;;  %v976_v15 = vperm.slane %v705_v45, %v3911_v7  ;;  %v718_v62 = vmul.f32 %v3675_v38, %v3675_v38 }
 0x289   :  { %5541 = vst [vmem:[#allocation90_spill] sm:$0xff] %v3889_v25  ;;  %v972_v47 = vperm.slane %v704_v24, %v3908_v39  ;;  %v708_v45 = vmul.f32 %v3650_v58, %v3650_v58 }
 0x28a   :  { %v968_v13 = vperm.slane %v703_v21, %v3899_v52  ;;  %v1020_v21 = vperm.slane %v717_v43, %v3879_v14  ;;  %v707_v43 = vmul.f32 %v3628_v16, %v3628_v16  ;;  %v1022_v42 = vperm.slane %v718_v62, %v3893_v50 }
 0x28b   :  { %v719_v16 = vmul.f32 %v3664_v48, %v3664_v48  ;;  %v3971_v62 = vadd.s32 4294967224, %v3876_v53  ;;  %v988_v58 = vperm.slane %v708_v45, %v3942_v37  ;;  %v732_v45 = vmul.f32 %v3722_v26, %v3722_v26 }
 0x28c   :  { %v984_v48 = vperm.slane %v707_v43, %v3939_v12  ;;  %v710_v43 = vmul.f32 %v3637_v8, %v3637_v8 }
 0x28e   :  { %v3915_v6 = vpop.xlane.xlu2 %624  ;;  %v3917_v1 = vpop.xlane.xlu1 %622 }
 0x28f   :  { %v3905_v25 = vpop.xlane.xlu0 %632  ;;  %5543 = vst [vmem:[#allocation92_spill] sm:$0xff] %v3915_v6  ;;  %v716_v6 = vmul.f32 %v3655_v44, %v3655_v44 }
 0x290   :  { %5542 = vst [vmem:[#allocation91_spill] sm:$0xff] %v3905_v25  ;;  %v3926_v25 = vadd.s32 4294967248, %v3876_v53 }
 0x291   :  { %5544 = vst [vmem:[#allocation93_spill] sm:$0xff] %v3917_v1  ;;  %v970_v1 = vsel %vm969_vm7, %v968_v13, %v966_v3  ;;  %v1019_v38 = vperm.slane %v716_v6, %v3876_v53  ;;  %v3965_v6 = vadd.s32 4294967192, %v3876_v53 }
 0x292   :  { %v980_v13 = vperm.slane %v706_v18, %v3926_v25  ;;  %v974_v3 = vsel %vm973_vm8, %v972_v47, %v970_v1  ;;  %v3962_v1 = vadd.s32 4294967216, %v3876_v53 }
 0x293   :  { %v978_v44 = vsel %vm977_vm9, %v976_v15, %v974_v3  ;;  %v1021_v15 = vsel %vm961_vm5, %v1020_v21, %v1019_v38  ;;  %v709_v3 = vmul.f32 %v3648_v40, %v3648_v40  ;;  %v3981_v38 = vadd.s32 4294967200, %v3876_v53 }
 0x294   :  { %v982_v34 = vsel %vm981_vm10, %v980_v13, %v978_v44  ;;  %v1023_v21 = vsel %vm965_vm6, %v1022_v42, %v1021_v15  ;;  %v3986_v40 = vadd.s32 4294967208, %v3876_v53  ;;  %v1024_v44 = vperm.slane %v719_v16, %v3899_v52 }
 0x295   :  { %v733_v13 = vmul.f32 %v3720_v31, %v3720_v31  ;;  %v986_v42 = vsel %vm985_vm11, %v984_v48, %v982_v34  ;;  %v723_v31 = vmul.f32 %v3695_v59, %v3695_v59 }
 0x296   :  { %v3957_v18 = vpop.xlane.xlu2 %630  ;;  %v3959_v47 = vpop.xlane.xlu1 %628  ;;  %v990_v15 = vsel %vm5231_vm12, %v988_v58, %v986_v42  ;;  %v712_v42 = vmul.f32 %v3657_v55, %v3657_v55 }
 0x297   :  { %v3949_v24 = vpop.xlane.xlu0 %638  ;;  %5546 = vst [vmem:[#allocation95_spill] sm:$0xff] %v3957_v18  ;;  %v721_v18 = vmul.f32 %v3684_v0, %v3684_v0  ;;  %v992_v0 = vperm.slane %v709_v3, %v3971_v62  ;;  %v722_v3 = vmul.f32 %v3673_v32, %v3673_v32  ;;  %v1051_v58 = vperm.slane %v733_v13, %v3879_v14 }
 0x298   :  { %5545 = vst [vmem:[#allocation94_spill] sm:$0xff] %v3949_v24  ;;  %v1025_v24 = vsel %vm969_vm7, %v1024_v44, %v1023_v21  ;;  %v735_v21 = vmul.f32 %v3731_v41, %v3731_v41  ;;  %v724_v13 = vmul.f32 %v3693_v61, %v3693_v61  ;;  %v4029_v41 = vadd.s32 4294967176, %v3876_v53 }
 0x299   :  { %5547 = vst [vmem:[#allocation96_spill] sm:$0xff] %v3959_v47  ;;  %v1026_v47 = vperm.slane %v720_v9, %v3908_v39  ;;  %v711_v9 = vmul.f32 %v3659_v33, %v3659_v33  ;;  %v1028_v16 = vperm.slane %v721_v18, %v3911_v7  ;;  %v1050_v18 = vperm.slane %v732_v45, %v3876_v53 }
 0x29a   :  { %v994_v44 = vsel %vm5235_vm13, %v992_v0, %v990_v15  ;;  %v1032_v45 = vperm.slane %v723_v31, %v3939_v12  ;;  %v1030_v0 = vperm.slane %v722_v3, %v3926_v25  ;;  %v713_v15 = vmul.f32 %v3646_v36, %v3646_v36 }
 0x29b   :  { %v1027_v48 = vsel %vm973_vm8, %v1026_v47, %v1025_v24  ;;  %v1000_v32 = vperm.slane %v711_v9, %v3986_v40  ;;  %v734_v24 = vmul.f32 %v3709_v23, %v3709_v23  ;;  %v996_v47 = vperm.slane %v710_v43, %v3962_v1 }
 0x29c   :  { %v1029_v59 = vsel %vm977_vm9, %v1028_v16, %v1027_v48  ;;  %v736_v9 = vmul.f32 %v3729_v22, %v3729_v22  ;;  %v1052_v16 = vsel %vm961_vm5, %v1051_v58, %v1050_v18  ;;  %v1055_v48 = vperm.slane %v735_v21, %v3899_v52 }
 0x29d   :  { %v998_v43 = vsel %vm5234_vm14, %v996_v47, %v994_v44  ;;  %v1004_v31 = vperm.slane %v712_v42, %v3981_v38  ;;  %v1031_v61 = vsel %vm981_vm10, %v1030_v0, %v1029_v59  ;;  %v1053_v3 = vperm.slane %v734_v24, %v3893_v50 }
 0x29e   :  { %v4009_v34 = vpop.xlane.xlu2 %636  ;;  %v4011_v8 = vpop.xlane.xlu1 %634  ;;  %v1002_v23 = vsel %vm5233_vm15, %v1000_v32, %v998_v43  ;;  %v725_v22 = vmul.f32 %v3682_v17, %v3682_v17  ;;  %v1034_v55 = vperm.slane %v724_v13, %v3942_v37  ;;  %v1033_v36 = vsel %vm985_vm11, %v1032_v45, %v1031_v61 }
 0x29f   :  { %v4004_v26 = vpop.xlane.xlu0 %644  ;;  %5549 = vst [vmem:[#allocation98_spill] sm:$0xff] %v4009_v34  ;;  %v726_v58 = vmul.f32 %v3704_v63, %v3704_v63  ;;  %v1057_v21 = vperm.slane %v736_v9, %v3908_v39  ;;  %v1054_v32 = vsel %vm965_vm6, %v1053_v3, %v1052_v16  ;;  %v738_v59 = vmul.f32 %v3740_v49, %v3740_v49 }
 0x2a0   :  { %5548 = vst [vmem:[#allocation97_spill] sm:$0xff] %v4004_v26  ;;  %v748_v44 = vmul.f32 %v3765_v29, %v3765_v29  ;;  %v4062_v61 = vadd.s32 4294967184, %v3876_v53  ;;  %v737_v47 = vmul.f32 %v3718_v30, %v3718_v30  ;;  %v1056_v13 = vsel %vm969_vm7, %v1055_v48, %v1054_v32 }
 0x2a1   :  { %v750_v45 = vmul.f32 %v3776_v4, %v3776_v4  ;;  %v1008_v0 = vperm.slane %v713_v15, %v3965_v6  ;;  %v1006_v9 = vsel %vm1005_vm0, %v1004_v31, %v1002_v23  ;;  %v727_v43 = vmul.f32 %v3702_v56, %v3702_v56 }
 0x2a2   :  { %v749_v16 = vmul.f32 %v3754_v46, %v3754_v46  ;;  %v1036_v3 = vperm.slane %v725_v22, %v3971_v62  ;;  %v1035_v29 = vsel %vm5231_vm12, %v1034_v55, %v1033_v36  ;;  %v1038_v30 = vperm.slane %v726_v58, %v3962_v1 }
 0x2a3   :  { %v739_v48 = vmul.f32 %v3738_v57, %v3738_v57  ;;  %v1058_v32 = vsel %vm973_vm8, %v1057_v21, %v1056_v13  ;;  %v1061_v15 = vperm.slane %v738_v59, %v3926_v25  ;;  %v1081_v23 = vperm.slane %v748_v44, %v3876_v53 }
 0x2a4   :  { %v751_v31 = vmul.f32 %v3774_v19, %v3774_v19  ;;  %v4087_v46 = vmul.f32 %v3666_v51, %v3666_v51  ;;  %v4090_v36 = vsel %vm1009_vm1, %v1008_v0, %v1006_v9  ;;  %v1059_v55 = vperm.slane %v737_v47, %v3911_v7 }
 0x2a5   :  { %v1084_v22 = vperm.slane %v750_v45, %v3893_v50  ;;  %v728_v58 = vmul.f32 %v3691_v20, %v3691_v20  ;;  %v1040_v21 = vperm.slane %v727_v43, %v3986_v40  ;;  %v1037_v59 = vsel %vm5235_vm13, %v1036_v3, %v1035_v29  ;;  %v5554_v29 = vld [vmem:[#allocation40_spill] sm:$0xff] }
 0x2a6   :  { %v4057_v42 = vpop.xlane.xlu2 %642  ;;  %v4059_v24 = vpop.xlane.xlu1 %640  ;;  %v1082_v44 = vperm.slane %v749_v16, %v3879_v14  ;;  %v1039_v13 = vsel %vm5234_vm14, %v1038_v30, %v1037_v59  ;;  %v740_v19 = vmul.f32 %v3727_v11, %v3727_v11  ;;  %v1063_v0 = vperm.slane %v739_v48, %v3939_v12  ;;  %v5557_v59 = vld [vmem:[#allocation59_spill] sm:$0xff]  ;;  %v5561_v11 = vld [vmem:[#allocation32_spill] sm:$0xff] }
 0x2a7   :  { %v4049_v18 = vpop.xlane.xlu0 %650  ;;  %5551 = vst [vmem:[#allocation100_spill] sm:$0xff] %v4057_v42  ;;  %v1060_v47 = vsel %vm977_vm9, %v1059_v55, %v1058_v32  ;;  %v1086_v43 = vperm.slane %v751_v31, %v3899_v52  ;;  %v753_v16 = vmul.f32 %v5554_v29, %v5554_v29  ;;  %v4117_v48 = vmul.f32 %v5557_v59, %v5557_v59  ;;  %v5558_v32 = vld [vmem:[#allocation36_spill] sm:$0xff] }
 0x2a8   :  { %5550 = vst [vmem:[#allocation99_spill] sm:$0xff] %v4049_v18  ;;  %v1062_v45 = vsel %vm981_vm10, %v1061_v15, %v1060_v47  ;;  %v1083_v4 = vsel %vm961_vm5, %v1082_v44, %v1081_v23  ;;  %v752_v55 = vmul.f32 %v5558_v32, %v5558_v32  ;;  %v765_v23 = vmul.f32 %v3821_v27, %v3821_v27  ;;  %v5559_v44 = vld [vmem:[#allocation24_spill] sm:$0xff] }
 0x2a9   :  { %5552 = vst [vmem:[#allocation101_spill] sm:$0xff] %v4059_v24  ;;  %v1085_v15 = vsel %vm965_vm6, %v1084_v22, %v1083_v4  ;;  %v1042_v31 = vperm.slane %v728_v58, %v3981_v38  ;;  %v4127_v47 = vmul.f32 %v5559_v44, %v5559_v44  ;;  %v5560_v29 = vld [vmem:[#allocation68_spill] sm:$0xff]  ;;  %v741_v49 = vmul.f32 %v5561_v11, %v5561_v11  ;;  %v5562_v4 = vld [vmem:[#allocation39_spill] sm:$0xff]  ;;  %v5563_v11 = vld [vmem:[#allocation26_spill] sm:$0xff] }
 0x2aa   :  { %v729_v57 = vmul.f32 %v5560_v29, %v5560_v29  ;;  %v1041_v56 = vsel %vm5233_vm15, %v1040_v21, %v1039_v13  ;;  %v1064_v32 = vsel %vm985_vm11, %v1063_v0, %v1062_v45  ;;  %v754_v22 = vmul.f32 %v5562_v4, %v5562_v4  ;;  %v5564_v13 = vld [vmem:[#allocation31_spill] sm:$0xff] }
 0x2ab   :  { %v764_v58 = vmul.f32 %v3799_v54, %v3799_v54  ;;  %v1065_v27 = vperm.slane %v740_v19, %v3942_v37  ;;  %v1087_v44 = vsel %vm969_vm7, %v1086_v43, %v1085_v15  ;;  %v1090_v20 = vperm.slane %v753_v16, %v3911_v7  ;;  %v5565_v19 = vld [vmem:[#allocation29_spill] sm:$0xff] }
 0x2ac   :  { %v766_v29 = vmul.f32 %v3819_v2, %v3819_v2  ;;  %v730_v21 = vmul.f32 %v5563_v11, %v5563_v11  ;;  %v742_v0 = vmul.f32 %v5564_v13, %v5564_v13  ;;  %v1088_v45 = vperm.slane %v752_v55, %v3908_v39 }
 0x2ad   :  { %v1113_v4 = vperm.slane %v765_v23, %v3879_v14  ;;  %v1044_v54 = vperm.slane %v729_v57, %v3965_v6  ;;  %v743_v43 = vmul.f32 %v5565_v19, %v5565_v19  ;;  %v1066_v16 = vsel %vm5231_vm12, %v1065_v27, %v1064_v32  ;;  %v5566_v57 = vld [vmem:[#allocation38_spill] sm:$0xff] }
 0x2ae   :  { %v4111_v3 = vpop.xlane.xlu2 %648  ;;  %v4113_v30 = vpop.xlane.xlu1 %646  ;;  %v1067_v15 = vperm.slane %v741_v49, %v3971_v62  ;;  %v1092_v2 = vperm.slane %v754_v22, %v3926_v25  ;;  %v1089_v11 = vsel %vm973_vm8, %v1088_v45, %v1087_v44  ;;  %v756_v13 = vmul.f32 %v3794_v35, %v3794_v35 }
 0x2af   :  { %v4104_v9 = vpop.xlane.xlu0 %656  ;;  %5555 = vst [vmem:[#allocation103_spill] sm:$0xff] %v4111_v3  ;;  %v1112_v55 = vperm.slane %v764_v58, %v3876_v53  ;;  %v755_v23 = vmul.f32 %v5566_v57, %v5566_v57  ;;  %v1091_v19 = vsel %vm977_vm9, %v1090_v20, %v1089_v11  ;;  %v1115_v27 = vperm.slane %v766_v29, %v3893_v50  ;;  %v5569_v58 = vld [vmem:[#allocation74_spill] sm:$0xff] }
 0x2b0   :  { %5553 = vst [vmem:[#allocation102_spill] sm:$0xff] %v4104_v9  ;;  %v768_v49 = vmul.f32 %v3830_v10, %v3830_v10  ;;  %v1069_v22 = vperm.slane %v742_v0, %v3962_v1  ;;  %v744_v45 = vmul.f32 %v5569_v58, %v5569_v58  ;;  %v767_v35 = vmul.f32 %v3808_v28, %v3808_v28  ;;  %v5570_v10 = vld [vmem:[#allocation42_spill] sm:$0xff] }
 0x2b1   :  { %5556 = vst [vmem:[#allocation104_spill] sm:$0xff] %v4113_v30  ;;  %v1114_v57 = vsel %vm961_vm5, %v1113_v4, %v1112_v55  ;;  %v1046_v20 = vperm.slane %v730_v21, %v4062_v61  ;;  %v1043_v11 = vsel %vm1005_vm0, %v1042_v31, %v1041_v56  ;;  %v1068_v29 = vsel %vm5235_vm13, %v1067_v15, %v1066_v16  ;;  %v5571_v15 = vld [vmem:[#allocation34_spill] sm:$0xff] }
 0x2b2   :  { %v757_v63 = vmul.f32 %v5570_v10, %v5570_v10  ;;  %v1045_v0 = vsel %vm1009_vm1, %v1044_v54, %v1043_v11  ;;  %v1093_v51 = vsel %vm981_vm10, %v1092_v2, %v1091_v19  ;;  %v1096_v58 = vperm.slane %v756_v13, %v3942_v37  ;;  %v5572_v19 = vld [vmem:[#allocation41_spill] sm:$0xff]  ;;  %v5573_v11 = vld [vmem:[#allocation46_spill] sm:$0xff] }
 0x2b3   :  { %v769_v28 = vmul.f32 %v3828_v60, %v3828_v60  ;;  %v1071_v4 = vperm.slane %v743_v43, %v3986_v40  ;;  %v1094_v21 = vperm.slane %v755_v23, %v3939_v12  ;;  %v1116_v56 = vsel %vm965_vm6, %v1115_v27, %v1114_v57 }
 0x2b4   :  { %v1119_v31 = vperm.slane %v768_v49, %v3908_v39  ;;  %v1070_v16 = vsel %vm5234_vm14, %v1069_v22, %v1068_v29  ;;  %v745_v54 = vmul.f32 %v5571_v15, %v5571_v15  ;;  %v1073_v2 = vperm.slane %v744_v45, %v3981_v38 }
 0x2b5   :  { %v1117_v13 = vperm.slane %v767_v35, %v3899_v52  ;;  %v758_v55 = vmul.f32 %v5572_v19, %v5572_v19  ;;  %v1098_v43 = vperm.slane %v757_v63, %v3971_v62  ;;  %v1095_v23 = vsel %vm985_vm11, %v1094_v21, %v1093_v51  ;;  %v5575_v51 = vld [vmem:[#allocation49_spill] sm:$0xff] }
 0x2b6   :  { %v4168_v32 = vpop.xlane.xlu2 %654  ;;  %v4170_v44 = vpop.xlane.xlu1 %652  ;;  %v759_v57 = vmul.f32 %v5573_v11, %v5573_v11  ;;  %v1097_v27 = vsel %vm5231_vm12, %v1096_v58, %v1095_v23  ;;  %v1121_v49 = vperm.slane %v769_v28, %v3911_v7  ;;  %v771_v45 = vmul.f32 %v3839_v5, %v3839_v5 }
 0x2b7   :  { %v4160_v17 = vpop.xlane.xlu0 %662  ;;  %5567 = vst [vmem:[#allocation59_spill] sm:$0xff] %v4168_v32  ;;  %v1118_v22 = vsel %vm969_vm7, %v1117_v13, %v1116_v56  ;;  %v1012_v29 = vperm.slane %v4117_v48, %v4062_v61  ;;  %v1072_v63 = vsel %vm5233_vm15, %v1071_v4, %v1070_v16  ;;  %v770_v21 = vmul.f32 %v5575_v51, %v5575_v51  ;;  %v5578_v16 = vld [vmem:[#allocation45_spill] sm:$0xff] }
 0x2b8   :  { %5568 = vst [vmem:[#allocation105_spill] sm:$0xff] %v4170_v44  ;;  %v1120_v60 = vsel %vm973_vm8, %v1119_v31, %v1118_v22  ;;  %v1048_v56 = vperm.slane %v4127_v47, %v4029_v41  ;;  %v1047_v13 = vsel %vm1013_vm2, %v1046_v20, %v1045_v0  ;;  %v1075_v23 = vperm.slane %v745_v54, %v3965_v6  ;;  %v5579_v22 = vld [vmem:[#allocation78_spill] sm:$0xff] }
 0x2b9   :  { %v1074_v48 = vsel %vm1005_vm0, %v1073_v2, %v1072_v63  ;;  %v1099_v4 = vsel %vm5235_vm13, %v1098_v43, %v1097_v27  ;;  %v760_v51 = vmul.f32 %v5578_v16, %v5578_v16  ;;  %v1102_v31 = vperm.slane %v759_v57, %v3986_v40  ;;  %v5580_v43 = vld [vmem:[#allocation33_spill] sm:$0xff] }
 0x2ba   :  { %v772_v5 = vmul.f32 %v5579_v22, %v5579_v22  ;;  %v1016_v10 = vperm.slane %v4087_v46, %v4029_v41  ;;  %v1100_v47 = vperm.slane %v758_v55, %v3962_v1  ;;  %v1122_v20 = vsel %vm977_vm9, %v1121_v49, %v1120_v60  ;;  %v5581_v22 = vld [vmem:[#allocation35_spill] sm:$0xff] }
 0x2bb   :  { %v1125_v0 = vperm.slane %v771_v45, %v3939_v12  ;;  %v1014_v54 = vsel %vm1013_vm2, %v1012_v29, %v4090_v36  ;;  %v1049_v2 = vsel %vm1017_vm3, %v1048_v56, %v1047_v13  ;;  %v746_v57 = vmul.f32 %v5580_v43, %v5580_v43  ;;  %v5582_v56 = vld [vmem:[#allocation82_spill] sm:$0xff] }
 0x2bc   :  { %v1123_v27 = vperm.slane %v770_v21, %v3926_v25  ;;  %v1076_v63 = vsel %vm1009_vm1, %v1075_v23, %v1074_v48  ;;  %v747_v46 = vmul.f32 %v5581_v22, %v5581_v22  ;;  %v1101_v55 = vsel %vm5234_vm14, %v1100_v47, %v1099_v4  ;;  %v5583_v13 = vld [vmem:[#allocation58_spill] sm:$0xff]  ;;  %v5584_v48 = vld [vmem:[#allocation84_spill] sm:$0xff] }
 0x2bd   :  { %v1104_v60 = vperm.slane %v760_v51, %v3981_v38  ;;  %v1103_v49 = vsel %vm5233_vm15, %v1102_v31, %v1101_v55  ;;  %v1127_v36 = vperm.slane %v772_v5, %v3942_v37  ;;  %v774_v21 = vmul.f32 %v5582_v56, %v5582_v56  ;;  %v5586_v5 = vld [vmem:[#allocation44_spill] sm:$0xff] }
 0x2be   :  { %v4216_v58 = vpop.xlane.xlu2 %660  ;;  %v4218_v28 = vpop.xlane.xlu1 %658  ;;  %v1124_v45 = vsel %vm981_vm10, %v1123_v27, %v1122_v20  ;;  %v781_v23 = vmul.f32 %v5583_v13, %v5583_v13  ;;  %v780_v4 = vmul.f32 %v5584_v48, %v5584_v48  ;;  %v1018_v51 = vsel %vm1017_vm3, %v1016_v10, %v1014_v54  ;;  %v5587_v27 = vld [vmem:[#allocation53_spill] sm:$0xff] }
 0x2bf   :  { %v4208_v35 = vpop.xlane.xlu0 %668  ;;  %5576 = vst [vmem:[#allocation107_spill] sm:$0xff] %v4216_v58  ;;  %v1126_v29 = vsel %vm985_vm11, %v1125_v0, %v1124_v45  ;;  %v1077_v31 = vperm.slane %v746_v57, %v4062_v61  ;;  %v761_v20 = vmul.f32 %v5586_v5, %v5586_v5  ;;  %v773_v0 = vmul.f32 %v5587_v27, %v5587_v27  ;;  %v5588_v57 = vld [vmem:[#allocation81_spill] sm:$0xff] }
 0x2c0   :  { %5574 = vst [vmem:[#allocation106_spill] sm:$0xff] %v4208_v35  ;;  %v1079_v13 = vperm.slane %v747_v46, %v4029_v41  ;;  %v4271_v48 = vsel %vm5222_vm4, %v1049_v2, %v1018_v51  ;;  %v1105_v10 = vsel %vm1005_vm0, %v1104_v60, %v1103_v49  ;;  %v1128_v54 = vsel %vm5231_vm12, %v1127_v36, %v1126_v29  ;;  %v5589_v51 = vld [vmem:[#allocation55_spill] sm:$0xff]  ;;  %v5590_v29 = vld [vmem:[#allocation76_spill] sm:$0xff] }
 0x2c1   :  { %5577 = vst [vmem:[#allocation108_spill] sm:$0xff] %v4218_v28  ;;  %v1078_v56 = vsel %vm1013_vm2, %v1077_v31, %v1076_v63  ;;  %v775_v16 = vmul.f32 %v5588_v57, %v5588_v57  ;;  %v1131_v27 = vperm.slane %v774_v21, %v3962_v1  ;;  %v1144_v5 = vperm.slane %v781_v23, %v3879_v14  ;;  %v5591_v23 = vld [vmem:[#allocation87_spill] sm:$0xff]  ;;  %v5592_v31 = vld [vmem:[#allocation94_spill] sm:$0xff] }
 0x2c2   :  { %v1143_v19 = vperm.slane %v780_v4, %v3876_v53  ;;  %v796_v46 = vmul.f32 %v4009_v34, %v4009_v34  ;;  %v1106_v2 = vperm.slane %v761_v20, %v3965_v6  ;;  %v1129_v63 = vperm.slane %v773_v0, %v3971_v62  ;;  %v5593_v34 = vld [vmem:[#allocation54_spill] sm:$0xff] }
 0x2c3   :  { %v782_v60 = vmul.f32 %v5589_v51, %v5589_v51  ;;  %v798_v49 = vmul.f32 %v4059_v24, %v4059_v24  ;;  %v4290_v36 = vsel %vm1017_vm3, %v1079_v13, %v1078_v56  ;;  %v762_v21 = vmul.f32 %v5590_v29, %v5590_v29 }
 0x2c4   :  { %v783_v4 = vmul.f32 %v5591_v23, %v5591_v23  ;;  %v797_v20 = vmul.f32 %v5592_v31, %v5592_v31  ;;  %v1107_v0 = vsel %vm1009_vm1, %v1106_v2, %v1105_v10  ;;  %v776_v51 = vmul.f32 %v5593_v34, %v5593_v34  ;;  %v5595_v31 = vld [vmem:[#allocation75_spill] sm:$0xff] }
 0x2c5   :  { %v1133_v57 = vperm.slane %v775_v16, %v3986_v40  ;;  %v1130_v24 = vsel %vm5235_vm13, %v1129_v63, %v1128_v54  ;;  %v1145_v13 = vsel %vm961_vm5, %v1144_v5, %v1143_v19  ;;  %v1174_v29 = vperm.slane %v796_v46, %v3876_v53  ;;  %v5596_v16 = vld [vmem:[#allocation86_spill] sm:$0xff] }
 0x2c6   :  { %v4265_v55 = vpop.xlane.xlu2 %666  ;;  %v4267_v45 = vpop.xlane.xlu1 %664  ;;  %v1132_v56 = vsel %vm5234_vm14, %v1131_v27, %v1130_v24  ;;  %v799_v23 = vmul.f32 %v4057_v42, %v4057_v42  ;;  %v4312_v10 = vmul.f32 %v5595_v31, %v5595_v31  ;;  %v1146_v2 = vperm.slane %v782_v60, %v3893_v50 }
 0x2c7   :  { %v4257_v47 = vpop.xlane.xlu0 %674  ;;  %v784_v54 = vmul.f32 %v5596_v16, %v5596_v16  ;;  %v1177_v24 = vperm.slane %v798_v49, %v3893_v50  ;;  %v1108_v5 = vperm.slane %v762_v21, %v4062_v61  ;;  %v1148_v46 = vperm.slane %v783_v4, %v3899_v52  ;;  %v5599_v16 = vld [vmem:[#allocation57_spill] sm:$0xff] }
 0x2c8   :  { %5585 = vst [vmem:[#allocation33_spill] sm:$0xff] %v4257_v47  ;;  %v1175_v63 = vperm.slane %v797_v20, %v3879_v14  ;;  %v1135_v60 = vperm.slane %v776_v51, %v3981_v38  ;;  %v1134_v34 = vsel %vm5233_vm15, %v1133_v57, %v1132_v56  ;;  %v785_v49 = vmul.f32 %v5599_v16, %v5599_v16 }
 0x2c9   :  { %v1147_v31 = vsel %vm965_vm6, %v1146_v2, %v1145_v13  ;;  %v1179_v21 = vperm.slane %v799_v23, %v3899_v52  ;;  %v801_v4 = vmul.f32 %v4113_v30, %v4113_v30  ;;  %v812_v20 = vmul.f32 %v4208_v35, %v4208_v35  ;;  %v5600_v13 = vld [vmem:[#allocation90_spill] sm:$0xff]  ;;  %v5601_v35 = vld [vmem:[#allocation80_spill] sm:$0xff] }
 0x2ca   :  { %v1176_v15 = vsel %vm961_vm5, %v1175_v63, %v1174_v29  ;;  %v800_v57 = vmul.f32 %v4004_v26, %v4004_v26  ;;  %v1149_v23 = vsel %vm969_vm7, %v1148_v46, %v1147_v31  ;;  %v786_v2 = vmul.f32 %v5600_v13, %v5600_v13 }
 0x2cb   :  { %v1178_v51 = vsel %vm965_vm6, %v1177_v24, %v1176_v15  ;;  %v4355_v26 = vmul.f32 %v5601_v35, %v5601_v35  ;;  %v4358_v15 = vsel %vm1005_vm0, %v1135_v60, %v1134_v34  ;;  %v802_v24 = vmul.f32 %v4111_v3, %v4111_v3 }
 0x2cc   :  { %v1152_v31 = vperm.slane %v785_v49, %v3911_v7  ;;  %v1180_v46 = vsel %vm969_vm7, %v1179_v21, %v1178_v51  ;;  %v1183_v29 = vperm.slane %v801_v4, %v3911_v7  ;;  %v1181_v30 = vperm.slane %v800_v57, %v3908_v39 }
 0x2cd   :  { %v1154_v49 = vperm.slane %v786_v2, %v3926_v25  ;;  %v815_v21 = vmul.f32 %v4257_v47, %v4257_v47  ;;  %v1185_v57 = vperm.slane %v802_v24, %v3926_v25  ;;  %v5607_v24 = vld [vmem:[#allocation93_spill] sm:$0xff]  ;;  %vm5232_vm4 = vcmask 1042434  }
 0x2ce   :  { %v4318_v27 = vpop.xlane.xlu2 %672  ;;  %v4320_v19 = vpop.xlane.xlu1 %670 }
 0x2cf   :  { %v4308_v11 = vpop.xlane.xlu0 %680  ;;  %5597 = vst [vmem:[#allocation109_spill] sm:$0xff] %v4318_v27  ;;  %v813_v42 = vmul.f32 %v4320_v19, %v4320_v19  ;;  %v814_v56 = vmul.f32 %v4318_v27, %v4318_v27 }
 0x2d0   :  { %5594 = vst [vmem:[#allocation35_spill] sm:$0xff] %v4308_v11 }
 0x2d1   :  { %5598 = vst [vmem:[#allocation110_spill] sm:$0xff] %v4320_v19  ;;  %v1150_v19 = vperm.slane %v784_v54, %v3908_v39  ;;  %v1206_v63 = vperm.slane %v813_v42, %v3879_v14  ;;  %v4351_v54 = vsel %vm1013_vm2, %v1108_v5, %v1107_v0  ;;  %v1205_v42 = vperm.slane %v812_v20, %v3876_v53  ;;  %v5602_v5 = vld [vmem:[#allocation89_spill] sm:$0xff] }
 0x2d2   :  { %v787_v27 = vmul.f32 %v5602_v5, %v5602_v5  ;;  %v1208_v34 = vperm.slane %v814_v56, %v3893_v50  ;;  %v5605_v20 = vld [vmem:[#allocation85_spill] sm:$0xff]  ;;  %v1182_v56 = vsel %vm973_vm8, %v1181_v30, %v1180_v46  ;;  %v789_v30 = vmul.f32 %v5607_v24, %v5607_v24 }
 0x2d3   :  { %v1151_v0 = vsel %vm973_vm8, %v1150_v19, %v1149_v23  ;;  %v1207_v4 = vsel %vm961_vm5, %v1206_v63, %v1205_v42  ;;  %v788_v51 = vmul.f32 %v5605_v20, %v5605_v20  ;;  %v804_v23 = vmul.f32 %v4170_v44, %v4170_v44  ;;  %v5608_v20 = vld [vmem:[#allocation56_spill] sm:$0xff] }
 0x2d4   :  { %v1153_v2 = vsel %vm977_vm9, %v1152_v31, %v1151_v0  ;;  %v803_v63 = vmul.f32 %v4049_v18, %v4049_v18  ;;  %v1184_v42 = vsel %vm977_vm9, %v1183_v29, %v1182_v56  ;;  %v1209_v46 = vsel %vm965_vm6, %v1208_v34, %v1207_v4 }
 0x2d5   :  { %v4402_v31 = vmul.f32 %v5608_v20, %v5608_v20  ;;  %v1155_v0 = vsel %vm981_vm10, %v1154_v49, %v1153_v2  ;;  %v805_v29 = vmul.f32 %v4168_v32, %v4168_v32  ;;  %v1210_v56 = vperm.slane %v815_v21, %v3899_v52 }
 0x2d6   :  { %v4371_v60 = vpop.xlane.xlu2 %678  ;;  %v4373_v3 = vpop.xlane.xlu1 %676  ;;  %v1158_v18 = vperm.slane %v788_v51, %v3942_v37  ;;  %v1186_v34 = vsel %vm981_vm10, %v1185_v57, %v1184_v42  ;;  %v1189_v4 = vperm.slane %v804_v23, %v3942_v37  ;;  %v1187_v16 = vperm.slane %v803_v63, %v3939_v12 }
 0x2d7   :  { %5603 = vst [vmem:[#allocation90_spill] sm:$0xff] %v4371_v60  ;;  %v816_v19 = vmul.f32 %v4373_v3, %v4373_v3  ;;  %v4387_v5 = vpop.xlane.xlu0 %686  ;;  %v817_v47 = vmul.f32 %v4371_v60, %v4371_v60  ;;  %v5609_v60 = vld [vmem:[#allocation83_spill] sm:$0xff]  ;;  %v1211_v2 = vsel %vm969_vm7, %v1210_v56, %v1209_v46  ;;  %v1160_v32 = vperm.slane %v789_v30, %v3971_v62  ;;  %v5613_v30 = vld [vmem:[#allocation88_spill] sm:$0xff] }
 0x2d8   :  { %5604 = vst [vmem:[#allocation80_spill] sm:$0xff] %v4373_v3  ;;  %v1156_v3 = vperm.slane %v787_v27, %v3939_v12  ;;  %v777_v27 = vmul.f32 %v5609_v60, %v5609_v60  ;;  %v818_v51 = vmul.f32 %v4308_v11, %v4308_v11  ;;  %v1188_v63 = vsel %vm985_vm11, %v1187_v16, %v1186_v34 }
 0x2d9   :  { %5606 = vst [vmem:[#allocation111_spill] sm:$0xff] %v4387_v5  ;;  %v1212_v44 = vperm.slane %v816_v19, %v3908_v39  ;;  %v5610_v19 = vld [vmem:[#allocation92_spill] sm:$0xff]  ;;  %v1214_v49 = vperm.slane %v817_v47, %v3911_v7  ;;  %v807_v47 = vmul.f32 %v4218_v28, %v4218_v28  ;;  %v791_v46 = vmul.f32 %v5613_v30, %v5613_v30 }
 0x2da   :  { %v790_v24 = vmul.f32 %v5610_v19, %v5610_v19  ;;  %v1157_v21 = vsel %vm985_vm11, %v1156_v3, %v1155_v0  ;;  %v1191_v19 = vperm.slane %v805_v29, %v3971_v62  ;;  %v1190_v0 = vsel %vm5231_vm12, %v1189_v4, %v1188_v63 }
 0x2db   :  { %v1213_v57 = vsel %vm973_vm8, %v1212_v44, %v1211_v2  ;;  %v806_v44 = vmul.f32 %v4104_v9, %v4104_v9  ;;  %v1159_v29 = vsel %vm5231_vm12, %v1158_v18, %v1157_v21  ;;  %v808_v4 = vmul.f32 %v4216_v58, %v4216_v58  ;;  %v5615_v58 = vld [vmem:[#allocation95_spill] sm:$0xff] }
 0x2dc   :  { %v1162_v16 = vperm.slane %v790_v24, %v3962_v1  ;;  %v1215_v34 = vsel %vm977_vm9, %v1214_v49, %v1213_v57  ;;  %v1161_v11 = vsel %vm5235_vm13, %v1160_v32, %v1159_v29  ;;  %v1216_v63 = vperm.slane %v818_v51, %v3926_v25 }
 0x2dd   :  { %v1139_v24 = vperm.slane %v4402_v31, %v4062_v61  ;;  %v1137_v18 = vperm.slane %v777_v27, %v3965_v6  ;;  %v1192_v49 = vsel %vm5235_vm13, %v1191_v19, %v1190_v0  ;;  %v1195_v21 = vperm.slane %v807_v47, %v3986_v40 }
 0x2de   :  { %v4423_v42 = vpop.xlane.xlu2 %684  ;;  %v4425_v23 = vpop.xlane.xlu1 %682  ;;  %v1164_v32 = vperm.slane %v791_v46, %v3986_v40  ;;  %v1193_v57 = vperm.slane %v806_v44, %v3962_v1  ;;  %v1217_v29 = vsel %vm981_vm10, %v1216_v63, %v1215_v34  ;;  %v1163_v51 = vsel %vm5234_vm14, %v1162_v16, %v1161_v11 }
 0x2df   :  { %5611 = vst [vmem:[#allocation56_spill] sm:$0xff] %v4423_v42  ;;  %v819_v3 = vmul.f32 %v4425_v23, %v4425_v23  ;;  %v820_v56 = vmul.f32 %v4423_v42, %v4423_v42  ;;  %v4450_v42 = vpop.xlane.xlu0 %692  ;;  %v793_v9 = vmul.f32 %v5615_v58, %v5615_v58  ;;  %v821_v31 = vmul.f32 %v4387_v5, %v4387_v5 }
 0x2e0   :  { %5612 = vst [vmem:[#allocation83_spill] sm:$0xff] %v4425_v23  ;;  %v5614_v23 = vld [vmem:[#allocation96_spill] sm:$0xff]  ;;  %v1197_v47 = vperm.slane %v808_v4, %v3981_v38  ;;  %v1194_v46 = vsel %vm5234_vm14, %v1193_v57, %v1192_v49  ;;  %v810_v44 = vmul.f32 %v4267_v45, %v4267_v45  ;;  %v5617_v4 = vld [vmem:[#allocation91_spill] sm:$0xff]  ;;  %v1165_v49 = vsel %vm5233_vm15, %v1164_v32, %v1163_v51 }
 0x2e1   :  { %v1218_v2 = vperm.slane %v819_v3, %v3939_v12  ;;  %v792_v28 = vmul.f32 %v5614_v23, %v5614_v23  ;;  %v1220_v3 = vperm.slane %v820_v56, %v3942_v37  ;;  %v809_v56 = vmul.f32 %v4160_v17, %v4160_v17 }
 0x2e2   :  { %v1196_v16 = vsel %vm5233_vm15, %v1195_v21, %v1194_v46  ;;  %v794_v63 = vmul.f32 %v5617_v4, %v5617_v4  ;;  %v795_v21 = vmul.f32 %v4011_v8, %v4011_v8  ;;  %v1222_v46 = vperm.slane %v821_v31, %v3971_v62 }
 0x2e3   :  { %v1219_v27 = vsel %vm985_vm11, %v1218_v2, %v1217_v29  ;;  %v1166_v19 = vperm.slane %v792_v28, %v3981_v38  ;;  %v1138_v2 = vsel %vm1009_vm1, %v1137_v18, %v4358_v15  ;;  %v1168_v29 = vperm.slane %v793_v9, %v3965_v6 }
 0x2e4   :  { %v1221_v57 = vsel %vm5231_vm12, %v1220_v3, %v1219_v27  ;;  %v811_v15 = vmul.f32 %v4265_v55, %v4265_v55  ;;  %v1201_v18 = vperm.slane %v810_v44, %v4062_v61  ;;  %v1198_v32 = vsel %vm1005_vm0, %v1197_v47, %v1196_v16 }
 0x2e5   :  { %v1167_v5 = vsel %vm1005_vm0, %v1166_v19, %v1165_v49  ;;  %v1199_v3 = vperm.slane %v809_v56, %v3965_v6  ;;  %v1223_v51 = vsel %vm5235_vm13, %v1222_v46, %v1221_v57  ;;  %v1239_v31 = vsel %vm5232_vm4, %v4290_v36, %v4271_v48 }
 0x2e6   :  { %v4472_v0 = vpop.xlane.xlu2 %690  ;;  %v4474_v11 = vpop.xlane.xlu1 %688  ;;  %v824_v27 = vmul.f32 %v4450_v42, %v4450_v42  ;;  %v5618_v47 = vperm.slane %v4312_v10, %v4029_v41  ;;  %vm5240_vm12 = vcmask 1043459   ;;  %v1172_v56 = vperm.slane %v795_v21, %v4029_v41 }
 0x2e7   :  { %5616 = vst [vmem:[#allocation88_spill] sm:$0xff] %v4472_v0  ;;  %v823_v34 = vmul.f32 %v4472_v0, %v4472_v0  ;;  %v822_v28 = vmul.f32 %v4474_v11, %v4474_v11  ;;  %v1140_v16 = vsel %vm1013_vm2, %v1139_v24, %v1138_v2  ;;  %v1169_v48 = vsel %vm1009_vm1, %v1168_v29, %v1167_v5 }
 0x2e8   :  { %v1111_v44 = vsel %vm1017_vm3, %v5618_v47, %v4351_v54  ;;  %v1200_v36 = vsel %vm1009_vm1, %v1199_v3, %v1198_v32  ;;  %v1203_v49 = vperm.slane %v811_v15, %v4029_v41  ;;  %v1228_v2 = vperm.slane %v824_v27, %v3981_v38 }
 0x2e9   :  { %v1224_v0 = vperm.slane %v822_v28, %v3962_v1  ;;  %v1226_v9 = vperm.slane %v823_v34, %v3986_v40  ;;  %v4508_v28 = vpop.xlane.xlu0 %698  ;;  %v1170_v34 = vperm.slane %v794_v63, %v4062_v61  ;;  %v1202_v54 = vsel %vm1013_vm2, %v1201_v18, %v1200_v36 }
 0x2ea   :  { %v827_v5 = vmul.f32 %v4508_v28, %v4508_v28  ;;  %vm5236_vm4 = vcmask 1044484   ;;  %v1204_v32 = vsel %vm1017_vm3, %v1203_v49, %v1202_v54  ;;  %vm5238_vm13 = vcmask 1047559  }
 0x2eb   :  { %v1225_v19 = vsel %vm5234_vm14, %v1224_v0, %v1223_v51  ;;  %v1141_v0 = vperm.slane %v4355_v26, %v4029_v41  ;;  %v1171_v29 = vsel %vm1013_vm2, %v1170_v34, %v1169_v48  ;;  %vm5239_vm14 = vcmask 1046534  }
 0x2ec   :  { %v1227_v21 = vsel %vm5233_vm15, %v1226_v9, %v1225_v19  ;;  %v1173_v18 = vsel %vm1017_vm3, %v1172_v56, %v1171_v29  ;;  %vm5237_vm15 = vcmask 1045509   ;;  %v1241_v9 = vsel %vm5240_vm12, %v1111_v44, %v1239_v31 }
 0x2ed   :  { %v1142_v63 = vsel %vm1017_vm3, %v1141_v0, %v1140_v16  ;;  %v1229_v3 = vsel %vm1005_vm0, %v1228_v2, %v1227_v21  ;;  %v1234_v51 = vperm.slane %v827_v5, %v4029_v41 }
 0x2ee   :  { %v4523_v57 = vpop.xlane.xlu2 %696  ;;  %v4525_v10 = vpop.xlane.xlu1 %694  ;;  %v1243_v19 = vsel %vm5236_vm4, %v1142_v63, %v1241_v9 }
 0x2ef   :  { %v826_v24 = vmul.f32 %v4523_v57, %v4523_v57  ;;  %v825_v26 = vmul.f32 %v4525_v10, %v4525_v10  ;;  %v1245_v16 = vsel %vm5237_vm15, %v1173_v18, %v1243_v19 }
 0x2f0   :  { %v1247_v48 = vsel %vm5239_vm14, %v1204_v32, %v1245_v16 }
 0x2f1   :  { %v1232_v46 = vperm.slane %v826_v24, %v4062_v61  ;;  %v1230_v15 = vperm.slane %v825_v26, %v3965_v6 }
 0x2f3   :  { %v1231_v27 = vsel %vm1009_vm1, %v1230_v15, %v1229_v3 }
 0x2f4   :  { %v1233_v47 = vsel %vm1013_vm2, %v1232_v46, %v1231_v27 }
 0x2f5   :  { %v1235_v56 = vsel %vm1017_vm3, %v1234_v51, %v1233_v47 }
 0x2f6   :  { %v1249_v36 = vsel %vm5238_vm13, %v1235_v56, %v1247_v48  ;;  %v2641_v56 = vmov 0   ;;  %v5619_v48 = vld [vmem:[#allocation2_spill] sm:$0xff] }
 0x2f7   :  { %1251 = vadd.xlane.f32.xlu1 %v1249_v36  ;;  %2617 = vset.pattern.permute.xlu0 %v2641_v56 }
 0x2f8   :  { %2618 = vset.pattern.permute.xlu1 %v2641_v56  ;;  %2616 = vset.pattern.permute.xlu2 %v2641_v56  ;;  %v5627_v56 = vld [vmem:[#allocation10_spill] sm:$0xff] }
 0x36a   :  { %v1252_v31 = vpop.xlane.xlu1 %1251 }
 0x36b   :  { %2623 = vrsqrt.f32 %v1252_v31  ;;  %vm1260_vm4 = vcmp.eq.f32.partialorder %v1252_v31, inf  ;;  %v1263_v24 = vand.u32 2147483648, %v1252_v31  ;;  %vm1262_vm15 = vcmp.eq.f32.partialorder %v1252_v31, 0.0 }
 0x371   :  { %v2624_v44 = vpop.eup %2623 }
 0x372   :  { %v1254_v0 = vmul.f32 %v2624_v44, %v1252_v31 }
 0x374   :  { %v1255_v34 = vmul.f32 %v2624_v44, %v1254_v0  ;;  %v5621_v0 = vld [vmem:[#allocation3_spill] sm:$0xff] }
 0x376   :  { %v1256_v49 = vmul.f32 0.5, %v1255_v34 }
 0x378   :  { %v1257_v54 = vsub.f32 1.5, %v1256_v49 }
 0x37a   :  { %v1258_v21 = vmul.f32 %v2624_v44, %v1257_v54  ;;  %v5622_v54 = vld [vmem:[#allocation13_spill] sm:$0xff] }
 0x37c   :  { %v1259_v5 = vmul.f32 %v1258_v21, %v1252_v31 }
 0x37e   :  { %v1261_v26 = vsel %vm1260_vm4, %v1252_v31, %v1259_v5  ;;  %v5620_v31 = vld [vmem:[#allocation9_spill] sm:$0xff]  ;;  %v5623_v5 = vld [vmem:[#allocation16_spill] sm:$0xff] }
 0x37f   :  { %v1264_v2 = vsel %vm1262_vm15, %v1263_v24, %v1261_v26  ;;  %v5624_v26 = vld [vmem:[#allocation11_spill] sm:$0xff] }
 0x380   :  { %v4552_v63 = vadd.f32 1e-08, %v1264_v2 }
 0x382   :  { %v1267_v29 = vperm.slane %v4552_v63, 0  ;;  %v1268_v16 = vperm.slane %v4552_v63, 1 }
 0x384   :  { %2625 = vrcp.f32 %v1267_v29  ;;  %v1294_v9 = vand.u32 2147483648, %v1267_v29  ;;  %vm1288_vm14 = vweird.f32 %v1267_v29  ;;  %v1292_v51 = vand.u32 2147483647, %v1267_v29 }
 0x385   :  { %2627 = vrcp.f32 %v1268_v16 }
 0x386   :  { %v1295_v19 = vor.u32 1.1754944e-38, %v1294_v9  ;;  %vm1293_vm4 = vcmp.eq.f32.partialorder %v1292_v51, 8.507059e+37 }
 0x38a   :  { %v2626_v46 = vpop.eup %2625 }
 0x38b   :  { %v1284_v15 = vmul.f32 %v2626_v46, %v1267_v29  ;;  %vm1289_vm13 = vweird.f32 %v2626_v46  ;;  %v2628_v49 = vpop.eup %2627 }
 0x38c   :  { %vm1290_vm12 = vmor %vm1288_vm14, %vm1289_vm13  ;;  %v1314_v29 = vmul.f32 %v2628_v49, %v1268_v16  ;;  %vm1318_vm13 = vweird.f32 %v1268_v16 }
 0x38d   :  { %v1285_v18 = vsub.f32 1.0, %v1284_v15  ;;  %v5625_v15 = vld [vmem:[#allocation8_spill] sm:$0xff] }
 0x38f   :  { %v1286_v32 = vmul.f32 %v2626_v46, %v1285_v18 }
 0x391   :  { %v1287_v3 = vadd.f32 %v2626_v46, %v1286_v32 }
 0x393   :  { %v1291_v27 = vsel %vm1290_vm12, %v2626_v46, %v1287_v3  ;;  %v1315_v46 = vsub.f32 1.0, %v1314_v29  ;;  %v5626_v3 = vld [vmem:[#allocation4_spill] sm:$0xff]  ;;  %vm1319_vm12 = vweird.f32 %v2628_v49 }
 0x394   :  { %v1296_v47 = vsel %vm1293_vm4, %v1295_v19, %v1291_v27  ;;  %v1324_v19 = vand.u32 2147483648, %v1268_v16  ;;  %vm1320_vm14 = vmor %vm1318_vm13, %vm1319_vm12 }
 0x395   :  { %v1299_v36 = vmul.f32 %v1296_v47, %v5619_v48  ;;  %v1298_v44 = vmul.f32 %v1296_v47, %v5620_v31  ;;  %v1297_v34 = vmul.f32 %v1296_v47, %v5621_v0  ;;  %v1302_v21 = vmul.f32 %v1296_v47, %v5622_v54 }
 0x396   :  { %v1305_v24 = vmul.f32 %v1296_v47, %v5623_v5  ;;  %v1300_v2 = vmul.f32 %v1296_v47, %v5624_v26  ;;  %v1304_v18 = vmul.f32 %v1296_v47, %v5625_v15  ;;  %v1308_v32 = vmul.f32 %v1296_v47, %v3659_v33  ;;  %v5633_v15 = vld [vmem:[#allocation62_spill] sm:$0xff] }
 0x397   :  { %1658 = vperm.xlu1 %2618, %v1299_v36   ;;  %1655 = vperm.xlu0 %2617, %v1298_v44   ;;  %v1301_v9 = vmul.f32 %v1296_v47, %v5626_v3  ;;  %v1316_v51 = vmul.f32 %v2628_v49, %v1315_v46  ;;  %v1307_v48 = vmul.f32 %v1296_v47, %v5627_v56  ;;  %v1322_v36 = vand.u32 2147483647, %v1268_v16  ;;  %v5628_v44 = vld [vmem:[#allocation12_spill] sm:$0xff]  ;;  %v5632_v16 = vld [vmem:[#allocation17_spill] sm:$0xff] }
 0x398   :  { %1652 = vperm.xlu2 %2616, %v1297_v34   ;;  %v1311_v31 = vmul.f32 %v1296_v47, %v5557_v59  ;;  %v1303_v0 = vmul.f32 %v1296_v47, %v5628_v44  ;;  %v1325_v34 = vor.u32 1.1754944e-38, %v1324_v19  ;;  %v1269_v59 = vperm.slane %v4552_v63, 2  ;;  %v5637_v56 = vld [vmem:[#allocation20_spill] sm:$0xff]  ;;  %v5638_v44 = vld [vmem:[#allocation21_spill] sm:$0xff] }
 0x399   :  { %v1317_v27 = vadd.f32 %v2628_v49, %v1316_v51  ;;  %vm1323_vm15 = vcmp.eq.f32.partialorder %v1322_v36, 8.507059e+37 }
 0x39a   :  { %2629 = vrcp.f32 %v1269_v59  ;;  %vm1348_vm12 = vweird.f32 %v1269_v59 }
 0x39b   :  { %v1321_v33 = vsel %vm1320_vm14, %v2628_v49, %v1317_v27  ;;  %v5636_v27 = vld [vmem:[#allocation65_spill] sm:$0xff] }
 0x39c   :  { %v1326_v54 = vsel %vm1323_vm15, %v1325_v34, %v1321_v33  ;;  %v5639_v33 = vld [vmem:[#allocation67_spill] sm:$0xff] }
 0x39d   :  { %v1327_v46 = vmul.f32 %v1326_v54, %v5632_v16  ;;  %v1331_v49 = vmul.f32 %v1326_v54, %v5633_v15  ;;  %v1334_v19 = vmul.f32 %v1326_v54, %v5636_v27  ;;  %v1337_v34 = vmul.f32 %v1326_v54, %v5639_v33  ;;  %v5644_v27 = vld [vmem:[#allocation63_spill] sm:$0xff]  ;;  %v5649_v33 = vld [vmem:[#allocation66_spill] sm:$0xff] }
 0x39e   :  { %v1352_v16 = vand.u32 2147483647, %v1269_v59 }
 0x39f   :  { %1667 = vperm.xlu1 %2618, %v1302_v21   ;;  %1676 = vperm.xlu0 %2617, %v1305_v24   ;;  %v5629_v21 = vld [vmem:[#allocation14_spill] sm:$0xff]  ;;  %v5630_v24 = vld [vmem:[#allocation60_spill] sm:$0xff] }
 0x3a0   :  { %1661 = vperm.xlu2 %2616, %v1300_v2   ;;  %v1310_v5 = vmul.f32 %v1296_v47, %v5629_v21  ;;  %v1328_v26 = vmul.f32 %v1326_v54, %v5630_v24  ;;  %v5631_v2 = vld [vmem:[#allocation15_spill] sm:$0xff]  ;;  %v2630_v3 = vpop.eup %2629  ;;  %v5640_v21 = vld [vmem:[#allocation22_spill] sm:$0xff]  ;;  %vm1353_vm14 = vcmp.eq.f32.partialorder %v1352_v16, 8.507059e+37 }
 0x3a1   :  { %v1306_v29 = vmul.f32 %v1296_v47, %v5631_v2  ;;  %v1344_v36 = vmul.f32 %v2630_v3, %v1269_v59  ;;  %vm1349_vm4 = vweird.f32 %v2630_v3  ;;  %v1354_v2 = vand.u32 2147483648, %v1269_v59 }
 0x3a2   :  { %vm1350_vm13 = vmor %vm1348_vm12, %vm1349_vm4 }
 0x3a7   :  { %1673 = vperm.xlu1 %2618, %v1304_v18   ;;  %1685 = vperm.xlu0 %2617, %v1308_v32   ;;  %v5634_v18 = vld [vmem:[#allocation18_spill] sm:$0xff] }
 0x3a8   :  { %1664 = vperm.xlu2 %2616, %v1301_v9   ;;  %v1309_v32 = vmul.f32 %v1296_v47, %v5634_v18  ;;  %v5635_v9 = vld [vmem:[#allocation19_spill] sm:$0xff] }
 0x3a9   :  { %v1330_v51 = vmul.f32 %v1326_v54, %v5635_v9  ;;  %v1355_v9 = vor.u32 1.1754944e-38, %v1354_v2 }
 0x3af   :  { %1682 = vperm.xlu1 %2618, %v1307_v48   ;;  %1694 = vperm.xlu0 %2617, %v1311_v31   ;;  %v1312_v48 = vmul.f32 %v1296_v47, %v5637_v56  ;;  %v1345_v31 = vsub.f32 1.0, %v1344_v36  ;;  %v5645_v56 = vld [vmem:[#allocation70_spill] sm:$0xff]  ;;  %v5646_v36 = vld [vmem:[#allocation64_spill] sm:$0xff] }
 0x3b0   :  { %1670 = vperm.xlu2 %2616, %v1303_v0   ;;  %v1333_v0 = vmul.f32 %v1326_v54, %v5638_v44  ;;  %v1335_v59 = vmul.f32 %v1326_v54, %v5646_v36 }
 0x3b1   :  { %v1346_v24 = vmul.f32 %v2630_v3, %v1345_v31  ;;  %v5647_v31 = vld [vmem:[#allocation24_spill] sm:$0xff] }
 0x3b2   :  { %v1342_v44 = vmul.f32 %v1326_v54, %v5647_v31 }
 0x3b7   :  { %1691 = vperm.xlu1 %2618, %v1310_v5   ;;  %1703 = vperm.xlu0 %2617, %v1328_v26   ;;  %v1329_v5 = vmul.f32 %v1326_v54, %v5640_v21  ;;  %v1347_v26 = vadd.f32 %v2630_v3, %v1346_v24  ;;  %v1270_v21 = vperm.slane %v4552_v63, 3 }
 0x3b8   :  { %1679 = vperm.xlu2 %2616, %v1306_v29   ;;  %v5641_v29 = vld [vmem:[#allocation23_spill] sm:$0xff] }
 0x3b9   :  { %v1336_v47 = vmul.f32 %v1326_v54, %v5641_v29  ;;  %v5652_v29 = vld [vmem:[#allocation26_spill] sm:$0xff]  ;;  %2631 = vrcp.f32 %v1270_v21  ;;  %vm1378_vm4 = vweird.f32 %v1270_v21 }
 0x3bf   :  { %1700 = vperm.xlu1 %2618, %v1327_v46   ;;  %1712 = vperm.xlu0 %2617, %v1331_v49   ;;  %v5642_v46 = vld [vmem:[#allocation68_spill] sm:$0xff]  ;;  %v5643_v49 = vld [vmem:[#allocation61_spill] sm:$0xff] }
 0x3c0   :  { %1688 = vperm.xlu2 %2616, %v1309_v32   ;;  %v1340_v15 = vmul.f32 %v1326_v54, %v5642_v46  ;;  %v1332_v18 = vmul.f32 %v1326_v54, %v5643_v49  ;;  %v1351_v32 = vsel %vm1350_vm13, %v2630_v3, %v1347_v26  ;;  %v5651_v26 = vld [vmem:[#allocation73_spill] sm:$0xff]  ;;  %v2632_v46 = vpop.eup %2631 }
 0x3c1   :  { %vm1379_vm15 = vweird.f32 %v2632_v46 }
 0x3c2   :  { %vm1380_vm12 = vmor %vm1378_vm4, %vm1379_vm15  ;;  %vm5670_vm15 = vcmask 654912   ;;  %vm5671_vm4 = vcmask 720512  }
 0x3c7   :  { %1709 = vperm.xlu1 %2618, %v1330_v51   ;;  %1721 = vperm.xlu0 %2617, %v1334_v19   ;;  %v4584_v51 = vsel %vm1353_vm14, %v1355_v9, %v1351_v32  ;;  %v1339_v19 = vmul.f32 %v1326_v54, %v5644_v27  ;;  %v5655_v9 = vld [vmem:[#allocation69_spill] sm:$0xff]  ;;  %vm5666_vm14 = vcmask 589312  }
 0x3c8   :  { %1697 = vperm.xlu2 %2616, %v1312_v48   ;;  %v1357_v48 = vmul.f32 %v4584_v51, %v5645_v56  ;;  %v1363_v2 = vmul.f32 %v4584_v51, %v5651_v26  ;;  %v1358_v27 = vmul.f32 %v4584_v51, %v5655_v9 }
 0x3cf   :  { %1718 = vperm.xlu1 %2618, %v1333_v0   ;;  %1730 = vperm.xlu0 %2617, %v1337_v34   ;;  %v5648_v0 = vld [vmem:[#allocation72_spill] sm:$0xff]  ;;  %v1338_v34 = vmul.f32 %v1326_v54, %v5649_v33 }
 0x3d0   :  { %1706 = vperm.xlu2 %2616, %v1329_v5   ;;  %v1360_v3 = vmul.f32 %v4584_v51, %v5648_v0  ;;  %v5650_v5 = vld [vmem:[#allocation25_spill] sm:$0xff] }
 0x3d1   :  { %v1359_v24 = vmul.f32 %v4584_v51, %v5650_v5  ;;  %v1384_v5 = vand.u32 2147483648, %v1270_v21 }
 0x3d7   :  { %1727 = vperm.xlu1 %2618, %v1336_v47   ;;  %1739 = vperm.xlu0 %2617, %v1340_v15   ;;  %v1341_v47 = vmul.f32 %v1326_v54, %v5652_v29  ;;  %v5653_v15 = vld [vmem:[#allocation27_spill] sm:$0xff]  ;;  %v1372_v29 = vmul.f32 %v4584_v51, %v5581_v22 }
 0x3d8   :  { %1715 = vperm.xlu2 %2616, %v1332_v18   ;;  %v1362_v49 = vmul.f32 %v4584_v51, %v5653_v15  ;;  %v5654_v18 = vld [vmem:[#allocation32_spill] sm:$0xff] }
 0x3d9   :  { %v1366_v32 = vmul.f32 %v4584_v51, %v5654_v18  ;;  %v1385_v18 = vor.u32 1.1754944e-38, %v1384_v5 }
 0x3df   :  { %1736 = vperm.xlu1 %2618, %v1339_v19   ;;  %1748 = vperm.xlu0 %2617, %v1357_v48   ;;  %v1374_v19 = vmul.f32 %v2632_v46, %v1270_v21  ;;  %v5656_v48 = vld [vmem:[#allocation28_spill] sm:$0xff] }
 0x3e0   :  { %1724 = vperm.xlu2 %2616, %v1335_v59   ;;  %v1365_v36 = vmul.f32 %v4584_v51, %v5656_v48  ;;  %v5657_v59 = vld [vmem:[#allocation74_spill] sm:$0xff] }
 0x3e1   :  { %v1375_v56 = vsub.f32 1.0, %v1374_v19  ;;  %v1369_v31 = vmul.f32 %v4584_v51, %v5657_v59 }
 0x3e7   :  { %1745 = vperm.xlu1 %2618, %v1342_v44   ;;  %1757 = vperm.xlu0 %2617, %v1360_v3   ;;  %v5658_v44 = vld [vmem:[#allocation71_spill] sm:$0xff]  ;;  %v1376_v3 = vmul.f32 %v2632_v46, %v1375_v56 }
 0x3e8   :  { %1733 = vperm.xlu2 %2616, %v1338_v34   ;;  %v1361_v0 = vmul.f32 %v4584_v51, %v5658_v44  ;;  %v5661_v44 = vld [vmem:[#allocation37_spill] sm:$0xff] }
 0x3e9   :  { %v1377_v34 = vadd.f32 %v2632_v46, %v1376_v3  ;;  %v5662_v3 = vld [vmem:[#allocation31_spill] sm:$0xff] }
 0x3ef   :  { %1754 = vperm.xlu1 %2618, %v1359_v24   ;;  %1766 = vperm.xlu0 %2617, %v1363_v2   ;;  %v5659_v24 = vld [vmem:[#allocation29_spill] sm:$0xff]  ;;  %v1382_v2 = vand.u32 2147483647, %v1270_v21 }
 0x3f0   :  { %1742 = vperm.xlu2 %2616, %v1341_v47   ;;  %v1368_v26 = vmul.f32 %v4584_v51, %v5659_v24  ;;  %v5660_v47 = vld [vmem:[#allocation30_spill] sm:$0xff] }
 0x3f1   :  { %v1364_v15 = vmul.f32 %v4584_v51, %v5660_v47  ;;  %vm1383_vm13 = vcmp.eq.f32.partialorder %v1382_v2, 8.507059e+37  ;;  %v5663_v47 = vld [vmem:[#allocation5_spill] sm:$0xff] }
 0x3f2   :  { %v1653_v16 = vpop.permute.xlu2 %1652 }
 0x3f3   :  { %v2035_v21 = vperm.slane %v1653_v16, %v3876_v53 }
 0x3f7   :  { %1763 = vperm.xlu1 %2618, %v1362_v49   ;;  %1775 = vperm.xlu0 %2617, %v1366_v32   ;;  %v1381_v49 = vsel %vm1380_vm12, %v2632_v46, %v1377_v34  ;;  %v1371_v46 = vmul.f32 %v4584_v51, %v5580_v43  ;;  %v1367_v34 = vmul.f32 %v4584_v51, %v5662_v3  ;;  %v5668_v3 = vld [vmem:[#allocation43_spill] sm:$0xff]  ;;  %vm5672_vm12 = vcmask 786112  }
 0x3f8   :  { %1751 = vperm.xlu2 %2616, %v1358_v27   ;;  %v4619_v56 = vsel %vm1383_vm13, %v1385_v18, %v1381_v49  ;;  %v5664_v18 = vld [vmem:[#allocation40_spill] sm:$0xff] }
 0x3fa   :  { %v1662_v54 = vpop.permute.xlu2 %1661 }
 0x3fb   :  { %v2040_v48 = vperm.slane %v1662_v54, %v3899_v52 }
 0x3ff   :  { %1772 = vperm.xlu1 %2618, %v1365_v36   ;;  %1784 = vperm.xlu0 %2617, %v1369_v31  }
 0x400   :  { %1760 = vperm.xlu2 %2616, %v1361_v0   ;;  %v1389_v0 = vmul.f32 %v4619_v56, %v5661_v44 }
 0x402   :  { %v1665_v33 = vpop.permute.xlu2 %1664 }
 0x403   :  { %v2042_v59 = vperm.slane %v1665_v33, %v3908_v39 }
 0x407   :  { %1781 = vperm.xlu1 %2618, %v1368_v26   ;;  %1793 = vperm.xlu0 %2617, %v1372_v29   ;;  %v4637_v26 = vperm.slane %v4552_v63, 4 }
 0x408   :  { %1769 = vperm.xlu2 %2616, %v1364_v15   ;;  %v1388_v15 = vmul.f32 %v4619_v56, %v5663_v47 }
 0x409   :  { %v1659_v32 = vpop.permute.xlu1 %1658  ;;  %v1656_v27 = vpop.permute.xlu0 %1655  ;;  %2633 = vrcp.f32 %v4637_v26 }
 0x40a   :  { %v2038_v9 = vperm.slane %v1659_v32, %v3893_v50  ;;  %v1671_v19 = vpop.permute.xlu2 %1670  ;;  %v2036_v22 = vperm.slane %v1656_v27, %v3879_v14  ;;  %v1392_v32 = vmul.f32 %v4619_v56, %v5664_v18 }
 0x40b   :  { %v2046_v2 = vperm.slane %v1671_v19, %v3926_v25 }
 0x40c   :  { %v2037_v36 = vsel %vm961_vm5, %v2036_v22, %v2035_v21 }
 0x40d   :  { %v2039_v31 = vsel %vm965_vm6, %v2038_v9, %v2037_v36  ;;  %v5665_v9 = vld [vmem:[#allocation34_spill] sm:$0xff] }
 0x40e   :  { %v2041_v16 = vsel %vm969_vm7, %v2040_v48, %v2039_v31  ;;  %v1370_v27 = vmul.f32 %v4584_v51, %v5665_v9  ;;  %v5667_v51 = vld [vmem:[#allocation36_spill] sm:$0xff]  ;;  %v5673_v9 = vld [vmem:[#allocation38_spill] sm:$0xff] }
 0x40f   :  { %1790 = vperm.xlu1 %2618, %v1371_v46   ;;  %1802 = vperm.xlu0 %2617, %v1389_v0   ;;  %v2043_v54 = vsel %vm973_vm8, %v2042_v59, %v2041_v16  ;;  %v2634_v31 = vpop.eup %2633  ;;  %v1391_v0 = vmul.f32 %v4619_v56, %v5667_v51  ;;  %v5669_v16 = vld [vmem:[#allocation6_spill] sm:$0xff] }
 0x410   :  { %1778 = vperm.xlu2 %2616, %v1367_v34   ;;  %v1395_v34 = vmul.f32 %v4619_v56, %v5668_v3  ;;  %vm1409_vm13 = vweird.f32 %v2634_v31 }
 0x411   :  { %v1668_v5 = vpop.permute.xlu1 %1667  ;;  %v1677_v24 = vpop.permute.xlu0 %1676 }
 0x412   :  { %v2044_v43 = vperm.slane %v1668_v5, %v3911_v7  ;;  %v1680_v33 = vpop.permute.xlu2 %1679  ;;  %v2050_v36 = vperm.slane %v1677_v24, %v3942_v37 }
 0x413   :  { %v2052_v46 = vperm.slane %v1680_v33, %v3971_v62 }
 0x414   :  { %v2045_v29 = vsel %vm977_vm9, %v2044_v43, %v2043_v54  ;;  %v1387_v54 = vmul.f32 %v4619_v56, %v5669_v16  ;;  %v1404_v43 = vmul.f32 %v2634_v31, %v4637_v26 }
 0x415   :  { %v2047_v49 = vsel %vm981_vm10, %v2046_v2, %v2045_v29 }
 0x417   :  { %1799 = vperm.xlu1 %2618, %v1388_v15   ;;  %1811 = vperm.xlu0 %2617, %v1392_v32   ;;  %v1405_v15 = vsub.f32 1.0, %v1404_v43 }
 0x418   :  { %1787 = vperm.xlu2 %2616, %v1370_v27   ;;  %v1394_v27 = vmul.f32 %v4619_v56, %v5673_v9 }
 0x419   :  { %v1674_v21 = vpop.permute.xlu1 %1673  ;;  %v1686_v22 = vpop.permute.xlu0 %1685 }
 0x41a   :  { %v2048_v19 = vperm.slane %v1674_v21, %v3939_v12  ;;  %v1689_v48 = vpop.permute.xlu2 %1688  ;;  %v2056_v47 = vperm.slane %v1686_v22, %v3986_v40  ;;  %v5674_v21 = vld [vmem:[#allocation46_spill] sm:$0xff]  ;;  %v1406_v22 = vmul.f32 %v2634_v31, %v1405_v15  ;;  %v5677_v15 = vld [vmem:[#allocation76_spill] sm:$0xff] }
 0x41c   :  { %v2049_v59 = vsel %vm985_vm11, %v2048_v19, %v2047_v49  ;;  %v2058_v49 = vperm.slane %v1689_v48, %v3981_v38  ;;  %v1398_v19 = vmul.f32 %v4619_v56, %v5674_v21 }
 0x41d   :  { %v2051_v44 = vsel %vm5666_vm14, %v2050_v36, %v2049_v59  ;;  %v5675_v36 = vld [vmem:[#allocation7_spill] sm:$0xff]  ;;  %vm1408_vm14 = vweird.f32 %v4637_v26 }
 0x41e   :  { %v2053_v5 = vsel %vm5670_vm15, %v2052_v46, %v2051_v44  ;;  %v1390_v46 = vmul.f32 %v4619_v56, %v5675_v36  ;;  %vm1410_vm15 = vmor %vm1408_vm14, %vm1409_vm13  ;;  %vm5689_vm13 = vcmask 654912   ;;  %vm5690_vm14 = vcmask 720512  }
 0x41f   :  { %1808 = vperm.xlu1 %2618, %v1391_v0   ;;  %1820 = vperm.xlu0 %2617, %v1395_v34   ;;  %v1407_v34 = vadd.f32 %v2634_v31, %v1406_v22 }
 0x420   :  { %1796 = vperm.xlu2 %2616, %v1387_v54  }
 0x421   :  { %v1683_v24 = vpop.permute.xlu1 %1682  ;;  %v1695_v2 = vpop.permute.xlu0 %1694 }
 0x422   :  { %v2054_v33 = vperm.slane %v1683_v24, %v3962_v1  ;;  %v1698_v29 = vpop.permute.xlu2 %1697  ;;  %v2062_v3 = vperm.slane %v1695_v2, %v4062_v61  ;;  %v5676_v24 = vld [vmem:[#allocation41_spill] sm:$0xff]  ;;  %v1401_v2 = vmul.f32 %v4619_v56, %v5677_v15 }
 0x423   :  { %v2064_v16 = vperm.slane %v1698_v29, %v4029_v41 }
 0x424   :  { %v2055_v18 = vsel %vm5671_vm4, %v2054_v33, %v2053_v5  ;;  %v1414_v5 = vand.u32 2147483648, %v4637_v26  ;;  %v1397_v33 = vmul.f32 %v4619_v56, %v5676_v24  ;;  %v4706_v24 = vperm.slane %v4552_v63, 5 }
 0x425   :  { %v2057_v32 = vsel %vm5672_vm12, %v2056_v47, %v2055_v18  ;;  %v1412_v47 = vand.u32 2147483647, %v4637_v26  ;;  %vm5688_vm12 = vcmask 589312  }
 0x426   :  { %v2059_v59 = vsel %vm1005_vm0, %v2058_v49, %v2057_v32  ;;  %v5678_v49 = vld [vmem:[#allocation39_spill] sm:$0xff]  ;;  %v1411_v32 = vsel %vm1410_vm15, %v2634_v31, %v1407_v34  ;;  %v1415_v9 = vor.u32 1.1754944e-38, %v1414_v5  ;;  %2635 = vrcp.f32 %v4706_v24 }
 0x427   :  { %1817 = vperm.xlu1 %2618, %v1394_v27   ;;  %1829 = vperm.xlu0 %2617, %v1398_v19   ;;  %v1393_v18 = vmul.f32 %v4619_v56, %v5678_v49  ;;  %vm1413_vm4 = vcmp.eq.f32.partialorder %v1412_v47, 8.507059e+37  ;;  %v5682_v49 = vld [vmem:[#allocation47_spill] sm:$0xff]  ;;  %vm5694_vm15 = vcmask 786112  }
 0x428   :  { %1805 = vperm.xlu2 %2616, %v1390_v46   ;;  %v4693_v46 = vsel %vm1413_vm4, %v1415_v9, %v1411_v32  ;;  %v5683_v32 = vld [vmem:[#allocation52_spill] sm:$0xff]  ;;  %vm1438_vm4 = vweird.f32 %v4706_v24 }
 0x429   :  { %v1692_v48 = vpop.permute.xlu1 %1691  ;;  %v1704_v51 = vpop.permute.xlu0 %1703  ;;  %v1421_v9 = vmul.f32 %v4693_v46, %v5683_v32 }
 0x42a   :  { %v2060_v44 = vperm.slane %v1692_v48, %v3965_v6  ;;  %v1707_v0 = vpop.permute.xlu2 %1706  ;;  %v2067_v21 = vperm.slane %v1704_v51, %v3879_v14  ;;  %v5679_v48 = vld [vmem:[#allocation44_spill] sm:$0xff] }
 0x42b   :  { %v1400_v31 = vmul.f32 %v4619_v56, %v5679_v48 }
 0x42c   :  { %v2061_v54 = vsel %vm1009_vm1, %v2060_v44, %v2059_v59  ;;  %v2069_v59 = vperm.slane %v1707_v0, %v3893_v50 }
 0x42d   :  { %v2063_v43 = vsel %vm1013_vm2, %v2062_v3, %v2061_v54  ;;  %v5680_v3 = vld [vmem:[#allocation77_spill] sm:$0xff] }
 0x42e   :  { %v4689_v29 = vsel %vm1017_vm3, %v2064_v16, %v2063_v43  ;;  %v1418_v34 = vmul.f32 %v4693_v46, %v5680_v3  ;;  %v5681_v16 = vld [vmem:[#allocation42_spill] sm:$0xff]  ;;  %v2636_v3 = vpop.eup %2635 }
 0x42f   :  { %1826 = vperm.xlu1 %2618, %v1397_v33   ;;  %1838 = vperm.xlu0 %2617, %v1401_v2   ;;  %v1396_v51 = vmul.f32 %v4619_v56, %v5681_v16  ;;  %v5685_v16 = vld [vmem:[#allocation48_spill] sm:$0xff] }
 0x430   :  { %1814 = vperm.xlu2 %2616, %v1393_v18   ;;  %v1417_v18 = vmul.f32 %v4693_v46, %v5682_v49 }
 0x431   :  { %v1701_v27 = vpop.permute.xlu1 %1700  ;;  %v1713_v19 = vpop.permute.xlu0 %1712 }
 0x432   :  { %v2066_v26 = vperm.slane %v1701_v27, %v3876_v53  ;;  %v1716_v36 = vpop.permute.xlu2 %1715  ;;  %v2073_v33 = vperm.slane %v1713_v19, %v3908_v39  ;;  %v5684_v27 = vld [vmem:[#allocation45_spill] sm:$0xff] }
 0x433   :  { %v2075_v47 = vperm.slane %v1716_v36, %v3911_v7 }
 0x434   :  { %v2068_v22 = vsel %vm961_vm5, %v2067_v21, %v2066_v26  ;;  %v1399_v21 = vmul.f32 %v4619_v56, %v5684_v27 }
 0x435   :  { %v2070_v44 = vsel %vm965_vm6, %v2069_v59, %v2068_v22 }
 0x437   :  { %1835 = vperm.xlu1 %2618, %v1400_v31   ;;  %1847 = vperm.xlu0 %2617, %v1418_v34  }
 0x438   :  { %1823 = vperm.xlu2 %2616, %v1396_v51   ;;  %v1420_v51 = vmul.f32 %v4693_v46, %v5685_v16 }
 0x439   :  { %v1710_v54 = vpop.permute.xlu1 %1709  ;;  %v1722_v0 = vpop.permute.xlu0 %1721 }
 0x43a   :  { %v2071_v5 = vperm.slane %v1710_v54, %v3899_v52  ;;  %v1725_v43 = vpop.permute.xlu2 %1724  ;;  %v2079_v48 = vperm.slane %v1722_v0, %v3939_v12  ;;  %v5686_v54 = vld [vmem:[#allocation79_spill] sm:$0xff]  ;;  %v1434_v0 = vmul.f32 %v2636_v3, %v4706_v24 }
 0x43b   :  { %v2081_v31 = vperm.slane %v1725_v43, %v3942_v37 }
 0x43c   :  { %v2072_v15 = vsel %vm969_vm7, %v2071_v5, %v2070_v44  ;;  %v1424_v5 = vmul.f32 %v4693_v46, %v5686_v54 }
 0x43d   :  { %v2074_v2 = vsel %vm973_vm8, %v2073_v33, %v2072_v15  ;;  %v5687_v33 = vld [vmem:[#allocation75_spill] sm:$0xff] }
 0x43e   :  { %v2076_v26 = vsel %vm977_vm9, %v2075_v47, %v2074_v2  ;;  %v1402_v47 = vmul.f32 %v4619_v56, %v5687_v33 }
 0x43f   :  { %1844 = vperm.xlu1 %2618, %v1417_v18   ;;  %1856 = vperm.xlu0 %2617, %v1421_v9   ;;  %v1435_v9 = vsub.f32 1.0, %v1434_v0 }
 0x440   :  { %1832 = vperm.xlu2 %2616, %v1399_v21  }
 0x441   :  { %v1719_v19 = vpop.permute.xlu1 %1718  ;;  %v1731_v59 = vpop.permute.xlu0 %1730 }
 0x442   :  { %v2077_v36 = vperm.slane %v1719_v19, %v3926_v25  ;;  %v1734_v22 = vpop.permute.xlu2 %1733  ;;  %v2085_v32 = vperm.slane %v1731_v59, %v3962_v1  ;;  %v1436_v59 = vmul.f32 %v2636_v3, %v1435_v9 }
 0x443   :  { %v2087_v27 = vperm.slane %v1734_v22, %v3986_v40 }
 0x444   :  { %v2078_v44 = vsel %vm981_vm10, %v2077_v36, %v2076_v26  ;;  %v5691_v26 = vld [vmem:[#allocation49_spill] sm:$0xff]  ;;  %v5692_v36 = vld [vmem:[#allocation82_spill] sm:$0xff] }
 0x445   :  { %v2080_v34 = vsel %vm985_vm11, %v2079_v48, %v2078_v44  ;;  %v1423_v19 = vmul.f32 %v4693_v46, %v5691_v26  ;;  %v1427_v48 = vmul.f32 %v4693_v46, %v5692_v36  ;;  %v5696_v26 = vld [vmem:[#allocation51_spill] sm:$0xff] }
 0x446   :  { %v2082_v15 = vsel %vm5688_vm12, %v2081_v31, %v2080_v34  ;;  %v5693_v31 = vld [vmem:[#allocation50_spill] sm:$0xff]  ;;  %vm1439_vm12 = vweird.f32 %v2636_v3 }
 0x447   :  { %1853 = vperm.xlu1 %2618, %v1420_v51   ;;  %1865 = vperm.xlu0 %2617, %v1424_v5   ;;  %v1419_v44 = vmul.f32 %v4693_v46, %v5693_v31 }
 0x448   :  { %1841 = vperm.xlu2 %2616, %v1402_v47  }
 0x449   :  { %v1728_v43 = vpop.permute.xlu1 %1727  ;;  %v1740_v49 = vpop.permute.xlu0 %1739 }
 0x44a   :  { %v2083_v2 = vperm.slane %v1728_v43, %v3971_v62  ;;  %v1743_v18 = vpop.permute.xlu2 %1742  ;;  %v2091_v5 = vperm.slane %v1740_v49, %v3965_v6  ;;  %v1442_v49 = vand.u32 2147483647, %v4706_v24 }
 0x44b   :  { %v2093_v0 = vperm.slane %v1743_v18, %v4062_v61 }
 0x44c   :  { %v2084_v21 = vsel %vm5689_vm13, %v2083_v2, %v2082_v15  ;;  %v1437_v15 = vadd.f32 %v2636_v3, %v1436_v59  ;;  %v1444_v2 = vand.u32 2147483648, %v4706_v24  ;;  %vm1440_vm13 = vmor %vm1438_vm4, %vm1439_vm12  ;;  %v5698_v24 = vld [vmem:[#allocation54_spill] sm:$0xff]  ;;  %vm5704_vm4 = vcmask 589312  }
 0x44d   :  { %v2086_v56 = vsel %vm5690_vm14, %v2085_v32, %v2084_v21  ;;  %vm1443_vm14 = vcmp.eq.f32.partialorder %v1442_v49, 8.507059e+37  ;;  %v5701_v49 = vld [vmem:[#allocation87_spill] sm:$0xff]  ;;  %vm5705_vm12 = vcmask 654912  }
 0x44e   :  { %v2088_v34 = vsel %vm5694_vm15, %v2087_v27, %v2086_v56  ;;  %v5695_v27 = vld [vmem:[#allocation53_spill] sm:$0xff]  ;;  %v1430_v56 = vmul.f32 %v4693_v46, %v5609_v60  ;;  %v1441_v36 = vsel %vm1440_vm13, %v2636_v3, %v1437_v15  ;;  %vm5697_vm15 = vcmask 1041409  }
 0x44f   :  { %1862 = vperm.xlu1 %2618, %v1423_v19   ;;  %1874 = vperm.xlu0 %2617, %v1427_v48   ;;  %v1426_v21 = vmul.f32 %v4693_v46, %v5695_v27  ;;  %v1422_v19 = vmul.f32 %v4693_v46, %v5696_v26  ;;  %v1445_v48 = vor.u32 1.1754944e-38, %v1444_v2  ;;  %v1429_v3 = vmul.f32 %v4693_v46, %v5698_v24  ;;  %v5702_v26 = vld [vmem:[#allocation81_spill] sm:$0xff]  ;;  %v5703_v24 = vld [vmem:[#allocation55_spill] sm:$0xff] }
 0x450   :  { %1850 = vperm.xlu2 %2616, %v1419_v44   ;;  %vm5709_vm13 = vcmask 720512  }
 0x451   :  { %v1737_v22 = vpop.permute.xlu1 %1736  ;;  %v1749_v51 = vpop.permute.xlu0 %1748  ;;  %v4766_v60 = vsel %vm1443_vm14, %v1445_v48, %v1441_v36  ;;  %vm5710_vm14 = vcmask 786112  }
 0x452   :  { %v2089_v16 = vperm.slane %v1737_v22, %v3981_v38  ;;  %v1752_v54 = vpop.permute.xlu2 %1751  ;;  %v2097_v33 = vperm.slane %v1749_v51, %v3876_v53  ;;  %v5699_v51 = vld [vmem:[#allocation84_spill] sm:$0xff] }
 0x453   :  { %v2098_v47 = vperm.slane %v1752_v54, %v3879_v14  ;;  %v1447_v54 = vmul.f32 %v4766_v60, %v5699_v51  ;;  %v1453_v51 = vmul.f32 %v4766_v60, %v5600_v13 }
 0x454   :  { %v2090_v43 = vsel %vm1005_vm0, %v2089_v16, %v2088_v34 }
 0x455   :  { %v2092_v32 = vsel %vm1009_vm1, %v2091_v5, %v2090_v43  ;;  %v2099_v9 = vsel %vm961_vm5, %v2098_v47, %v2097_v33  ;;  %v5700_v5 = vld [vmem:[#allocation78_spill] sm:$0xff] }
 0x456   :  { %v2094_v18 = vsel %vm1013_vm2, %v2093_v0, %v2092_v32  ;;  %v1425_v33 = vmul.f32 %v4693_v46, %v5700_v5 }
 0x457   :  { %1871 = vperm.xlu1 %2618, %v1426_v21   ;;  %1883 = vperm.xlu0 %2617, %v1430_v56   ;;  %v1432_v21 = vmul.f32 %v4693_v46, %v5601_v35  ;;  %v1450_v56 = vmul.f32 %v4766_v60, %v5701_v49  ;;  %v5708_v49 = vld [vmem:[#allocation58_spill] sm:$0xff] }
 0x458   :  { %1859 = vperm.xlu2 %2616, %v1422_v19   ;;  %v1428_v19 = vmul.f32 %v4693_v46, %v5702_v26 }
 0x459   :  { %v1746_v31 = vpop.permute.xlu1 %1745  ;;  %v1758_v34 = vpop.permute.xlu0 %1757 }
 0x45a   :  { %v2095_v44 = vperm.slane %v1746_v31, %v4029_v41  ;;  %v1761_v59 = vpop.permute.xlu2 %1760 }
 0x45b   :  { %v2104_v2 = vperm.slane %v1761_v59, %v3908_v39 }
 0x45c   :  { %v2096_v22 = vsel %vm1017_vm3, %v2095_v44, %v2094_v18  ;;  %v4793_v44 = vperm.slane %v4552_v63, 6 }
 0x45d   :  { %v4771_v16 = vsel %vm5697_vm15, %v2096_v22, %v4689_v29  ;;  %v2102_v29 = vperm.slane %v1758_v34, %v3899_v52 }
 0x45e   :  { %2637 = vrcp.f32 %v4793_v44 }
 0x45f   :  { %1880 = vperm.xlu1 %2618, %v1429_v3   ;;  %1892 = vperm.xlu0 %2617, %v1447_v54   ;;  %v1449_v3 = vmul.f32 %v4766_v60, %v5703_v24  ;;  %v1431_v54 = vmul.f32 %v4693_v46, %v5608_v20  ;;  %v5706_v46 = vld [vmem:[#allocation57_spill] sm:$0xff] }
 0x460   :  { %1868 = vperm.xlu2 %2616, %v1425_v33   ;;  %v5711_v24 = vld [vmem:[#allocation85_spill] sm:$0xff] }
 0x461   :  { %v1755_v47 = vpop.permute.xlu1 %1754  ;;  %v1767_v0 = vpop.permute.xlu0 %1766 }
 0x462   :  { %v2100_v15 = vperm.slane %v1755_v47, %v3893_v50  ;;  %v1770_v43 = vpop.permute.xlu2 %1769  ;;  %v2108_v35 = vperm.slane %v1767_v0, %v3926_v25 }
 0x463   :  { %v2110_v34 = vperm.slane %v1770_v43, %v3939_v12 }
 0x464   :  { %v2101_v32 = vsel %vm965_vm6, %v2100_v15, %v2099_v9 }
 0x465   :  { %v2103_v27 = vsel %vm969_vm7, %v2102_v29, %v2101_v32  ;;  %v1452_v32 = vmul.f32 %v4766_v60, %v5706_v46  ;;  %v1474_v46 = vand.u32 2147483648, %v4793_v44 }
 0x466   :  { %v2105_v18 = vsel %vm973_vm8, %v2104_v2, %v2103_v27  ;;  %v2638_v2 = vpop.eup %2637  ;;  %v5707_v27 = vld [vmem:[#allocation93_spill] sm:$0xff] }
 0x467   :  { %1889 = vperm.xlu1 %2618, %v1432_v21   ;;  %1901 = vperm.xlu0 %2617, %v1450_v56   ;;  %v1456_v21 = vmul.f32 %v4766_v60, %v5707_v27  ;;  %v1448_v56 = vmul.f32 %v4766_v60, %v5708_v49  ;;  %vm1469_vm15 = vweird.f32 %v2638_v2  ;;  %v1458_v27 = vmul.f32 %v4766_v60, %v5613_v30 }
 0x468   :  { %1877 = vperm.xlu2 %2616, %v1428_v19   ;;  %v1464_v19 = vmul.f32 %v2638_v2, %v4793_v44 }
 0x469   :  { %v1764_v36 = vpop.permute.xlu1 %1763  ;;  %v1776_v9 = vpop.permute.xlu0 %1775 }
 0x46a   :  { %v2106_v48 = vperm.slane %v1764_v36, %v3911_v7  ;;  %v1779_v31 = vpop.permute.xlu2 %1778  ;;  %v2114_v43 = vperm.slane %v1776_v9, %v3971_v62 }
 0x46b   :  { %v2116_v29 = vperm.slane %v1779_v31, %v3962_v1 }
 0x46c   :  { %v2107_v59 = vsel %vm977_vm9, %v2106_v48, %v2105_v18 }
 0x46d   :  { %v2109_v22 = vsel %vm981_vm10, %v2108_v35, %v2107_v59  ;;  %v1465_v35 = vsub.f32 1.0, %v1464_v19 }
 0x46e   :  { %v2111_v5 = vsel %vm985_vm11, %v2110_v34, %v2109_v22 }
 0x46f   :  { %1898 = vperm.xlu1 %2618, %v1449_v3   ;;  %1910 = vperm.xlu0 %2617, %v1453_v51   ;;  %v1455_v3 = vmul.f32 %v4766_v60, %v5711_v24  ;;  %v1459_v51 = vmul.f32 %v4766_v60, %v5614_v23  ;;  %v5715_v24 = vld [vmem:[#allocation101_spill] sm:$0xff] }
 0x470   :  { %1886 = vperm.xlu2 %2616, %v1431_v54   ;;  %v5712_v54 = vld [vmem:[#allocation86_spill] sm:$0xff] }
 0x471   :  { %v1773_v33 = vpop.permute.xlu1 %1772  ;;  %v1785_v15 = vpop.permute.xlu0 %1784 }
 0x472   :  { %v2112_v47 = vperm.slane %v1773_v33, %v3942_v37  ;;  %v1788_v0 = vpop.permute.xlu2 %1787  ;;  %v2120_v31 = vperm.slane %v1785_v15, %v3981_v38 }
 0x473   :  { %v2122_v34 = vperm.slane %v1788_v0, %v3965_v6 }
 0x474   :  { %v2113_v13 = vsel %vm5704_vm4, %v2112_v47, %v2111_v5  ;;  %v1451_v5 = vmul.f32 %v4766_v60, %v5712_v54  ;;  %v1466_v47 = vmul.f32 %v2638_v2, %v1465_v35  ;;  %vm1468_vm4 = vweird.f32 %v4793_v44 }
 0x475   :  { %v2115_v20 = vsel %vm5705_vm12, %v2114_v43, %v2113_v13  ;;  %vm5713_vm12 = vcmask 1042434  }
 0x476   :  { %v2117_v26 = vsel %vm5709_vm13, %v2116_v29, %v2115_v20  ;;  %v1467_v20 = vadd.f32 %v2638_v2, %v1466_v47  ;;  %vm1470_vm13 = vmor %vm1468_vm4, %vm1469_vm15  ;;  %vm5719_vm15 = vcmask 589312   ;;  %vm5723_vm4 = vcmask 654912  }
 0x477   :  { %1907 = vperm.xlu1 %2618, %v1452_v32   ;;  %1919 = vperm.xlu0 %2617, %v1456_v21   ;;  %v1472_v21 = vand.u32 2147483647, %v4793_v44 }
 0x478   :  { %1895 = vperm.xlu2 %2616, %v1448_v56   ;;  %v1462_v56 = vmul.f32 %v4766_v60, %v4011_v8 }
 0x479   :  { %v1782_v18 = vpop.permute.xlu1 %1781  ;;  %v1794_v48 = vpop.permute.xlu0 %1793 }
 0x47a   :  { %v2118_v36 = vperm.slane %v1782_v18, %v3986_v40  ;;  %v1797_v9 = vpop.permute.xlu2 %1796  ;;  %v2126_v13 = vperm.slane %v1794_v48, %v4029_v41  ;;  %v1471_v18 = vsel %vm1470_vm13, %v2638_v2, %v1467_v20  ;;  %v5717_v20 = vld [vmem:[#allocation94_spill] sm:$0xff]  ;;  %vm5725_vm13 = vcmask 786112  }
 0x47b   :  { %v2128_v30 = vperm.slane %v1797_v9, %v3876_v53 }
 0x47c   :  { %v2119_v59 = vsel %vm5710_vm14, %v2118_v36, %v2117_v26  ;;  %v5714_v26 = vld [vmem:[#allocation89_spill] sm:$0xff]  ;;  %v1475_v36 = vor.u32 1.1754944e-38, %v1474_v46  ;;  %vm1473_vm14 = vcmp.eq.f32.partialorder %v1472_v21, 8.507059e+37  ;;  %v5718_v46 = vld [vmem:[#allocation104_spill] sm:$0xff] }
 0x47d   :  { %v2121_v22 = vsel %vm1005_vm0, %v2120_v31, %v2119_v59  ;;  %v1454_v19 = vmul.f32 %v4766_v60, %v5714_v26 }
 0x47e   :  { %v2123_v33 = vsel %vm1009_vm1, %v2122_v34, %v2121_v22  ;;  %v4851_v35 = vsel %vm1473_vm14, %v1475_v36, %v1471_v18  ;;  %v1461_v22 = vmul.f32 %v4766_v60, %v5617_v4 }
 0x47f   :  { %1916 = vperm.xlu1 %2618, %v1455_v3   ;;  %1928 = vperm.xlu0 %2617, %v1459_v51   ;;  %v1479_v9 = vmul.f32 %v4851_v35, %v5715_v24  ;;  %v5716_v3 = vld [vmem:[#allocation92_spill] sm:$0xff] }
 0x480   :  { %1904 = vperm.xlu2 %2616, %v1451_v5   ;;  %v1457_v51 = vmul.f32 %v4766_v60, %v5716_v3 }
 0x481   :  { %v1791_v15 = vpop.permute.xlu1 %1790  ;;  %v1803_v43 = vpop.permute.xlu0 %1802 }
 0x482   :  { %v2124_v0 = vperm.slane %v1791_v15, %v4062_v61  ;;  %v1806_v29 = vpop.permute.xlu2 %1805  ;;  %v2131_v8 = vperm.slane %v1803_v43, %v3893_v50 }
 0x483   :  { %v2133_v34 = vperm.slane %v1806_v29, %v3899_v52 }
 0x484   :  { %v2125_v23 = vsel %vm1013_vm2, %v2124_v0, %v2123_v33  ;;  %v4866_v0 = vperm.slane %v4552_v63, 7 }
 0x485   :  { %v2127_v32 = vsel %vm1017_vm3, %v2126_v13, %v2125_v23  ;;  %v1478_v23 = vmul.f32 %v4851_v35, %v5717_v20 }
 0x486   :  { %v4843_v49 = vsel %vm5713_vm12, %v2127_v32, %v4771_v16  ;;  %v1482_v32 = vmul.f32 %v4851_v35, %v5718_v46  ;;  %2639 = vrcp.f32 %v4866_v0  ;;  %vm5724_vm12 = vcmask 720512  }
 0x487   :  { %1925 = vperm.xlu1 %2618, %v1458_v27   ;;  %1937 = vperm.xlu0 %2617, %v1462_v56   ;;  %v1460_v27 = vmul.f32 %v4766_v60, %v5615_v58  ;;  %v5720_v60 = vld [vmem:[#allocation97_spill] sm:$0xff] }
 0x488   :  { %1913 = vperm.xlu2 %2616, %v1454_v19  }
 0x489   :  { %v1800_v48 = vpop.permute.xlu1 %1799  ;;  %v1812_v16 = vpop.permute.xlu0 %1811 }
 0x48a   :  { %v2129_v44 = vperm.slane %v1800_v48, %v3879_v14  ;;  %v1815_v31 = vpop.permute.xlu2 %1814  ;;  %v2137_v4 = vperm.slane %v1812_v16, %v3911_v7  ;;  %v5721_v16 = vld [vmem:[#allocation105_spill] sm:$0xff] }
 0x48b   :  { %v2139_v43 = vperm.slane %v1815_v31, %v3926_v25  ;;  %v1485_v31 = vmul.f32 %v4851_v35, %v5721_v16 }
 0x48c   :  { %v2130_v59 = vsel %vm961_vm5, %v2129_v44, %v2128_v30  ;;  %v2640_v30 = vpop.eup %2639  ;;  %v1481_v44 = vmul.f32 %v4851_v35, %v5720_v60 }
 0x48d   :  { %v2132_v2 = vsel %vm965_vm6, %v2131_v8, %v2130_v59  ;;  %v5722_v8 = vld [vmem:[#allocation98_spill] sm:$0xff]  ;;  %vm1499_vm14 = vweird.f32 %v2640_v30 }
 0x48e   :  { %v2134_v54 = vsel %vm969_vm7, %v2133_v34, %v2132_v2  ;;  %v1477_v34 = vmul.f32 %v4851_v35, %v5722_v8  ;;  %v1494_v2 = vmul.f32 %v2640_v30, %v4866_v0  ;;  %v5730_v8 = vld [vmem:[#allocation103_spill] sm:$0xff] }
 0x48f   :  { %1934 = vperm.xlu1 %2618, %v1461_v22   ;;  %1946 = vperm.xlu0 %2617, %v1479_v9  }
 0x490   :  { %1922 = vperm.xlu2 %2616, %v1457_v51  }
 0x491   :  { %v1809_v5 = vpop.permute.xlu1 %1808  ;;  %v1821_v47 = vpop.permute.xlu0 %1820 }
 0x492   :  { %v2135_v33 = vperm.slane %v1809_v5, %v3908_v39  ;;  %v1824_v15 = vpop.permute.xlu2 %1823  ;;  %v2143_v18 = vperm.slane %v1821_v47, %v3942_v37 }
 0x493   :  { %v2145_v36 = vperm.slane %v1824_v15, %v3971_v62  ;;  %v5726_v15 = vld [vmem:[#allocation99_spill] sm:$0xff] }
 0x494   :  { %v2136_v29 = vsel %vm973_vm8, %v2135_v33, %v2134_v54  ;;  %v1495_v54 = vsub.f32 1.0, %v1494_v2 }
 0x495   :  { %v2138_v13 = vsel %vm977_vm9, %v2137_v4, %v2136_v29  ;;  %v1484_v4 = vmul.f32 %v4851_v35, %v5726_v15 }
 0x496   :  { %v2140_v63 = vsel %vm981_vm10, %v2139_v43, %v2138_v13  ;;  %v5727_v43 = vld [vmem:[#allocation108_spill] sm:$0xff]  ;;  %v1496_v46 = vmul.f32 %v2640_v30, %v1495_v54 }
 0x497   :  { %1943 = vperm.xlu1 %2618, %v1478_v23   ;;  %1955 = vperm.xlu0 %2617, %v1482_v32   ;;  %v1488_v29 = vmul.f32 %v4851_v35, %v5727_v43  ;;  %v5728_v13 = vld [vmem:[#allocation100_spill] sm:$0xff] }
 0x498   :  { %1931 = vperm.xlu2 %2616, %v1460_v27   ;;  %v1480_v20 = vmul.f32 %v4851_v35, %v5728_v13 }
 0x499   :  { %v1818_v21 = vpop.permute.xlu1 %1817  ;;  %v1830_v26 = vpop.permute.xlu0 %1829 }
 0x49a   :  { %v2141_v56 = vperm.slane %v1818_v21, %v3939_v12  ;;  %v1833_v19 = vpop.permute.xlu2 %1832  ;;  %v2149_v51 = vperm.slane %v1830_v26, %v3986_v40  ;;  %v1497_v26 = vadd.f32 %v2640_v30, %v1496_v46 }
 0x49b   :  { %v2151_v5 = vperm.slane %v1833_v19, %v3981_v38 }
 0x49c   :  { %v2142_v48 = vsel %vm985_vm11, %v2141_v56, %v2140_v63 }
 0x49d   :  { %v2144_v58 = vsel %vm5719_vm15, %v2143_v18, %v2142_v48  ;;  %vm1498_vm15 = vweird.f32 %v4866_v0 }
 0x49e   :  { %v2146_v59 = vsel %vm5723_vm4, %v2145_v36, %v2144_v58  ;;  %v1504_v36 = vand.u32 2147483648, %v4866_v0  ;;  %v5729_v58 = vld [vmem:[#allocation102_spill] sm:$0xff]  ;;  %vm1500_vm4 = vmor %vm1498_vm15, %vm1499_vm14  ;;  %vm5739_vm14 = vcmask 589312   ;;  %vm5740_vm15 = vcmask 654912  }
 0x49f   :  { %1952 = vperm.xlu1 %2618, %v1481_v44   ;;  %1964 = vperm.xlu0 %2617, %v1485_v31   ;;  %v1487_v60 = vmul.f32 %v4851_v35, %v5729_v58  ;;  %v1502_v44 = vand.u32 2147483647, %v4866_v0  ;;  %v1491_v31 = vmul.f32 %v4851_v35, %v4267_v45 }
 0x4a0   :  { %1940 = vperm.xlu2 %2616, %v1477_v34   ;;  %v1483_v34 = vmul.f32 %v4851_v35, %v5730_v8  ;;  %v1505_v2 = vor.u32 1.1754944e-38, %v1504_v36 }
 0x4a1   :  { %v1827_v22 = vpop.permute.xlu1 %1826  ;;  %v1839_v9 = vpop.permute.xlu0 %1838 }
 0x4a2   :  { %v2147_v24 = vperm.slane %v1827_v22, %v3962_v1  ;;  %v1842_v3 = vpop.permute.xlu2 %1841  ;;  %v2155_v56 = vperm.slane %v1839_v9, %v4062_v61 }
 0x4a3   :  { %v2157_v19 = vperm.slane %v1842_v3, %v4029_v41 }
 0x4a4   :  { %v2148_v33 = vsel %vm5724_vm12, %v2147_v24, %v2146_v59  ;;  %v1501_v59 = vsel %vm1500_vm4, %v2640_v30, %v1497_v26  ;;  %vm1503_vm12 = vcmp.eq.f32.partialorder %v1502_v44, 8.507059e+37  ;;  %v5736_v26 = vld [vmem:[#allocation107_spill] sm:$0xff]  ;;  %vm5741_vm4 = vcmask 720512  }
 0x4a5   :  { %v2150_v47 = vsel %vm5725_vm13, %v2149_v51, %v2148_v33  ;;  %vm5731_vm13 = vcmask 1043459   ;;  %v4926_v51 = vsel %vm1503_vm12, %v1505_v2, %v1501_v59  ;;  %v5738_v2 = vld [vmem:[#allocation83_spill] sm:$0xff]  ;;  %vm5744_vm12 = vcmask 786112  }
 0x4a6   :  { %v2152_v23 = vsel %vm1005_vm0, %v2151_v5, %v2150_v47  ;;  %v1490_v5 = vmul.f32 %v4851_v35, %v4160_v17  ;;  %v5732_v47 = vld [vmem:[#allocation110_spill] sm:$0xff] }
 0x4a7   :  { %1961 = vperm.xlu1 %2618, %v1484_v4   ;;  %1973 = vperm.xlu0 %2617, %v1488_v29   ;;  %v1508_v15 = vmul.f32 %v4926_v51, %v5732_v47  ;;  %v5733_v4 = vld [vmem:[#allocation59_spill] sm:$0xff] }
 0x4a8   :  { %1949 = vperm.xlu2 %2616, %v1480_v20   ;;  %v1486_v43 = vmul.f32 %v4851_v35, %v5733_v4  ;;  %v5742_v4 = vld [vmem:[#allocation35_spill] sm:$0xff] }
 0x4a9   :  { %v1836_v32 = vpop.permute.xlu1 %1835  ;;  %v1848_v63 = vpop.permute.xlu0 %1847 }
 0x4aa   :  { %v2153_v27 = vperm.slane %v1836_v32, %v3965_v6  ;;  %v1851_v21 = vpop.permute.xlu2 %1850  ;;  %v2160_v24 = vperm.slane %v1848_v63, %v3879_v14 }
 0x4ab   :  { %v2162_v54 = vperm.slane %v1851_v21, %v3893_v50  ;;  %v5735_v21 = vld [vmem:[#allocation80_spill] sm:$0xff] }
 0x4ac   :  { %v2154_v18 = vsel %vm1009_vm1, %v2153_v27, %v2152_v23  ;;  %v5734_v27 = vld [vmem:[#allocation106_spill] sm:$0xff] }
 0x4ad   :  { %v2156_v48 = vsel %vm1013_vm2, %v2155_v56, %v2154_v18  ;;  %v1507_v63 = vmul.f32 %v4926_v51, %v5734_v27  ;;  %v1511_v56 = vmul.f32 %v4926_v51, %v5735_v21 }
 0x4ae   :  { %v2158_v16 = vsel %vm1017_vm3, %v2157_v19, %v2156_v48  ;;  %v1489_v19 = vmul.f32 %v4851_v35, %v5736_v26  ;;  %v5745_v26 = vld [vmem:[#allocation111_spill] sm:$0xff] }
 0x4af   :  { %1970 = vperm.xlu1 %2618, %v1487_v60   ;;  %1982 = vperm.xlu0 %2617, %v1491_v31   ;;  %v4924_v45 = vsel %vm5731_vm13, %v2158_v16, %v4843_v49  ;;  %vm5747_vm13 = vcmask 1044484  }
 0x4b0   :  { %1958 = vperm.xlu2 %2616, %v1483_v34   ;;  %v5737_v34 = vld [vmem:[#allocation33_spill] sm:$0xff] }
 0x4b1   :  { %v1845_v22 = vpop.permute.xlu1 %1844  ;;  %v1857_v9 = vpop.permute.xlu0 %1856  ;;  %v1510_v59 = vmul.f32 %v4926_v51, %v5737_v34 }
 0x4b2   :  { %v2159_v0 = vperm.slane %v1845_v22, %v3876_v53  ;;  %v1860_v3 = vpop.permute.xlu2 %1859  ;;  %v2166_v23 = vperm.slane %v1857_v9, %v3908_v39  ;;  %v1514_v22 = vmul.f32 %v4926_v51, %v5738_v2 }
 0x4b3   :  { %v2168_v17 = vperm.slane %v1860_v3, %v3911_v7 }
 0x4b4   :  { %v2161_v30 = vsel %vm961_vm5, %v2160_v24, %v2159_v0  ;;  %v1492_v24 = vmul.f32 %v4851_v35, %v4265_v55  ;;  %v1513_v55 = vmul.f32 %v4926_v51, %v5742_v4  ;;  %v1517_v35 = vmul.f32 %v4926_v51, %v4474_v11 }
 0x4b5   :  { %v2163_v33 = vsel %vm965_vm6, %v2162_v54, %v2161_v30 }
 0x4b7   :  { %1979 = vperm.xlu1 %2618, %v1490_v5   ;;  %1991 = vperm.xlu0 %2617, %v1508_v15  }
 0x4b8   :  { %1967 = vperm.xlu2 %2616, %v1486_v43   ;;  %v5743_v43 = vld [vmem:[#allocation109_spill] sm:$0xff] }
 0x4b9   :  { %v1854_v49 = vpop.permute.xlu1 %1853  ;;  %v1866_v13 = vpop.permute.xlu0 %1865 }
 0x4ba   :  { %v2164_v29 = vperm.slane %v1854_v49, %v3899_v52  ;;  %v1869_v20 = vpop.permute.xlu2 %1868  ;;  %v2172_v44 = vperm.slane %v1866_v13, %v3939_v12  ;;  %v1509_v49 = vmul.f32 %v4926_v51, %v5743_v43 }
 0x4bb   :  { %v2174_v16 = vperm.slane %v1869_v20, %v3942_v37 }
 0x4bc   :  { %v2165_v46 = vsel %vm969_vm7, %v2164_v29, %v2163_v33 }
 0x4bd   :  { %v2167_v32 = vsel %vm973_vm8, %v2166_v23, %v2165_v46 }
 0x4be   :  { %v2169_v18 = vsel %vm977_vm9, %v2168_v17, %v2167_v32 }
 0x4bf   :  { %1988 = vperm.xlu1 %2618, %v1507_v63   ;;  %2000 = vperm.xlu0 %2617, %v1511_v56  }
 0x4c0   :  { %1976 = vperm.xlu2 %2616, %v1489_v19   ;;  %v1516_v19 = vmul.f32 %v4926_v51, %v5745_v26 }
 0x4c1   :  { %v1863_v36 = vpop.permute.xlu1 %1862  ;;  %v1875_v58 = vpop.permute.xlu0 %1874 }
 0x4c2   :  { %v2170_v48 = vperm.slane %v1863_v36, %v3926_v25  ;;  %v1878_v60 = vpop.permute.xlu2 %1877  ;;  %v2178_v5 = vperm.slane %v1875_v58, %v3962_v1  ;;  %v5746_v36 = vld [vmem:[#allocation90_spill] sm:$0xff] }
 0x4c3   :  { %v2180_v33 = vperm.slane %v1878_v60, %v3986_v40 }
 0x4c4   :  { %v2171_v31 = vsel %vm981_vm10, %v2170_v48, %v2169_v18  ;;  %v1520_v18 = vmul.f32 %v4926_v51, %v4525_v10  ;;  %v1512_v48 = vmul.f32 %v4926_v51, %v5746_v36  ;;  %v1519_v10 = vmul.f32 %v4926_v51, %v4450_v42 }
 0x4c5   :  { %v2173_v8 = vsel %vm985_vm11, %v2172_v44, %v2171_v31  ;;  %v1522_v42 = vmul.f32 %v4926_v51, %v4508_v28 }
 0x4c6   :  { %v2175_v0 = vsel %vm5739_vm14, %v2174_v16, %v2173_v8 }
 0x4c7   :  { %1997 = vperm.xlu1 %2618, %v1510_v59   ;;  %2009 = vperm.xlu0 %2617, %v1514_v22   ;;  %v5748_v59 = vld [vmem:[#allocation56_spill] sm:$0xff] }
 0x4c8   :  { %1985 = vperm.xlu2 %2616, %v1492_v24   ;;  %v1515_v2 = vmul.f32 %v4926_v51, %v5748_v59 }
 0x4c9   :  { %v1872_v9 = vpop.permute.xlu1 %1871  ;;  %v1884_v54 = vpop.permute.xlu0 %1883 }
 0x4ca   :  { %v2176_v3 = vperm.slane %v1872_v9, %v3971_v62  ;;  %v1887_v30 = vpop.permute.xlu2 %1886  ;;  %v2184_v46 = vperm.slane %v1884_v54, %v3965_v6 }
 0x4cb   :  { %v2186_v11 = vperm.slane %v1887_v30, %v4062_v61 }
 0x4cc   :  { %v2177_v47 = vsel %vm5740_vm15, %v2176_v3, %v2175_v0 }
 0x4cd   :  { %v2179_v15 = vsel %vm5741_vm4, %v2178_v5, %v2177_v47  ;;  %v5749_v5 = vld [vmem:[#allocation88_spill] sm:$0xff] }
 0x4ce   :  { %v2181_v29 = vsel %vm5744_vm12, %v2180_v33, %v2179_v15  ;;  %v1518_v33 = vmul.f32 %v4926_v51, %v5749_v5 }
 0x4cf   :  { %2006 = vperm.xlu1 %2618, %v1513_v55   ;;  %2018 = vperm.xlu0 %2617, %v1517_v35  }
 0x4d0   :  { %1994 = vperm.xlu2 %2616, %v1509_v49  }
 0x4d1   :  { %v1881_v13 = vpop.permute.xlu1 %1880  ;;  %v1893_v23 = vpop.permute.xlu0 %1892 }
 0x4d2   :  { %v2182_v20 = vperm.slane %v1881_v13, %v3981_v38  ;;  %v1896_v17 = vpop.permute.xlu2 %1895  ;;  %v2190_v32 = vperm.slane %v1893_v23, %v3876_v53  ;;  %v1521_v13 = vmul.f32 %v4926_v51, %v4523_v57 }
 0x4d3   :  { %v2191_v27 = vperm.slane %v1896_v17, %v3879_v14 }
 0x4d4   :  { %v2183_v63 = vsel %vm1005_vm0, %v2182_v20, %v2181_v29 }
 0x4d5   :  { %v2185_v21 = vsel %vm1009_vm1, %v2184_v46, %v2183_v63  ;;  %v2192_v56 = vsel %vm961_vm5, %v2191_v27, %v2190_v32 }
 0x4d6   :  { %v2187_v58 = vsel %vm1013_vm2, %v2186_v11, %v2185_v21 }
 0x4d7   :  { %2015 = vperm.xlu1 %2618, %v1516_v19   ;;  %2027 = vperm.xlu0 %2617, %v1520_v18  }
 0x4d8   :  { %2003 = vperm.xlu2 %2616, %v1512_v48  }
 0x4d9   :  { %v1890_v60 = vpop.permute.xlu1 %1889  ;;  %v1902_v16 = vpop.permute.xlu0 %1901 }
 0x4da   :  { %v2188_v44 = vperm.slane %v1890_v60, %v4029_v41  ;;  %v1905_v31 = vpop.permute.xlu2 %1904  ;;  %v2195_v3 = vperm.slane %v1902_v16, %v3899_v52 }
 0x4db   :  { %v2197_v54 = vperm.slane %v1905_v31, %v3908_v39 }
 0x4dc   :  { %v2189_v8 = vsel %vm1017_vm3, %v2188_v44, %v2187_v58 }
 0x4dd   :  { %v2286_v34 = vsel %vm5747_vm13, %v2189_v8, %v4924_v45  ;;  %vm5750_vm13 = vcmask 1045509  }
 0x4df   :  { %2024 = vperm.xlu1 %2618, %v1519_v10  }
 0x4e0   :  { %2012 = vperm.xlu2 %2616, %v1515_v2  }
 0x4e1   :  { %v1899_v22 = vpop.permute.xlu1 %1898  ;;  %v1911_v0 = vpop.permute.xlu0 %1910 }
 0x4e2   :  { %v2193_v24 = vperm.slane %v1899_v22, %v3893_v50  ;;  %v1914_v9 = vpop.permute.xlu2 %1913  ;;  %v2201_v43 = vperm.slane %v1911_v0, %v3926_v25 }
 0x4e3   :  { %v2203_v49 = vperm.slane %v1914_v9, %v3939_v12 }
 0x4e4   :  { %v2194_v30 = vsel %vm965_vm6, %v2193_v24, %v2192_v56 }
 0x4e5   :  { %v2196_v45 = vsel %vm969_vm7, %v2195_v3, %v2194_v30 }
 0x4e6   :  { %v2198_v47 = vsel %vm973_vm8, %v2197_v54, %v2196_v45 }
 0x4e7   :  { %2033 = vperm.xlu1 %2618, %v1522_v42  }
 0x4e8   :  { %2021 = vperm.xlu2 %2616, %v1518_v33  }
 0x4e9   :  { %v1908_v15 = vpop.permute.xlu1 %1907  ;;  %v1920_v55 = vpop.permute.xlu0 %1919 }
 0x4ea   :  { %v2199_v4 = vperm.slane %v1908_v15, %v3911_v7  ;;  %v1923_v35 = vpop.permute.xlu2 %1922  ;;  %v2207_v27 = vperm.slane %v1920_v55, %v3971_v62 }
 0x4eb   :  { %v2209_v11 = vperm.slane %v1923_v35, %v3962_v1 }
 0x4ec   :  { %v2200_v29 = vsel %vm977_vm9, %v2199_v4, %v2198_v47 }
 0x4ed   :  { %v2202_v28 = vsel %vm981_vm10, %v2201_v43, %v2200_v29 }
 0x4ee   :  { %v2204_v20 = vsel %vm985_vm11, %v2203_v49, %v2202_v28 }
 0x4f0   :  { %2030 = vperm.xlu2 %2616, %v1521_v13  }
 0x4f1   :  { %v1917_v23 = vpop.permute.xlu1 %1916  ;;  %v1929_v46 = vpop.permute.xlu0 %1928 }
 0x4f2   :  { %v2205_v17 = vperm.slane %v1917_v23, %v3942_v37  ;;  %v1932_v32 = vpop.permute.xlu2 %1931  ;;  %v2213_v18 = vperm.slane %v1929_v46, %v3981_v38 }
 0x4f3   :  { %v2215_v36 = vperm.slane %v1932_v32, %v3965_v6 }
 0x4f4   :  { %v2206_v63 = vsel %vm5739_vm14, %v2205_v17, %v2204_v20 }
 0x4f5   :  { %v2208_v21 = vsel %vm5740_vm15, %v2207_v27, %v2206_v63 }
 0x4f6   :  { %v2210_v56 = vsel %vm5741_vm4, %v2209_v11, %v2208_v21 }
 0x4f9   :  { %v1926_v26 = vpop.permute.xlu1 %1925  ;;  %v1938_v51 = vpop.permute.xlu0 %1937 }
 0x4fa   :  { %v2211_v57 = vperm.slane %v1926_v26, %v3986_v40  ;;  %v1941_v19 = vpop.permute.xlu2 %1940  ;;  %v2219_v10 = vperm.slane %v1938_v51, %v4029_v41 }
 0x4fb   :  { %v2221_v0 = vperm.slane %v1941_v19, %v3876_v53 }
 0x4fc   :  { %v2212_v48 = vsel %vm5744_vm12, %v2211_v57, %v2210_v56 }
 0x4fd   :  { %v2214_v58 = vsel %vm1005_vm0, %v2213_v18, %v2212_v48 }
 0x4fe   :  { %v2216_v60 = vsel %vm1009_vm1, %v2215_v36, %v2214_v58 }
 0x501   :  { %v1935_v44 = vpop.permute.xlu1 %1934  ;;  %v1947_v31 = vpop.permute.xlu0 %1946 }
 0x502   :  { %v2217_v16 = vperm.slane %v1935_v44, %v4062_v61  ;;  %v1950_v8 = vpop.permute.xlu2 %1949  ;;  %v2224_v45 = vperm.slane %v1947_v31, %v3893_v50 }
 0x504   :  { %v2218_v59 = vsel %vm1013_vm2, %v2217_v16, %v2216_v60 }
 0x505   :  { %v2220_v2 = vsel %vm1017_vm3, %v2219_v10, %v2218_v59 }
 0x506   :  { %v2287_v22 = vsel %vm5750_vm13, %v2220_v2, %v2286_v34  ;;  %v2226_v34 = vperm.slane %v1950_v8, %v3899_v52  ;;  %vm5751_vm13 = vcmask 1046534  }
 0x509   :  { %v1944_v24 = vpop.permute.xlu1 %1943  ;;  %v1956_v3 = vpop.permute.xlu0 %1955 }
 0x50a   :  { %v2222_v9 = vperm.slane %v1944_v24, %v3879_v14  ;;  %v1959_v54 = vpop.permute.xlu2 %1958  ;;  %v2230_v35 = vperm.slane %v1956_v3, %v3911_v7 }
 0x50b   :  { %v2232_v20 = vperm.slane %v1959_v54, %v3926_v25 }
 0x50c   :  { %v2223_v30 = vsel %vm961_vm5, %v2222_v9, %v2221_v0 }
 0x50d   :  { %v2225_v47 = vsel %vm965_vm6, %v2224_v45, %v2223_v30 }
 0x50e   :  { %v2227_v4 = vsel %vm969_vm7, %v2226_v34, %v2225_v47 }
 0x511   :  { %v1953_v42 = vpop.permute.xlu1 %1952  ;;  %v1965_v5 = vpop.permute.xlu0 %1964 }
 0x512   :  { %v1968_v33 = vpop.permute.xlu2 %1967  ;;  %v2228_v15 = vperm.slane %v1953_v42, %v3908_v39  ;;  %v2236_v46 = vperm.slane %v1965_v5, %v3942_v37 }
 0x513   :  { %v2238_v11 = vperm.slane %v1968_v33, %v3971_v62 }
 0x514   :  { %v2229_v55 = vsel %vm973_vm8, %v2228_v15, %v2227_v4 }
 0x515   :  { %v2231_v49 = vsel %vm977_vm9, %v2230_v35, %v2229_v55 }
 0x516   :  { %v2233_v23 = vsel %vm981_vm10, %v2232_v20, %v2231_v49 }
 0x519   :  { %v1962_v43 = vpop.permute.xlu1 %1961  ;;  %v1974_v28 = vpop.permute.xlu0 %1973 }
 0x51a   :  { %v2234_v29 = vperm.slane %v1962_v43, %v3939_v12  ;;  %v1977_v13 = vpop.permute.xlu2 %1976  ;;  %v2242_v51 = vperm.slane %v1974_v28, %v3986_v40 }
 0x51b   :  { %v2244_v18 = vperm.slane %v1977_v13, %v3981_v38 }
 0x51c   :  { %v2235_v17 = vsel %vm985_vm11, %v2234_v29, %v2233_v23 }
 0x51d   :  { %v2237_v32 = vsel %vm5739_vm14, %v2236_v46, %v2235_v17 }
 0x51e   :  { %v2239_v56 = vsel %vm5740_vm15, %v2238_v11, %v2237_v32 }
 0x521   :  { %v1971_v27 = vpop.permute.xlu1 %1970  ;;  %v1983_v21 = vpop.permute.xlu0 %1982 }
 0x522   :  { %v2240_v63 = vperm.slane %v1971_v27, %v3962_v1  ;;  %v1986_v26 = vpop.permute.xlu2 %1985  ;;  %v2248_v58 = vperm.slane %v1983_v21, %v4062_v61 }
 0x523   :  { %v2250_v8 = vperm.slane %v1986_v26, %v4029_v41 }
 0x524   :  { %v2241_v57 = vsel %vm5741_vm4, %v2240_v63, %v2239_v56 }
 0x525   :  { %v2243_v19 = vsel %vm5744_vm12, %v2242_v51, %v2241_v57 }
 0x526   :  { %v2245_v60 = vsel %vm1005_vm0, %v2244_v18, %v2243_v19 }
 0x529   :  { %v1980_v36 = vpop.permute.xlu1 %1979  ;;  %v1992_v44 = vpop.permute.xlu0 %1991 }
 0x52a   :  { %v2246_v48 = vperm.slane %v1980_v36, %v3965_v6  ;;  %v1995_v10 = vpop.permute.xlu2 %1994  ;;  %v2253_v30 = vperm.slane %v1992_v44, %v3879_v14 }
 0x52b   :  { %v2255_v5 = vperm.slane %v1995_v10, %v3893_v50 }
 0x52c   :  { %v2247_v16 = vsel %vm1009_vm1, %v2246_v48, %v2245_v60 }
 0x52d   :  { %v2249_v31 = vsel %vm1013_vm2, %v2248_v58, %v2247_v16 }
 0x52e   :  { %v2251_v59 = vsel %vm1017_vm3, %v2250_v8, %v2249_v31 }
 0x52f   :  { %v2288_v24 = vsel %vm5751_vm13, %v2251_v59, %v2287_v22 }
 0x531   :  { %v1989_v2 = vpop.permute.xlu1 %1988  ;;  %v2001_v0 = vpop.permute.xlu0 %2000 }
 0x532   :  { %v2252_v9 = vperm.slane %v1989_v2, %v3876_v53  ;;  %v2004_v3 = vpop.permute.xlu2 %2003  ;;  %v2259_v22 = vperm.slane %v2001_v0, %v3908_v39 }
 0x533   :  { %v2261_v14 = vperm.slane %v2004_v3, %v3911_v7 }
 0x534   :  { %v2254_v45 = vsel %vm961_vm5, %v2253_v30, %v2252_v9  ;;  %vm5752_vm5 = vmmov %vm5739_vm14 }
 0x535   :  { %v2256_v33 = vsel %vm965_vm6, %v2255_v5, %v2254_v45  ;;  %vm5753_vm6 = vmmov %vm5740_vm15 }
 0x539   :  { %v1998_v54 = vpop.permute.xlu1 %1997  ;;  %v2010_v47 = vpop.permute.xlu0 %2009 }
 0x53a   :  { %v2257_v42 = vperm.slane %v1998_v54, %v3899_v52  ;;  %v2013_v4 = vpop.permute.xlu2 %2012  ;;  %v2265_v50 = vperm.slane %v2010_v47, %v3939_v12 }
 0x53b   :  { %v2267_v28 = vperm.slane %v2013_v4, %v3942_v37 }
 0x53c   :  { %v2258_v15 = vsel %vm969_vm7, %v2257_v42, %v2256_v33  ;;  %vm5754_vm7 = vmmov %vm5741_vm4 }
 0x53d   :  { %v2260_v53 = vsel %vm973_vm8, %v2259_v22, %v2258_v15  ;;  %vm5755_vm8 = vmmov %vm5744_vm12 }
 0x53e   :  { %v2262_v35 = vsel %vm977_vm9, %v2261_v14, %v2260_v53  ;;  %vm5756_vm9 = vcmask 1047559  }
 0x541   :  { %v2007_v34 = vpop.permute.xlu1 %2006  ;;  %v2019_v43 = vpop.permute.xlu0 %2018 }
 0x542   :  { %v2263_v55 = vperm.slane %v2007_v34, %v3926_v25  ;;  %v2022_v13 = vpop.permute.xlu2 %2021  ;;  %v2271_v7 = vperm.slane %v2019_v43, %v3962_v1 }
 0x543   :  { %v2273_v12 = vperm.slane %v2022_v13, %v3986_v40 }
 0x544   :  { %v2264_v52 = vsel %vm981_vm10, %v2263_v55, %v2262_v35 }
 0x545   :  { %v2266_v29 = vsel %vm985_vm11, %v2265_v50, %v2264_v52 }
 0x546   :  { %v2268_v20 = vsel %vm5752_vm5, %v2267_v28, %v2266_v29 }
 0x549   :  { %v2016_v49 = vpop.permute.xlu1 %2015  ;;  %v2028_v32 = vpop.permute.xlu0 %2027 }
 0x54a   :  { %v2269_v39 = vperm.slane %v2016_v49, %v3971_v62  ;;  %v2277_v37 = vperm.slane %v2028_v32, %v3965_v6  ;;  %v2031_v11 = vpop.permute.xlu2 %2030 }
 0x54b   :  { %v2279_v21 = vperm.slane %v2031_v11, %v4062_v61 }
 0x54c   :  { %v2270_v25 = vsel %vm5753_vm6, %v2269_v39, %v2268_v20 }
 0x54d   :  { %v2272_v23 = vsel %vm5754_vm7, %v2271_v7, %v2270_v25 }
 0x54e   :  { %v2274_v27 = vsel %vm5755_vm8, %v2273_v12, %v2272_v23 }
 0x551   :  { %v2025_v17 = vpop.permute.xlu1 %2024 }
 0x552   :  { %v2275_v46 = vperm.slane %v2025_v17, %v3981_v38 }
 0x554   :  { %v2276_v62 = vsel %vm1005_vm0, %v2275_v46, %v2274_v27 }
 0x555   :  { %v2278_v63 = vsel %vm1009_vm1, %v2277_v37, %v2276_v62 }
 0x556   :  { %v2280_v26 = vsel %vm1013_vm2, %v2279_v21, %v2278_v63 }
 0x559   :  { %v2034_v1 = vpop.permute.xlu1 %2033 }
 0x55a   :  { %v2281_v56 = vperm.slane %v2034_v1, %v4029_v41 }
 0x55c   :  { %v2282_v40 = vsel %vm1017_vm3, %v2281_v56, %v2280_v26 }
 0x55d   :  { %v2289_v38 = vsel %vm5756_vm9, %v2282_v40, %v2288_v24 }
 0x55e   :  { %2291 = vst [vmem:[%s5100_s2] sm:$0xff] %v2289_v38 }

</bundles_post_ra>
